<compile_context>
chip_gen: v5e
topology: v5e:2x2
jax: 0.10.0
libtpu: 0.0.40
codegen_flags: <defaults>
</compile_context>

<pallas_src>
import numpy as np
import jax
import jax.numpy as jnp
from jax import lax
from jax.experimental import pallas as pl
from jax.experimental.pallas import tpu as pltpu


IMG = 32                     # LeNet's 16*5*5 flatten pins the input to 3x32x32
NB = IMG * IMG               # 1024 flat spatial positions per batch element

# Minimal working widths along the flat-spatial (lane) axis.  Valid final
# features live at pooled-conv2 flat positions <= 528; chaining the static
# shift reads backwards gives the required extents:
#   pool2 reads y2  <= 528+66  = 594   -> CONV2_W >= SEL_W+66
#   conv2 reads p1  <= 594+264 = 858   -> POOL1_W >= CONV2_W+264
#   pool1 reads y1  <= 858+33  = 891   -> CONV1_W >= POOL1_W+33
#   conv1 reads x   <= 891+132 = 1023  -> X_W     >= CONV1_W+132 (and >= 1024)
X_W     = 1152               # zero-padded per-element input width (9*128)
CONV1_W = 960                # conv1+relu output width
POOL1_W = 904                # pool1 output width (deferred decimation)
CONV2_W = 640                # conv2+relu output width
SEL_W   = 544                # pooled-conv2 slab width fed to the gather-matmul
K_IM    = 25 * 8             # im2col contraction depth (taps x padded channels)


# ----------------------------- Pallas kernel ----------------------------------

def _lenet_kernel(x_ref, w1_ref, b1_ref, w2_ref, b2_ref, sel_ref,
                  fw1_ref, fb1_ref, fw2_ref, fb2_ref, fw3_ref, fb3_ref,
                  o_ref,
                  xb_ref, im_ref, y1_ref, p1_ref, y2_ref, ft_ref):
    """Full LeNet forward for one batch element.

    Layout: channels on sublanes, flat spatial index h*IMG+w on lanes.
      x_ref  : (8, X_W)        f32   input, channels padded 3->8, zero halo
      w1_ref : (8, 200)        bf16  conv1 weights, [c_out, 8*(5*kh+kw)+c_in]
      b1_ref : (8, 1)          f32
      w2_ref : (16, 200)       bf16
      b2_ref : (16, 1)         f32
      sel_ref: (SEL_W, 32)     bf16  0/1 gather matrix: 128*i+4*j -> lane i*5+j
      fw1_ref: (16, 32, 128)   bf16  fc1, per-input-channel slabs
      fw2/3  : (128, 128)      bf16  fc2/fc3, lane-padded
      fb*    : (1, 128)        f32
      o_ref  : (1, 10)         f32   softmax probabilities
    """
    # ---- single hoisted f32->bf16 cast of the input slab -------------------
    xb_ref[...] = x_ref[...].astype(jnp.bfloat16)

    # ---- conv1: VMEM im2col (K=200) + ONE MXU matmul, bias+relu in f32 ------
    for t in range(25):
        kh, kw = divmod(t, 5)
        s = kh * IMG + kw
        im_ref[8 * t:8 * t + 8, :] = xb_ref[:, s:s + CONV1_W]
    y1 = jnp.dot(w1_ref[...], im_ref[...], preferred_element_type=jnp.float32)
    y1_ref[...] = jnp.maximum(y1 + b1_ref[...], 0.0)

    # ---- pool1: 2x2/s2 max, decimation deferred; single bf16 cast on store --
    p1 = jnp.maximum(
        jnp.maximum(y1_ref[:, 0:POOL1_W], y1_ref[:, 1:1 + POOL1_W]),
        jnp.maximum(y1_ref[:, IMG:IMG + POOL1_W],
                    y1_ref[:, IMG + 1:IMG + 1 + POOL1_W]))
    p1_ref[...] = p1.astype(jnp.bfloat16)

    # ---- conv2: same im2col scratch, taps doubled (stride-2 embedded) -------
    for t in range(25):
        kh, kw = divmod(t, 5)
        s = 2 * (kh * IMG + kw)
        im_ref[8 * t:8 * t + 8, 0:CONV2_W] = p1_ref[:, s:s + CONV2_W]
    y2 = jnp.dot(w2_ref[...], im_ref[:, 0:CONV2_W],
                 preferred_element_type=jnp.float32)
    y2_ref[...] = jnp.maximum(y2 + b2_ref[...], 0.0)

    # ---- pool2 + gather-as-matmul: (16,SEL_W) @ (SEL_W,32) -> (16,32) feats --
    y2p = jnp.maximum(
        jnp.maximum(y2_ref[:, 0:SEL_W], y2_ref[:, 2:2 + SEL_W]),
        jnp.maximum(y2_ref[:, 2 * IMG:2 * IMG + SEL_W],
                    y2_ref[:, 2 * IMG + 2:2 * IMG + 2 + SEL_W]))
    ft_ref[...] = jnp.dot(y2p.astype(jnp.bfloat16), sel_ref[...],
                          preferred_element_type=jnp.float32)

    # ---- fc1 (NCHW flatten folded into per-channel weight slabs) + relu -----
    h = fb1_ref[...]                                            # (1, 128) f32
    for c in range(16):
        h = h + jnp.dot(ft_ref[c:c + 1, :].astype(jnp.bfloat16), fw1_ref[c],
                        preferred_element_type=jnp.float32)
    h = jnp.maximum(h, 0.0).astype(jnp.bfloat16)
    # dropout1: p = 0.0 in the reference module -> identity.

    # ---- fc2 -> relu -> fc3 -> exact masked softmax --------------------------
    h = jnp.dot(h, fw2_ref[...], preferred_element_type=jnp.float32) + fb2_ref[...]
    h = jnp.maximum(h, 0.0).astype(jnp.bfloat16)
    # dropout2: identity (p = 0.0).
    logits = jnp.dot(h, fw3_ref[...],
                     preferred_element_type=jnp.float32) + fb3_ref[...]
    lane = lax.broadcasted_iota(jnp.int32, (1, 128), 1)
    logits = jnp.where(lane < 10, logits, -jnp.inf)             # mask pad lanes
    m = jnp.max(logits, axis=-1, keepdims=True)
    e = jnp.exp(logits - m)
    probs = e / jnp.sum(e, axis=-1, keepdims=True)              # exact normalize
    o_ref[...] = probs[:, 0:10]


def lenet_pallas(xp, prep):
    """xp: (B, 8, X_W) f32 -> (B, 10) softmax probabilities."""
    B = xp.shape[0]
    out = pl.pallas_call(
        _lenet_kernel,
        out_shape=jax.ShapeDtypeStruct((B, 1, 10), jnp.float32),
        grid=(B,),
        in_specs=[
            pl.BlockSpec((None, 8, X_W), lambda b: (b, 0, 0)),
            pl.BlockSpec((8, K_IM), lambda b: (0, 0)),
            pl.BlockSpec((8, 1), lambda b: (0, 0)),
            pl.BlockSpec((16, K_IM), lambda b: (0, 0)),
            pl.BlockSpec((16, 1), lambda b: (0, 0)),
            pl.BlockSpec((SEL_W, 32), lambda b: (0, 0)),
            pl.BlockSpec((16, 32, 128), lambda b: (0, 0, 0)),
            pl.BlockSpec((1, 128), lambda b: (0, 0)),
            pl.BlockSpec((128, 128), lambda b: (0, 0)),
            pl.BlockSpec((1, 128), lambda b: (0, 0)),
            pl.BlockSpec((128, 128), lambda b: (0, 0)),
            pl.BlockSpec((1, 128), lambda b: (0, 0)),
        ],
        out_specs=pl.BlockSpec((None, 1, 10), lambda b: (b, 0, 0)),
        scratch_shapes=[
            pltpu.VMEM((8, X_W), jnp.bfloat16),        # xb   : bf16 input slab
            pltpu.VMEM((K_IM, CONV1_W), jnp.bfloat16), # im2col (shared by convs)
            pltpu.VMEM((8, CONV1_W), jnp.float32),     # y1
            pltpu.VMEM((8, POOL1_W), jnp.bfloat16),    # p1 (re-read 25x -> bf16)
            pltpu.VMEM((16, CONV2_W), jnp.float32),    # y2
            pltpu.VMEM((16, 32), jnp.float32),         # compacted features
        ],
        compiler_params=pltpu.CompilerParams(
            dimension_semantics=("parallel",)),
    )(xp, prep["conv1_w"], prep["conv1_b"], prep["conv2_w"], prep["conv2_b"],
      prep["sel"], prep["fc1_w"], prep["fc1_b"], prep["fc2_w"], prep["fc2_b"],
      prep["fc3_w"], prep["fc3_b"])
    return out.reshape(B, 10)


# ------------------------------ init / prepare --------------------------------

def orthogonal(key, shape):
    """Matches nn.init.orthogonal_ semantics (flatten trailing dims)."""
    rows = shape[0]
    cols = int(np.prod(shape[1:]))
    n, m = max(rows, cols), min(rows, cols)
    a = jax.random.normal(key, (n, m), dtype=jnp.float32)
    q, r = jnp.linalg.qr(a)
    q = q * jnp.sign(jnp.diagonal(r))
    if rows < cols:
        q = q.T
    return q.reshape(shape).astype(jnp.float32)


def _uniform_bias(key, fan_in, n):
    bound = 1.0 / np.sqrt(fan_in)
    return jax.random.uniform(key, (n,), jnp.float32, -bound, bound)


def init_lenet_params(key, in_channels=3):
    """Raw parameters in PyTorch layouts (OIHW conv weights, (out,in) fc)."""
    ks = jax.random.split(key, 10)
    p = {}
    p["conv1_w"] = orthogonal(ks[0], (6, in_channels, 5, 5))
    p["conv1_b"] = _uniform_bias(ks[1], in_channels * 25, 6)
    p["conv2_w"] = orthogonal(ks[2], (16, 6, 5, 5))
    p["conv2_b"] = _uniform_bias(ks[3], 6 * 25, 16)
    p["fc1_w"] = orthogonal(ks[4], (120, 16 * 5 * 5))
    p["fc1_b"] = _uniform_bias(ks[5], 16 * 5 * 5, 120)
    p["fc2_w"] = orthogonal(ks[6], (84, 120))
    p["fc2_b"] = _uniform_bias(ks[7], 120, 84)
    p["fc3_w"] = orthogonal(ks[8], (10, 84))
    p["fc3_b"] = _uniform_bias(ks[9], 84, 10)
    return p


def prepare_params(raw):
    """One-time weight preprocessing: flatten/pad/transpose + bf16 cast."""
    def conv_prep(w, cin_pad, cout_pad):
        co, ci, kh, kw = w.shape
        wp = jnp.pad(w, ((0, cout_pad - co), (0, cin_pad - ci), (0, 0), (0, 0)))
        # row index of the im2col slab is 8*(5*kh+kw) + c_in
        wp = jnp.transpose(wp, (0, 2, 3, 1)).reshape(cout_pad, kh * kw * cin_pad)
        return wp.astype(jnp.bfloat16)

    # fc1: fw1[c, m, n] = W1[n, c*25 + m]  (m = i*5+j; pad 25->32 lanes, 120->128)
    w1 = raw["fc1_w"].reshape(120, 16, 25)
    w1 = jnp.transpose(w1, (1, 2, 0))
    w1 = jnp.pad(w1, ((0, 0), (0, 32 - 25), (0, 128 - 120)))

    # constant 0/1 gather matrix: pooled-conv2 flat pos 128*i+4*j -> lane i*5+j
    sel = np.zeros((SEL_W, 32), np.float32)
    for i in range(5):
        for j in range(5):
            sel[128 * i + 4 * j, 5 * i + j] = 1.0

    def fc_pad(w, b, kin, kout):
        wt = jnp.pad(w.T, ((0, kin - w.shape[1]), (0, kout - w.shape[0])))
        bt = jnp.pad(b, (0, kout - b.shape[0])).reshape(1, kout)
        return wt.astype(jnp.bfloat16), bt

    fw2, fb2 = fc_pad(raw["fc2_w"], raw["fc2_b"], 128, 128)
    fw3, fb3 = fc_pad(raw["fc3_w"], raw["fc3_b"], 128, 128)
    return {
        "conv1_w": conv_prep(raw["conv1_w"], 8, 8),                # (8, 200)
        "conv1_b": jnp.pad(raw["conv1_b"], (0, 2)).reshape(8, 1),
        "conv2_w": conv_prep(raw["conv2_w"], 8, 16),               # (16, 200)
        "conv2_b": raw["conv2_b"].reshape(16, 1),
        "sel": jnp.asarray(sel, dtype=jnp.bfloat16),               # (544, 32)
        "fc1_w": w1.astype(jnp.bfloat16),                          # (16, 32, 128)
        "fc1_b": jnp.pad(raw["fc1_b"], (0, 8)).reshape(1, 128),
        "fc2_w": fw2, "fc2_b": fb2,                                # (128,128),(1,128)
        "fc3_w": fw3, "fc3_b": fb3,
    }


# ------------------------------- forward pass ---------------------------------

def lenet_forward(prep, x_nchw):
    """x_nchw: (B, 3, 32, 32) float32 -> (B, 10) softmax probabilities."""
    x = x_nchw.astype(jnp.float32)
    B, C = x.shape[0], x.shape[1]
    # (B, C, 32, 32) -> (B, 8, X_W): channels padded to 8 sublanes, flat spatial
    # (h*32 + w) on lanes, zero halo so all in-kernel shifted reads are in bounds.
    xp = jnp.pad(x.reshape(B, C, NB), ((0, 0), (0, 8 - C), (0, X_W - NB)))
    return lenet_pallas(xp, prep)


# ------------------------------ pure-JAX reference ----------------------------

def lenet_reference(raw, x):
    dn = ("NCHW", "OIHW", "NCHW")
    y = lax.conv_general_dilated(x, raw["conv1_w"], (1, 1), "VALID",
                                 dimension_numbers=dn)
    y = jnp.maximum(y + raw["conv1_b"][None, :, None, None], 0.0)
    y = lax.reduce_window(y, -jnp.inf, lax.max, (1, 1, 2, 2), (1, 1, 2, 2),
                          "VALID")
    y = lax.conv_general_dilated(y, raw["conv2_w"], (1, 1), "VALID",
                                 dimension_numbers=dn)
    y = jnp.maximum(y + raw["conv2_b"][None, :, None, None], 0.0)
    y = lax.reduce_window(y, -jnp.inf, lax.max, (1, 1, 2, 2), (1, 1, 2, 2),
                          "VALID")
    y = y.reshape(y.shape[0], -1)
    y = jnp.maximum(y @ raw["fc1_w"].T + raw["fc1_b"], 0.0)
    y = jnp.maximum(y @ raw["fc2_w"].T + raw["fc2_b"], 0.0)
    return jax.nn.softmax(y @ raw["fc3_w"].T + raw["fc3_b"], axis=-1)


# ---------------------------------- main ---------------------------------------

if __name__ == "__main__":
    key = jax.random.PRNGKey(0)
    k_params, k_data = jax.random.split(key)

    # LeNet's 16*5*5 flatten pins the input spatial size to 3x32x32; batch=2.
    x = jax.random.normal(k_data, (2, 3, 32, 32), dtype=jnp.float32)
    raw = init_lenet_params(k_params, in_channels=3)
    prep = prepare_params(raw)          # one-time weight layout prep (outside jit)

    out = jax.jit(lenet_forward)(prep, x)
    out = jax.block_until_ready(out)

    assert out.shape == (2, 10)
    # Exact softmax normalization (plain divide in the epilogue).
    np.testing.assert_allclose(np.asarray(jnp.sum(out, axis=1)), 1.0, atol=1e-5)
    # Match the f32 XLA reference (bf16 MXU operands -> loose tolerance).
    ref = np.asarray(jax.jit(lenet_reference)(raw, x))
    np.testing.assert_allclose(np.asarray(out), ref, atol=5e-2)

    print("KERNEL_OK")
</pallas_src>

<mosaic_0001>
module attributes {stable_mosaic.version = 11 : i64} {
  func.func @_lenet_kernel(%arg0: i32, %arg1: memref<1x8x1152xf32, #tpu.memory_space<vmem>>, %arg2: memref<8x200xbf16, #tpu.memory_space<vmem>>, %arg3: memref<8x1xf32, #tpu.memory_space<vmem>>, %arg4: memref<16x200xbf16, #tpu.memory_space<vmem>>, %arg5: memref<16x1xf32, #tpu.memory_space<vmem>>, %arg6: memref<544x32xbf16, #tpu.memory_space<vmem>>, %arg7: memref<16x32x128xbf16, #tpu.memory_space<vmem>>, %arg8: memref<1x128xf32, #tpu.memory_space<vmem>>, %arg9: memref<128x128xbf16, #tpu.memory_space<vmem>>, %arg10: memref<1x128xf32, #tpu.memory_space<vmem>>, %arg11: memref<128x128xbf16, #tpu.memory_space<vmem>>, %arg12: memref<1x128xf32, #tpu.memory_space<vmem>>, %arg13: memref<1x1x10xf32, #tpu.memory_space<vmem>>, %arg14: memref<8x1152xbf16, #tpu.memory_space<vmem>>, %arg15: memref<200x960xbf16, #tpu.memory_space<vmem>>, %arg16: memref<8x960xf32, #tpu.memory_space<vmem>>, %arg17: memref<8x904xbf16, #tpu.memory_space<vmem>>, %arg18: memref<16x640xf32, #tpu.memory_space<vmem>>, %arg19: memref<16x32xf32, #tpu.memory_space<vmem>>) attributes {dimension_semantics = [#tpu.dimension_semantics<parallel>], iteration_bounds = array<i64: 2>, scalar_prefetch = 0 : i64, scratch_operands = 6 : i64, tpu.core_type = #tpu.core_type<tc>, window_params = [{transform_indices = @transform_0, window_bounds = array<i64: 1, 8, 1152>}, {pipeline_mode = #tpu.pipeline_mode<synchronous>, transform_indices = @transform_1, window_bounds = array<i64: 8, 200>}, {pipeline_mode = #tpu.pipeline_mode<synchronous>, transform_indices = @transform_2, window_bounds = array<i64: 8, 1>}, {pipeline_mode = #tpu.pipeline_mode<synchronous>, transform_indices = @transform_3, window_bounds = array<i64: 16, 200>}, {pipeline_mode = #tpu.pipeline_mode<synchronous>, transform_indices = @transform_4, window_bounds = array<i64: 16, 1>}, {pipeline_mode = #tpu.pipeline_mode<synchronous>, transform_indices = @transform_5, window_bounds = array<i64: 544, 32>}, {pipeline_mode = #tpu.pipeline_mode<synchronous>, transform_indices = @transform_6, window_bounds = array<i64: 16, 32, 128>}, {pipeline_mode = #tpu.pipeline_mode<synchronous>, transform_indices = @transform_7, window_bounds = array<i64: 1, 128>}, {pipeline_mode = #tpu.pipeline_mode<synchronous>, transform_indices = @transform_8, window_bounds = array<i64: 128, 128>}, {pipeline_mode = #tpu.pipeline_mode<synchronous>, transform_indices = @transform_9, window_bounds = array<i64: 1, 128>}, {pipeline_mode = #tpu.pipeline_mode<synchronous>, transform_indices = @transform_10, window_bounds = array<i64: 128, 128>}, {pipeline_mode = #tpu.pipeline_mode<synchronous>, transform_indices = @transform_11, window_bounds = array<i64: 1, 128>}, {transform_indices = @transform_12, window_bounds = array<i64: 1, 1, 10>}]} {
    %c0 = arith.constant 0 : index
    %c0_0 = arith.constant 0 : index
    %c0_1 = arith.constant 0 : index
    %0 = vector.load %arg1[%c0, %c0_0, %c0_1] : memref<1x8x1152xf32, #tpu.memory_space<vmem>>, vector<1x8x1152xf32>
    %1 = vector.shape_cast %0 : vector<1x8x1152xf32> to vector<8x1152xf32>
    %2 = arith.truncf %1 : vector<8x1152xf32> to vector<8x1152xbf16>
    %c0_2 = arith.constant 0 : index
    %c0_3 = arith.constant 0 : index
    %3 = vector.load %arg14[%c0_2, %c0_3] : memref<8x1152xbf16, #tpu.memory_space<vmem>>, vector<8x1152xbf16>
    tpu.vector_store %arg14[%c0_2, %c0_3], %2 {strides = array<i32>} : memref<8x1152xbf16, #tpu.memory_space<vmem>>, vector<8x1152xbf16>,
    %c0_4 = arith.constant 0 : index
    %c0_5 = arith.constant 0 : index
    %4 = vector.load %arg14[%c0_4, %c0_5] : memref<8x1152xbf16, #tpu.memory_space<vmem>>, vector<8x960xbf16>
    %c0_6 = arith.constant 0 : index
    %c0_7 = arith.constant 0 : index
    %5 = vector.load %arg15[%c0_6, %c0_7] : memref<200x960xbf16, #tpu.memory_space<vmem>>, vector<8x960xbf16>
    tpu.vector_store %arg15[%c0_6, %c0_7], %4 {strides = array<i32>} : memref<200x960xbf16, #tpu.memory_space<vmem>>, vector<8x960xbf16>,
    %c0_8 = arith.constant 0 : index
    %c1 = arith.constant 1 : index
    %6 = vector.load %arg14[%c0_8, %c1] : memref<8x1152xbf16, #tpu.memory_space<vmem>>, vector<8x960xbf16>
    %c8 = arith.constant 8 : index
    %c0_9 = arith.constant 0 : index
    %7 = vector.load %arg15[%c8, %c0_9] : memref<200x960xbf16, #tpu.memory_space<vmem>>, vector<8x960xbf16>
    tpu.vector_store %arg15[%c8, %c0_9], %6 {strides = array<i32>} : memref<200x960xbf16, #tpu.memory_space<vmem>>, vector<8x960xbf16>,
    %c0_10 = arith.constant 0 : index
    %c2 = arith.constant 2 : index
    %8 = vector.load %arg14[%c0_10, %c2] : memref<8x1152xbf16, #tpu.memory_space<vmem>>, vector<8x960xbf16>
    %c16 = arith.constant 16 : index
    %c0_11 = arith.constant 0 : index
    %9 = vector.load %arg15[%c16, %c0_11] : memref<200x960xbf16, #tpu.memory_space<vmem>>, vector<8x960xbf16>
    tpu.vector_store %arg15[%c16, %c0_11], %8 {strides = array<i32>} : memref<200x960xbf16, #tpu.memory_space<vmem>>, vector<8x960xbf16>,
    %c0_12 = arith.constant 0 : index
    %c3 = arith.constant 3 : index
    %10 = vector.load %arg14[%c0_12, %c3] : memref<8x1152xbf16, #tpu.memory_space<vmem>>, vector<8x960xbf16>
    %c24 = arith.constant 24 : index
    %c0_13 = arith.constant 0 : index
    %11 = vector.load %arg15[%c24, %c0_13] : memref<200x960xbf16, #tpu.memory_space<vmem>>, vector<8x960xbf16>
    tpu.vector_store %arg15[%c24, %c0_13], %10 {strides = array<i32>} : memref<200x960xbf16, #tpu.memory_space<vmem>>, vector<8x960xbf16>,
    %c0_14 = arith.constant 0 : index
    %c4 = arith.constant 4 : index
    %12 = vector.load %arg14[%c0_14, %c4] : memref<8x1152xbf16, #tpu.memory_space<vmem>>, vector<8x960xbf16>
    %c32 = arith.constant 32 : index
    %c0_15 = arith.constant 0 : index
    %13 = vector.load %arg15[%c32, %c0_15] : memref<200x960xbf16, #tpu.memory_space<vmem>>, vector<8x960xbf16>
    tpu.vector_store %arg15[%c32, %c0_15], %12 {strides = array<i32>} : memref<200x960xbf16, #tpu.memory_space<vmem>>, vector<8x960xbf16>,
    %c0_16 = arith.constant 0 : index
    %c32_17 = arith.constant 32 : index
    %14 = vector.load %arg14[%c0_16, %c32_17] : memref<8x1152xbf16, #tpu.memory_space<vmem>>, vector<8x960xbf16>
    %c40 = arith.constant 40 : index
    %c0_18 = arith.constant 0 : index
    %15 = vector.load %arg15[%c40, %c0_18] : memref<200x960xbf16, #tpu.memory_space<vmem>>, vector<8x960xbf16>
    tpu.vector_store %arg15[%c40, %c0_18], %14 {strides = array<i32>} : memref<200x960xbf16, #tpu.memory_space<vmem>>, vector<8x960xbf16>,
    %c0_19 = arith.constant 0 : index
    %c33 = arith.constant 33 : index
    %16 = vector.load %arg14[%c0_19, %c33] : memref<8x1152xbf16, #tpu.memory_space<vmem>>, vector<8x960xbf16>
    %c48 = arith.constant 48 : index
    %c0_20 = arith.constant 0 : index
    %17 = vector.load %arg15[%c48, %c0_20] : memref<200x960xbf16, #tpu.memory_space<vmem>>, vector<8x960xbf16>
    tpu.vector_store %arg15[%c48, %c0_20], %16 {strides = array<i32>} : memref<200x960xbf16, #tpu.memory_space<vmem>>, vector<8x960xbf16>,
    %c0_21 = arith.constant 0 : index
    %c34 = arith.constant 34 : index
    %18 = vector.load %arg14[%c0_21, %c34] : memref<8x1152xbf16, #tpu.memory_space<vmem>>, vector<8x960xbf16>
    %c56 = arith.constant 56 : index
    %c0_22 = arith.constant 0 : index
    %19 = vector.load %arg15[%c56, %c0_22] : memref<200x960xbf16, #tpu.memory_space<vmem>>, vector<8x960xbf16>
    tpu.vector_store %arg15[%c56, %c0_22], %18 {strides = array<i32>} : memref<200x960xbf16, #tpu.memory_space<vmem>>, vector<8x960xbf16>,
    %c0_23 = arith.constant 0 : index
    %c35 = arith.constant 35 : index
    %20 = vector.load %arg14[%c0_23, %c35] : memref<8x1152xbf16, #tpu.memory_space<vmem>>, vector<8x960xbf16>
    %c64 = arith.constant 64 : index
    %c0_24 = arith.constant 0 : index
    %21 = vector.load %arg15[%c64, %c0_24] : memref<200x960xbf16, #tpu.memory_space<vmem>>, vector<8x960xbf16>
    tpu.vector_store %arg15[%c64, %c0_24], %20 {strides = array<i32>} : memref<200x960xbf16, #tpu.memory_space<vmem>>, vector<8x960xbf16>,
    %c0_25 = arith.constant 0 : index
    %c36 = arith.constant 36 : index
    %22 = vector.load %arg14[%c0_25, %c36] : memref<8x1152xbf16, #tpu.memory_space<vmem>>, vector<8x960xbf16>
    %c72 = arith.constant 72 : index
    %c0_26 = arith.constant 0 : index
    %23 = vector.load %arg15[%c72, %c0_26] : memref<200x960xbf16, #tpu.memory_space<vmem>>, vector<8x960xbf16>
    tpu.vector_store %arg15[%c72, %c0_26], %22 {strides = array<i32>} : memref<200x960xbf16, #tpu.memory_space<vmem>>, vector<8x960xbf16>,
    %c0_27 = arith.constant 0 : index
    %c64_28 = arith.constant 64 : index
    %24 = vector.load %arg14[%c0_27, %c64_28] : memref<8x1152xbf16, #tpu.memory_space<vmem>>, vector<8x960xbf16>
    %c80 = arith.constant 80 : index
    %c0_29 = arith.constant 0 : index
    %25 = vector.load %arg15[%c80, %c0_29] : memref<200x960xbf16, #tpu.memory_space<vmem>>, vector<8x960xbf16>
    tpu.vector_store %arg15[%c80, %c0_29], %24 {strides = array<i32>} : memref<200x960xbf16, #tpu.memory_space<vmem>>, vector<8x960xbf16>,
    %c0_30 = arith.constant 0 : index
    %c65 = arith.constant 65 : index
    %26 = vector.load %arg14[%c0_30, %c65] : memref<8x1152xbf16, #tpu.memory_space<vmem>>, vector<8x960xbf16>
    %c88 = arith.constant 88 : index
    %c0_31 = arith.constant 0 : index
    %27 = vector.load %arg15[%c88, %c0_31] : memref<200x960xbf16, #tpu.memory_space<vmem>>, vector<8x960xbf16>
    tpu.vector_store %arg15[%c88, %c0_31], %26 {strides = array<i32>} : memref<200x960xbf16, #tpu.memory_space<vmem>>, vector<8x960xbf16>,
    %c0_32 = arith.constant 0 : index
    %c66 = arith.constant 66 : index
    %28 = vector.load %arg14[%c0_32, %c66] : memref<8x1152xbf16, #tpu.memory_space<vmem>>, vector<8x960xbf16>
    %c96 = arith.constant 96 : index
    %c0_33 = arith.constant 0 : index
    %29 = vector.load %arg15[%c96, %c0_33] : memref<200x960xbf16, #tpu.memory_space<vmem>>, vector<8x960xbf16>
    tpu.vector_store %arg15[%c96, %c0_33], %28 {strides = array<i32>} : memref<200x960xbf16, #tpu.memory_space<vmem>>, vector<8x960xbf16>,
    %c0_34 = arith.constant 0 : index
    %c67 = arith.constant 67 : index
    %30 = vector.load %arg14[%c0_34, %c67] : memref<8x1152xbf16, #tpu.memory_space<vmem>>, vector<8x960xbf16>
    %c104 = arith.constant 104 : index
    %c0_35 = arith.constant 0 : index
    %31 = vector.load %arg15[%c104, %c0_35] : memref<200x960xbf16, #tpu.memory_space<vmem>>, vector<8x960xbf16>
    tpu.vector_store %arg15[%c104, %c0_35], %30 {strides = array<i32>} : memref<200x960xbf16, #tpu.memory_space<vmem>>, vector<8x960xbf16>,
    %c0_36 = arith.constant 0 : index
    %c68 = arith.constant 68 : index
    %32 = vector.load %arg14[%c0_36, %c68] : memref<8x1152xbf16, #tpu.memory_space<vmem>>, vector<8x960xbf16>
    %c112 = arith.constant 112 : index
    %c0_37 = arith.constant 0 : index
    %33 = vector.load %arg15[%c112, %c0_37] : memref<200x960xbf16, #tpu.memory_space<vmem>>, vector<8x960xbf16>
    tpu.vector_store %arg15[%c112, %c0_37], %32 {strides = array<i32>} : memref<200x960xbf16, #tpu.memory_space<vmem>>, vector<8x960xbf16>,
    %c0_38 = arith.constant 0 : index
    %c96_39 = arith.constant 96 : index
    %34 = vector.load %arg14[%c0_38, %c96_39] : memref<8x1152xbf16, #tpu.memory_space<vmem>>, vector<8x960xbf16>
    %c120 = arith.constant 120 : index
    %c0_40 = arith.constant 0 : index
    %35 = vector.load %arg15[%c120, %c0_40] : memref<200x960xbf16, #tpu.memory_space<vmem>>, vector<8x960xbf16>
    tpu.vector_store %arg15[%c120, %c0_40], %34 {strides = array<i32>} : memref<200x960xbf16, #tpu.memory_space<vmem>>, vector<8x960xbf16>,
    %c0_41 = arith.constant 0 : index
    %c97 = arith.constant 97 : index
    %36 = vector.load %arg14[%c0_41, %c97] : memref<8x1152xbf16, #tpu.memory_space<vmem>>, vector<8x960xbf16>
    %c128 = arith.constant 128 : index
    %c0_42 = arith.constant 0 : index
    %37 = vector.load %arg15[%c128, %c0_42] : memref<200x960xbf16, #tpu.memory_space<vmem>>, vector<8x960xbf16>
    tpu.vector_store %arg15[%c128, %c0_42], %36 {strides = array<i32>} : memref<200x960xbf16, #tpu.memory_space<vmem>>, vector<8x960xbf16>,
    %c0_43 = arith.constant 0 : index
    %c98 = arith.constant 98 : index
    %38 = vector.load %arg14[%c0_43, %c98] : memref<8x1152xbf16, #tpu.memory_space<vmem>>, vector<8x960xbf16>
    %c136 = arith.constant 136 : index
    %c0_44 = arith.constant 0 : index
    %39 = vector.load %arg15[%c136, %c0_44] : memref<200x960xbf16, #tpu.memory_space<vmem>>, vector<8x960xbf16>
    tpu.vector_store %arg15[%c136, %c0_44], %38 {strides = array<i32>} : memref<200x960xbf16, #tpu.memory_space<vmem>>, vector<8x960xbf16>,
    %c0_45 = arith.constant 0 : index
    %c99 = arith.constant 99 : index
    %40 = vector.load %arg14[%c0_45, %c99] : memref<8x1152xbf16, #tpu.memory_space<vmem>>, vector<8x960xbf16>
    %c144 = arith.constant 144 : index
    %c0_46 = arith.constant 0 : index
    %41 = vector.load %arg15[%c144, %c0_46] : memref<200x960xbf16, #tpu.memory_space<vmem>>, vector<8x960xbf16>
    tpu.vector_store %arg15[%c144, %c0_46], %40 {strides = array<i32>} : memref<200x960xbf16, #tpu.memory_space<vmem>>, vector<8x960xbf16>,
    %c0_47 = arith.constant 0 : index
    %c100 = arith.constant 100 : index
    %42 = vector.load %arg14[%c0_47, %c100] : memref<8x1152xbf16, #tpu.memory_space<vmem>>, vector<8x960xbf16>
    %c152 = arith.constant 152 : index
    %c0_48 = arith.constant 0 : index
    %43 = vector.load %arg15[%c152, %c0_48] : memref<200x960xbf16, #tpu.memory_space<vmem>>, vector<8x960xbf16>
    tpu.vector_store %arg15[%c152, %c0_48], %42 {strides = array<i32>} : memref<200x960xbf16, #tpu.memory_space<vmem>>, vector<8x960xbf16>,
    %c0_49 = arith.constant 0 : index
    %c128_50 = arith.constant 128 : index
    %44 = vector.load %arg14[%c0_49, %c128_50] : memref<8x1152xbf16, #tpu.memory_space<vmem>>, vector<8x960xbf16>
    %c160 = arith.constant 160 : index
    %c0_51 = arith.constant 0 : index
    %45 = vector.load %arg15[%c160, %c0_51] : memref<200x960xbf16, #tpu.memory_space<vmem>>, vector<8x960xbf16>
    tpu.vector_store %arg15[%c160, %c0_51], %44 {strides = array<i32>} : memref<200x960xbf16, #tpu.memory_space<vmem>>, vector<8x960xbf16>,
    %c0_52 = arith.constant 0 : index
    %c129 = arith.constant 129 : index
    %46 = vector.load %arg14[%c0_52, %c129] : memref<8x1152xbf16, #tpu.memory_space<vmem>>, vector<8x960xbf16>
    %c168 = arith.constant 168 : index
    %c0_53 = arith.constant 0 : index
    %47 = vector.load %arg15[%c168, %c0_53] : memref<200x960xbf16, #tpu.memory_space<vmem>>, vector<8x960xbf16>
    tpu.vector_store %arg15[%c168, %c0_53], %46 {strides = array<i32>} : memref<200x960xbf16, #tpu.memory_space<vmem>>, vector<8x960xbf16>,
    %c0_54 = arith.constant 0 : index
    %c130 = arith.constant 130 : index
    %48 = vector.load %arg14[%c0_54, %c130] : memref<8x1152xbf16, #tpu.memory_space<vmem>>, vector<8x960xbf16>
    %c176 = arith.constant 176 : index
    %c0_55 = arith.constant 0 : index
    %49 = vector.load %arg15[%c176, %c0_55] : memref<200x960xbf16, #tpu.memory_space<vmem>>, vector<8x960xbf16>
    tpu.vector_store %arg15[%c176, %c0_55], %48 {strides = array<i32>} : memref<200x960xbf16, #tpu.memory_space<vmem>>, vector<8x960xbf16>,
    %c0_56 = arith.constant 0 : index
    %c131 = arith.constant 131 : index
    %50 = vector.load %arg14[%c0_56, %c131] : memref<8x1152xbf16, #tpu.memory_space<vmem>>, vector<8x960xbf16>
    %c184 = arith.constant 184 : index
    %c0_57 = arith.constant 0 : index
    %51 = vector.load %arg15[%c184, %c0_57] : memref<200x960xbf16, #tpu.memory_space<vmem>>, vector<8x960xbf16>
    tpu.vector_store %arg15[%c184, %c0_57], %50 {strides = array<i32>} : memref<200x960xbf16, #tpu.memory_space<vmem>>, vector<8x960xbf16>,
    %c0_58 = arith.constant 0 : index
    %c132 = arith.constant 132 : index
    %52 = vector.load %arg14[%c0_58, %c132] : memref<8x1152xbf16, #tpu.memory_space<vmem>>, vector<8x960xbf16>
    %c192 = arith.constant 192 : index
    %c0_59 = arith.constant 0 : index
    %53 = vector.load %arg15[%c192, %c0_59] : memref<200x960xbf16, #tpu.memory_space<vmem>>, vector<8x960xbf16>
    tpu.vector_store %arg15[%c192, %c0_59], %52 {strides = array<i32>} : memref<200x960xbf16, #tpu.memory_space<vmem>>, vector<8x960xbf16>,
    %c0_60 = arith.constant 0 : index
    %c0_61 = arith.constant 0 : index
    %54 = vector.load %arg2[%c0_60, %c0_61] : memref<8x200xbf16, #tpu.memory_space<vmem>>, vector<8x200xbf16>
    %c0_62 = arith.constant 0 : index
    %c0_63 = arith.constant 0 : index
    %55 = vector.load %arg15[%c0_62, %c0_63] : memref<200x960xbf16, #tpu.memory_space<vmem>>, vector<200x960xbf16>
    %cst = arith.constant dense<0.000000e+00> : vector<8x960xf32>
    %56 = tpu.matmul %54, %55, %cst {dimension_numbers = #tpu.dot_dimension_numbers<[1], [0], [0], [1], [0, 0, 1, 1], [], []>} : vector<8x200xbf16>, vector<200x960xbf16>, vector<8x960xf32> -> vector<8x960xf32>
    %c0_64 = arith.constant 0 : index
    %c0_65 = arith.constant 0 : index
    %57 = vector.load %arg3[%c0_64, %c0_65] : memref<8x1xf32, #tpu.memory_space<vmem>>, vector<8x1xf32>
    %58 = vector.broadcast %57 : vector<8x1xf32> to vector<8x960xf32>
    %59 = arith.addf %56, %58 : vector<8x960xf32>
    %cst_66 = arith.constant 0.000000e+00 : f32
    %60 = vector.broadcast %cst_66 : f32 to vector<8x960xf32>
    %61 = arith.maximumf %59, %60 : vector<8x960xf32>
    %c0_67 = arith.constant 0 : index
    %c0_68 = arith.constant 0 : index
    %62 = vector.load %arg16[%c0_67, %c0_68] : memref<8x960xf32, #tpu.memory_space<vmem>>, vector<8x960xf32>
    tpu.vector_store %arg16[%c0_67, %c0_68], %61 {strides = array<i32>} : memref<8x960xf32, #tpu.memory_space<vmem>>, vector<8x960xf32>,
    %c0_69 = arith.constant 0 : index
    %c0_70 = arith.constant 0 : index
    %63 = vector.load %arg16[%c0_69, %c0_70] : memref<8x960xf32, #tpu.memory_space<vmem>>, vector<8x904xf32>
    %c0_71 = arith.constant 0 : index
    %c1_72 = arith.constant 1 : index
    %64 = vector.load %arg16[%c0_71, %c1_72] : memref<8x960xf32, #tpu.memory_space<vmem>>, vector<8x904xf32>
    %65 = arith.maximumf %63, %64 : vector<8x904xf32>
    %c0_73 = arith.constant 0 : index
    %c32_74 = arith.constant 32 : index
    %66 = vector.load %arg16[%c0_73, %c32_74] : memref<8x960xf32, #tpu.memory_space<vmem>>, vector<8x904xf32>
    %c0_75 = arith.constant 0 : index
    %c33_76 = arith.constant 33 : index
    %67 = vector.load %arg16[%c0_75, %c33_76] : memref<8x960xf32, #tpu.memory_space<vmem>>, vector<8x904xf32>
    %68 = arith.maximumf %66, %67 : vector<8x904xf32>
    %69 = arith.maximumf %65, %68 : vector<8x904xf32>
    %70 = arith.truncf %69 : vector<8x904xf32> to vector<8x904xbf16>
    %c0_77 = arith.constant 0 : index
    %c0_78 = arith.constant 0 : index
    %71 = vector.load %arg17[%c0_77, %c0_78] : memref<8x904xbf16, #tpu.memory_space<vmem>>, vector<8x904xbf16>
    tpu.vector_store %arg17[%c0_77, %c0_78], %70 {strides = array<i32>} : memref<8x904xbf16, #tpu.memory_space<vmem>>, vector<8x904xbf16>,
    %c0_79 = arith.constant 0 : index
    %c0_80 = arith.constant 0 : index
    %72 = vector.load %arg17[%c0_79, %c0_80] : memref<8x904xbf16, #tpu.memory_space<vmem>>, vector<8x640xbf16>
    %c0_81 = arith.constant 0 : index
    %c0_82 = arith.constant 0 : index
    %73 = vector.load %arg15[%c0_81, %c0_82] : memref<200x960xbf16, #tpu.memory_space<vmem>>, vector<8x640xbf16>
    tpu.vector_store %arg15[%c0_81, %c0_82], %72 {strides = array<i32>} : memref<200x960xbf16, #tpu.memory_space<vmem>>, vector<8x640xbf16>,
    %c0_83 = arith.constant 0 : index
    %c2_84 = arith.constant 2 : index
    %74 = vector.load %arg17[%c0_83, %c2_84] : memref<8x904xbf16, #tpu.memory_space<vmem>>, vector<8x640xbf16>
    %c8_85 = arith.constant 8 : index
    %c0_86 = arith.constant 0 : index
    %75 = vector.load %arg15[%c8_85, %c0_86] : memref<200x960xbf16, #tpu.memory_space<vmem>>, vector<8x640xbf16>
    tpu.vector_store %arg15[%c8_85, %c0_86], %74 {strides = array<i32>} : memref<200x960xbf16, #tpu.memory_space<vmem>>, vector<8x640xbf16>,
    %c0_87 = arith.constant 0 : index
    %c4_88 = arith.constant 4 : index
    %76 = vector.load %arg17[%c0_87, %c4_88] : memref<8x904xbf16, #tpu.memory_space<vmem>>, vector<8x640xbf16>
    %c16_89 = arith.constant 16 : index
    %c0_90 = arith.constant 0 : index
    %77 = vector.load %arg15[%c16_89, %c0_90] : memref<200x960xbf16, #tpu.memory_space<vmem>>, vector<8x640xbf16>
    tpu.vector_store %arg15[%c16_89, %c0_90], %76 {strides = array<i32>} : memref<200x960xbf16, #tpu.memory_space<vmem>>, vector<8x640xbf16>,
    %c0_91 = arith.constant 0 : index
    %c6 = arith.constant 6 : index
    %78 = vector.load %arg17[%c0_91, %c6] : memref<8x904xbf16, #tpu.memory_space<vmem>>, vector<8x640xbf16>
    %c24_92 = arith.constant 24 : index
    %c0_93 = arith.constant 0 : index
    %79 = vector.load %arg15[%c24_92, %c0_93] : memref<200x960xbf16, #tpu.memory_space<vmem>>, vector<8x640xbf16>
    tpu.vector_store %arg15[%c24_92, %c0_93], %78 {strides = array<i32>} : memref<200x960xbf16, #tpu.memory_space<vmem>>, vector<8x640xbf16>,
    %c0_94 = arith.constant 0 : index
    %c8_95 = arith.constant 8 : index
    %80 = vector.load %arg17[%c0_94, %c8_95] : memref<8x904xbf16, #tpu.memory_space<vmem>>, vector<8x640xbf16>
    %c32_96 = arith.constant 32 : index
    %c0_97 = arith.constant 0 : index
    %81 = vector.load %arg15[%c32_96, %c0_97] : memref<200x960xbf16, #tpu.memory_space<vmem>>, vector<8x640xbf16>
    tpu.vector_store %arg15[%c32_96, %c0_97], %80 {strides = array<i32>} : memref<200x960xbf16, #tpu.memory_space<vmem>>, vector<8x640xbf16>,
    %c0_98 = arith.constant 0 : index
    %c64_99 = arith.constant 64 : index
    %82 = vector.load %arg17[%c0_98, %c64_99] : memref<8x904xbf16, #tpu.memory_space<vmem>>, vector<8x640xbf16>
    %c40_100 = arith.constant 40 : index
    %c0_101 = arith.constant 0 : index
    %83 = vector.load %arg15[%c40_100, %c0_101] : memref<200x960xbf16, #tpu.memory_space<vmem>>, vector<8x640xbf16>
    tpu.vector_store %arg15[%c40_100, %c0_101], %82 {strides = array<i32>} : memref<200x960xbf16, #tpu.memory_space<vmem>>, vector<8x640xbf16>,
    %c0_102 = arith.constant 0 : index
    %c66_103 = arith.constant 66 : index
    %84 = vector.load %arg17[%c0_102, %c66_103] : memref<8x904xbf16, #tpu.memory_space<vmem>>, vector<8x640xbf16>
    %c48_104 = arith.constant 48 : index
    %c0_105 = arith.constant 0 : index
    %85 = vector.load %arg15[%c48_104, %c0_105] : memref<200x960xbf16, #tpu.memory_space<vmem>>, vector<8x640xbf16>
    tpu.vector_store %arg15[%c48_104, %c0_105], %84 {strides = array<i32>} : memref<200x960xbf16, #tpu.memory_space<vmem>>, vector<8x640xbf16>,
    %c0_106 = arith.constant 0 : index
    %c68_107 = arith.constant 68 : index
    %86 = vector.load %arg17[%c0_106, %c68_107] : memref<8x904xbf16, #tpu.memory_space<vmem>>, vector<8x640xbf16>
    %c56_108 = arith.constant 56 : index
    %c0_109 = arith.constant 0 : index
    %87 = vector.load %arg15[%c56_108, %c0_109] : memref<200x960xbf16, #tpu.memory_space<vmem>>, vector<8x640xbf16>
    tpu.vector_store %arg15[%c56_108, %c0_109], %86 {strides = array<i32>} : memref<200x960xbf16, #tpu.memory_space<vmem>>, vector<8x640xbf16>,
    %c0_110 = arith.constant 0 : index
    %c70 = arith.constant 70 : index
    %88 = vector.load %arg17[%c0_110, %c70] : memref<8x904xbf16, #tpu.memory_space<vmem>>, vector<8x640xbf16>
    %c64_111 = arith.constant 64 : index
    %c0_112 = arith.constant 0 : index
    %89 = vector.load %arg15[%c64_111, %c0_112] : memref<200x960xbf16, #tpu.memory_space<vmem>>, vector<8x640xbf16>
    tpu.vector_store %arg15[%c64_111, %c0_112], %88 {strides = array<i32>} : memref<200x960xbf16, #tpu.memory_space<vmem>>, vector<8x640xbf16>,
    %c0_113 = arith.constant 0 : index
    %c72_114 = arith.constant 72 : index
    %90 = vector.load %arg17[%c0_113, %c72_114] : memref<8x904xbf16, #tpu.memory_space<vmem>>, vector<8x640xbf16>
    %c72_115 = arith.constant 72 : index
    %c0_116 = arith.constant 0 : index
    %91 = vector.load %arg15[%c72_115, %c0_116] : memref<200x960xbf16, #tpu.memory_space<vmem>>, vector<8x640xbf16>
    tpu.vector_store %arg15[%c72_115, %c0_116], %90 {strides = array<i32>} : memref<200x960xbf16, #tpu.memory_space<vmem>>, vector<8x640xbf16>,
    %c0_117 = arith.constant 0 : index
    %c128_118 = arith.constant 128 : index
    %92 = vector.load %arg17[%c0_117, %c128_118] : memref<8x904xbf16, #tpu.memory_space<vmem>>, vector<8x640xbf16>
    %c80_119 = arith.constant 80 : index
    %c0_120 = arith.constant 0 : index
    %93 = vector.load %arg15[%c80_119, %c0_120] : memref<200x960xbf16, #tpu.memory_space<vmem>>, vector<8x640xbf16>
    tpu.vector_store %arg15[%c80_119, %c0_120], %92 {strides = array<i32>} : memref<200x960xbf16, #tpu.memory_space<vmem>>, vector<8x640xbf16>,
    %c0_121 = arith.constant 0 : index
    %c130_122 = arith.constant 130 : index
    %94 = vector.load %arg17[%c0_121, %c130_122] : memref<8x904xbf16, #tpu.memory_space<vmem>>, vector<8x640xbf16>
    %c88_123 = arith.constant 88 : index
    %c0_124 = arith.constant 0 : index
    %95 = vector.load %arg15[%c88_123, %c0_124] : memref<200x960xbf16, #tpu.memory_space<vmem>>, vector<8x640xbf16>
    tpu.vector_store %arg15[%c88_123, %c0_124], %94 {strides = array<i32>} : memref<200x960xbf16, #tpu.memory_space<vmem>>, vector<8x640xbf16>,
    %c0_125 = arith.constant 0 : index
    %c132_126 = arith.constant 132 : index
    %96 = vector.load %arg17[%c0_125, %c132_126] : memref<8x904xbf16, #tpu.memory_space<vmem>>, vector<8x640xbf16>
    %c96_127 = arith.constant 96 : index
    %c0_128 = arith.constant 0 : index
    %97 = vector.load %arg15[%c96_127, %c0_128] : memref<200x960xbf16, #tpu.memory_space<vmem>>, vector<8x640xbf16>
    tpu.vector_store %arg15[%c96_127, %c0_128], %96 {strides = array<i32>} : memref<200x960xbf16, #tpu.memory_space<vmem>>, vector<8x640xbf16>,
    %c0_129 = arith.constant 0 : index
    %c134 = arith.constant 134 : index
    %98 = vector.load %arg17[%c0_129, %c134] : memref<8x904xbf16, #tpu.memory_space<vmem>>, vector<8x640xbf16>
    %c104_130 = arith.constant 104 : index
    %c0_131 = arith.constant 0 : index
    %99 = vector.load %arg15[%c104_130, %c0_131] : memref<200x960xbf16, #tpu.memory_space<vmem>>, vector<8x640xbf16>
    tpu.vector_store %arg15[%c104_130, %c0_131], %98 {strides = array<i32>} : memref<200x960xbf16, #tpu.memory_space<vmem>>, vector<8x640xbf16>,
    %c0_132 = arith.constant 0 : index
    %c136_133 = arith.constant 136 : index
    %100 = vector.load %arg17[%c0_132, %c136_133] : memref<8x904xbf16, #tpu.memory_space<vmem>>, vector<8x640xbf16>
    %c112_134 = arith.constant 112 : index
    %c0_135 = arith.constant 0 : index
    %101 = vector.load %arg15[%c112_134, %c0_135] : memref<200x960xbf16, #tpu.memory_space<vmem>>, vector<8x640xbf16>
    tpu.vector_store %arg15[%c112_134, %c0_135], %100 {strides = array<i32>} : memref<200x960xbf16, #tpu.memory_space<vmem>>, vector<8x640xbf16>,
    %c0_136 = arith.constant 0 : index
    %c192_137 = arith.constant 192 : index
    %102 = vector.load %arg17[%c0_136, %c192_137] : memref<8x904xbf16, #tpu.memory_space<vmem>>, vector<8x640xbf16>
    %c120_138 = arith.constant 120 : index
    %c0_139 = arith.constant 0 : index
    %103 = vector.load %arg15[%c120_138, %c0_139] : memref<200x960xbf16, #tpu.memory_space<vmem>>, vector<8x640xbf16>
    tpu.vector_store %arg15[%c120_138, %c0_139], %102 {strides = array<i32>} : memref<200x960xbf16, #tpu.memory_space<vmem>>, vector<8x640xbf16>,
    %c0_140 = arith.constant 0 : index
    %c194 = arith.constant 194 : index
    %104 = vector.load %arg17[%c0_140, %c194] : memref<8x904xbf16, #tpu.memory_space<vmem>>, vector<8x640xbf16>
    %c128_141 = arith.constant 128 : index
    %c0_142 = arith.constant 0 : index
    %105 = vector.load %arg15[%c128_141, %c0_142] : memref<200x960xbf16, #tpu.memory_space<vmem>>, vector<8x640xbf16>
    tpu.vector_store %arg15[%c128_141, %c0_142], %104 {strides = array<i32>} : memref<200x960xbf16, #tpu.memory_space<vmem>>, vector<8x640xbf16>,
    %c0_143 = arith.constant 0 : index
    %c196 = arith.constant 196 : index
    %106 = vector.load %arg17[%c0_143, %c196] : memref<8x904xbf16, #tpu.memory_space<vmem>>, vector<8x640xbf16>
    %c136_144 = arith.constant 136 : index
    %c0_145 = arith.constant 0 : index
    %107 = vector.load %arg15[%c136_144, %c0_145] : memref<200x960xbf16, #tpu.memory_space<vmem>>, vector<8x640xbf16>
    tpu.vector_store %arg15[%c136_144, %c0_145], %106 {strides = array<i32>} : memref<200x960xbf16, #tpu.memory_space<vmem>>, vector<8x640xbf16>,
    %c0_146 = arith.constant 0 : index
    %c198 = arith.constant 198 : index
    %108 = vector.load %arg17[%c0_146, %c198] : memref<8x904xbf16, #tpu.memory_space<vmem>>, vector<8x640xbf16>
    %c144_147 = arith.constant 144 : index
    %c0_148 = arith.constant 0 : index
    %109 = vector.load %arg15[%c144_147, %c0_148] : memref<200x960xbf16, #tpu.memory_space<vmem>>, vector<8x640xbf16>
    tpu.vector_store %arg15[%c144_147, %c0_148], %108 {strides = array<i32>} : memref<200x960xbf16, #tpu.memory_space<vmem>>, vector<8x640xbf16>,
    %c0_149 = arith.constant 0 : index
    %c200 = arith.constant 200 : index
    %110 = vector.load %arg17[%c0_149, %c200] : memref<8x904xbf16, #tpu.memory_space<vmem>>, vector<8x640xbf16>
    %c152_150 = arith.constant 152 : index
    %c0_151 = arith.constant 0 : index
    %111 = vector.load %arg15[%c152_150, %c0_151] : memref<200x960xbf16, #tpu.memory_space<vmem>>, vector<8x640xbf16>
    tpu.vector_store %arg15[%c152_150, %c0_151], %110 {strides = array<i32>} : memref<200x960xbf16, #tpu.memory_space<vmem>>, vector<8x640xbf16>,
    %c0_152 = arith.constant 0 : index
    %c256 = arith.constant 256 : index
    %112 = vector.load %arg17[%c0_152, %c256] : memref<8x904xbf16, #tpu.memory_space<vmem>>, vector<8x640xbf16>
    %c160_153 = arith.constant 160 : index
    %c0_154 = arith.constant 0 : index
    %113 = vector.load %arg15[%c160_153, %c0_154] : memref<200x960xbf16, #tpu.memory_space<vmem>>, vector<8x640xbf16>
    tpu.vector_store %arg15[%c160_153, %c0_154], %112 {strides = array<i32>} : memref<200x960xbf16, #tpu.memory_space<vmem>>, vector<8x640xbf16>,
    %c0_155 = arith.constant 0 : index
    %c258 = arith.constant 258 : index
    %114 = vector.load %arg17[%c0_155, %c258] : memref<8x904xbf16, #tpu.memory_space<vmem>>, vector<8x640xbf16>
    %c168_156 = arith.constant 168 : index
    %c0_157 = arith.constant 0 : index
    %115 = vector.load %arg15[%c168_156, %c0_157] : memref<200x960xbf16, #tpu.memory_space<vmem>>, vector<8x640xbf16>
    tpu.vector_store %arg15[%c168_156, %c0_157], %114 {strides = array<i32>} : memref<200x960xbf16, #tpu.memory_space<vmem>>, vector<8x640xbf16>,
    %c0_158 = arith.constant 0 : index
    %c260 = arith.constant 260 : index
    %116 = vector.load %arg17[%c0_158, %c260] : memref<8x904xbf16, #tpu.memory_space<vmem>>, vector<8x640xbf16>
    %c176_159 = arith.constant 176 : index
    %c0_160 = arith.constant 0 : index
    %117 = vector.load %arg15[%c176_159, %c0_160] : memref<200x960xbf16, #tpu.memory_space<vmem>>, vector<8x640xbf16>
    tpu.vector_store %arg15[%c176_159, %c0_160], %116 {strides = array<i32>} : memref<200x960xbf16, #tpu.memory_space<vmem>>, vector<8x640xbf16>,
    %c0_161 = arith.constant 0 : index
    %c262 = arith.constant 262 : index
    %118 = vector.load %arg17[%c0_161, %c262] : memref<8x904xbf16, #tpu.memory_space<vmem>>, vector<8x640xbf16>
    %c184_162 = arith.constant 184 : index
    %c0_163 = arith.constant 0 : index
    %119 = vector.load %arg15[%c184_162, %c0_163] : memref<200x960xbf16, #tpu.memory_space<vmem>>, vector<8x640xbf16>
    tpu.vector_store %arg15[%c184_162, %c0_163], %118 {strides = array<i32>} : memref<200x960xbf16, #tpu.memory_space<vmem>>, vector<8x640xbf16>,
    %c0_164 = arith.constant 0 : index
    %c264 = arith.constant 264 : index
    %120 = vector.load %arg17[%c0_164, %c264] : memref<8x904xbf16, #tpu.memory_space<vmem>>, vector<8x640xbf16>
    %c192_165 = arith.constant 192 : index
    %c0_166 = arith.constant 0 : index
    %121 = vector.load %arg15[%c192_165, %c0_166] : memref<200x960xbf16, #tpu.memory_space<vmem>>, vector<8x640xbf16>
    tpu.vector_store %arg15[%c192_165, %c0_166], %120 {strides = array<i32>} : memref<200x960xbf16, #tpu.memory_space<vmem>>, vector<8x640xbf16>,
    %c0_167 = arith.constant 0 : index
    %c0_168 = arith.constant 0 : index
    %122 = vector.load %arg4[%c0_167, %c0_168] : memref<16x200xbf16, #tpu.memory_space<vmem>>, vector<16x200xbf16>
    %c0_169 = arith.constant 0 : index
    %c0_170 = arith.constant 0 : index
    %123 = vector.load %arg15[%c0_169, %c0_170] : memref<200x960xbf16, #tpu.memory_space<vmem>>, vector<200x640xbf16>
    %cst_171 = arith.constant dense<0.000000e+00> : vector<16x640xf32>
    %124 = tpu.matmul %122, %123, %cst_171 {dimension_numbers = #tpu.dot_dimension_numbers<[1], [0], [0], [1], [0, 0, 1, 1], [], []>} : vector<16x200xbf16>, vector<200x640xbf16>, vector<16x640xf32> -> vector<16x640xf32>
    %c0_172 = arith.constant 0 : index
    %c0_173 = arith.constant 0 : index
    %125 = vector.load %arg5[%c0_172, %c0_173] : memref<16x1xf32, #tpu.memory_space<vmem>>, vector<16x1xf32>
    %126 = vector.broadcast %125 : vector<16x1xf32> to vector<16x640xf32>
    %127 = arith.addf %124, %126 : vector<16x640xf32>
    %cst_174 = arith.constant 0.000000e+00 : f32
    %128 = vector.broadcast %cst_174 : f32 to vector<16x640xf32>
    %129 = arith.maximumf %127, %128 : vector<16x640xf32>
    %c0_175 = arith.constant 0 : index
    %c0_176 = arith.constant 0 : index
    %130 = vector.load %arg18[%c0_175, %c0_176] : memref<16x640xf32, #tpu.memory_space<vmem>>, vector<16x640xf32>
    tpu.vector_store %arg18[%c0_175, %c0_176], %129 {strides = array<i32>} : memref<16x640xf32, #tpu.memory_space<vmem>>, vector<16x640xf32>,
    %c0_177 = arith.constant 0 : index
    %c0_178 = arith.constant 0 : index
    %131 = vector.load %arg18[%c0_177, %c0_178] : memref<16x640xf32, #tpu.memory_space<vmem>>, vector<16x544xf32>
    %c0_179 = arith.constant 0 : index
    %c2_180 = arith.constant 2 : index
    %132 = vector.load %arg18[%c0_179, %c2_180] : memref<16x640xf32, #tpu.memory_space<vmem>>, vector<16x544xf32>
    %133 = arith.maximumf %131, %132 : vector<16x544xf32>
    %c0_181 = arith.constant 0 : index
    %c64_182 = arith.constant 64 : index
    %134 = vector.load %arg18[%c0_181, %c64_182] : memref<16x640xf32, #tpu.memory_space<vmem>>, vector<16x544xf32>
    %c0_183 = arith.constant 0 : index
    %c66_184 = arith.constant 66 : index
    %135 = vector.load %arg18[%c0_183, %c66_184] : memref<16x640xf32, #tpu.memory_space<vmem>>, vector<16x544xf32>
    %136 = arith.maximumf %134, %135 : vector<16x544xf32>
    %137 = arith.maximumf %133, %136 : vector<16x544xf32>
    %138 = arith.truncf %137 : vector<16x544xf32> to vector<16x544xbf16>
    %c0_185 = arith.constant 0 : index
    %c0_186 = arith.constant 0 : index
    %139 = vector.load %arg6[%c0_185, %c0_186] : memref<544x32xbf16, #tpu.memory_space<vmem>>, vector<544x32xbf16>
    %cst_187 = arith.constant dense<0.000000e+00> : vector<16x32xf32>
    %140 = tpu.matmul %138, %139, %cst_187 {dimension_numbers = #tpu.dot_dimension_numbers<[1], [0], [0], [1], [0, 0, 1, 1], [], []>} : vector<16x544xbf16>, vector<544x32xbf16>, vector<16x32xf32> -> vector<16x32xf32>
    %c0_188 = arith.constant 0 : index
    %c0_189 = arith.constant 0 : index
    %141 = vector.load %arg19[%c0_188, %c0_189] : memref<16x32xf32, #tpu.memory_space<vmem>>, vector<16x32xf32>
    tpu.vector_store %arg19[%c0_188, %c0_189], %140 {strides = array<i32>} : memref<16x32xf32, #tpu.memory_space<vmem>>, vector<16x32xf32>,
    %c0_190 = arith.constant 0 : index
    %c0_191 = arith.constant 0 : index
    %142 = vector.load %arg8[%c0_190, %c0_191] : memref<1x128xf32, #tpu.memory_space<vmem>>, vector<1x128xf32>
    %c0_192 = arith.constant 0 : index
    %c0_193 = arith.constant 0 : index
    %143 = vector.load %arg19[%c0_192, %c0_193] : memref<16x32xf32, #tpu.memory_space<vmem>>, vector<1x32xf32>
    %144 = arith.truncf %143 : vector<1x32xf32> to vector<1x32xbf16>
    %c0_194 = arith.constant 0 : index
    %c0_195 = arith.constant 0 : index
    %c0_196 = arith.constant 0 : index
    %145 = vector.load %arg7[%c0_194, %c0_195, %c0_196] : memref<16x32x128xbf16, #tpu.memory_space<vmem>>, vector<1x32x128xbf16>
    %146 = vector.shape_cast %145 : vector<1x32x128xbf16> to vector<32x128xbf16>
    %cst_197 = arith.constant dense<0.000000e+00> : vector<1x128xf32>
    %147 = tpu.matmul %144, %146, %cst_197 {dimension_numbers = #tpu.dot_dimension_numbers<[1], [0], [0], [1], [0, 0, 1, 1], [], []>} : vector<1x32xbf16>, vector<32x128xbf16>, vector<1x128xf32> -> vector<1x128xf32>
    %148 = arith.addf %142, %147 : vector<1x128xf32>
    %c1_198 = arith.constant 1 : index
    %c0_199 = arith.constant 0 : index
    %149 = vector.load %arg19[%c1_198, %c0_199] : memref<16x32xf32, #tpu.memory_space<vmem>>, vector<1x32xf32>
    %150 = arith.truncf %149 : vector<1x32xf32> to vector<1x32xbf16>
    %c1_200 = arith.constant 1 : index
    %c0_201 = arith.constant 0 : index
    %c0_202 = arith.constant 0 : index
    %151 = vector.load %arg7[%c1_200, %c0_201, %c0_202] : memref<16x32x128xbf16, #tpu.memory_space<vmem>>, vector<1x32x128xbf16>
    %152 = vector.shape_cast %151 : vector<1x32x128xbf16> to vector<32x128xbf16>
    %cst_203 = arith.constant dense<0.000000e+00> : vector<1x128xf32>
    %153 = tpu.matmul %150, %152, %cst_203 {dimension_numbers = #tpu.dot_dimension_numbers<[1], [0], [0], [1], [0, 0, 1, 1], [], []>} : vector<1x32xbf16>, vector<32x128xbf16>, vector<1x128xf32> -> vector<1x128xf32>
    %154 = arith.addf %148, %153 : vector<1x128xf32>
    %c2_204 = arith.constant 2 : index
    %c0_205 = arith.constant 0 : index
    %155 = vector.load %arg19[%c2_204, %c0_205] : memref<16x32xf32, #tpu.memory_space<vmem>>, vector<1x32xf32>
    %156 = arith.truncf %155 : vector<1x32xf32> to vector<1x32xbf16>
    %c2_206 = arith.constant 2 : index
    %c0_207 = arith.constant 0 : index
    %c0_208 = arith.constant 0 : index
    %157 = vector.load %arg7[%c2_206, %c0_207, %c0_208] : memref<16x32x128xbf16, #tpu.memory_space<vmem>>, vector<1x32x128xbf16>
    %158 = vector.shape_cast %157 : vector<1x32x128xbf16> to vector<32x128xbf16>
    %cst_209 = arith.constant dense<0.000000e+00> : vector<1x128xf32>
    %159 = tpu.matmul %156, %158, %cst_209 {dimension_numbers = #tpu.dot_dimension_numbers<[1], [0], [0], [1], [0, 0, 1, 1], [], []>} : vector<1x32xbf16>, vector<32x128xbf16>, vector<1x128xf32> -> vector<1x128xf32>
    %160 = arith.addf %154, %159 : vector<1x128xf32>
    %c3_210 = arith.constant 3 : index
    %c0_211 = arith.constant 0 : index
    %161 = vector.load %arg19[%c3_210, %c0_211] : memref<16x32xf32, #tpu.memory_space<vmem>>, vector<1x32xf32>
    %162 = arith.truncf %161 : vector<1x32xf32> to vector<1x32xbf16>
    %c3_212 = arith.constant 3 : index
    %c0_213 = arith.constant 0 : index
    %c0_214 = arith.constant 0 : index
    %163 = vector.load %arg7[%c3_212, %c0_213, %c0_214] : memref<16x32x128xbf16, #tpu.memory_space<vmem>>, vector<1x32x128xbf16>
    %164 = vector.shape_cast %163 : vector<1x32x128xbf16> to vector<32x128xbf16>
    %cst_215 = arith.constant dense<0.000000e+00> : vector<1x128xf32>
    %165 = tpu.matmul %162, %164, %cst_215 {dimension_numbers = #tpu.dot_dimension_numbers<[1], [0], [0], [1], [0, 0, 1, 1], [], []>} : vector<1x32xbf16>, vector<32x128xbf16>, vector<1x128xf32> -> vector<1x128xf32>
    %166 = arith.addf %160, %165 : vector<1x128xf32>
    %c4_216 = arith.constant 4 : index
    %c0_217 = arith.constant 0 : index
    %167 = vector.load %arg19[%c4_216, %c0_217] : memref<16x32xf32, #tpu.memory_space<vmem>>, vector<1x32xf32>
    %168 = arith.truncf %167 : vector<1x32xf32> to vector<1x32xbf16>
    %c4_218 = arith.constant 4 : index
    %c0_219 = arith.constant 0 : index
    %c0_220 = arith.constant 0 : index
    %169 = vector.load %arg7[%c4_218, %c0_219, %c0_220] : memref<16x32x128xbf16, #tpu.memory_space<vmem>>, vector<1x32x128xbf16>
    %170 = vector.shape_cast %169 : vector<1x32x128xbf16> to vector<32x128xbf16>
    %cst_221 = arith.constant dense<0.000000e+00> : vector<1x128xf32>
    %171 = tpu.matmul %168, %170, %cst_221 {dimension_numbers = #tpu.dot_dimension_numbers<[1], [0], [0], [1], [0, 0, 1, 1], [], []>} : vector<1x32xbf16>, vector<32x128xbf16>, vector<1x128xf32> -> vector<1x128xf32>
    %172 = arith.addf %166, %171 : vector<1x128xf32>
    %c5 = arith.constant 5 : index
    %c0_222 = arith.constant 0 : index
    %173 = vector.load %arg19[%c5, %c0_222] : memref<16x32xf32, #tpu.memory_space<vmem>>, vector<1x32xf32>
    %174 = arith.truncf %173 : vector<1x32xf32> to vector<1x32xbf16>
    %c5_223 = arith.constant 5 : index
    %c0_224 = arith.constant 0 : index
    %c0_225 = arith.constant 0 : index
    %175 = vector.load %arg7[%c5_223, %c0_224, %c0_225] : memref<16x32x128xbf16, #tpu.memory_space<vmem>>, vector<1x32x128xbf16>
    %176 = vector.shape_cast %175 : vector<1x32x128xbf16> to vector<32x128xbf16>
    %cst_226 = arith.constant dense<0.000000e+00> : vector<1x128xf32>
    %177 = tpu.matmul %174, %176, %cst_226 {dimension_numbers = #tpu.dot_dimension_numbers<[1], [0], [0], [1], [0, 0, 1, 1], [], []>} : vector<1x32xbf16>, vector<32x128xbf16>, vector<1x128xf32> -> vector<1x128xf32>
    %178 = arith.addf %172, %177 : vector<1x128xf32>
    %c6_227 = arith.constant 6 : index
    %c0_228 = arith.constant 0 : index
    %179 = vector.load %arg19[%c6_227, %c0_228] : memref<16x32xf32, #tpu.memory_space<vmem>>, vector<1x32xf32>
    %180 = arith.truncf %179 : vector<1x32xf32> to vector<1x32xbf16>
    %c6_229 = arith.constant 6 : index
    %c0_230 = arith.constant 0 : index
    %c0_231 = arith.constant 0 : index
    %181 = vector.load %arg7[%c6_229, %c0_230, %c0_231] : memref<16x32x128xbf16, #tpu.memory_space<vmem>>, vector<1x32x128xbf16>
    %182 = vector.shape_cast %181 : vector<1x32x128xbf16> to vector<32x128xbf16>
    %cst_232 = arith.constant dense<0.000000e+00> : vector<1x128xf32>
    %183 = tpu.matmul %180, %182, %cst_232 {dimension_numbers = #tpu.dot_dimension_numbers<[1], [0], [0], [1], [0, 0, 1, 1], [], []>} : vector<1x32xbf16>, vector<32x128xbf16>, vector<1x128xf32> -> vector<1x128xf32>
    %184 = arith.addf %178, %183 : vector<1x128xf32>
    %c7 = arith.constant 7 : index
    %c0_233 = arith.constant 0 : index
    %185 = vector.load %arg19[%c7, %c0_233] : memref<16x32xf32, #tpu.memory_space<vmem>>, vector<1x32xf32>
    %186 = arith.truncf %185 : vector<1x32xf32> to vector<1x32xbf16>
    %c7_234 = arith.constant 7 : index
    %c0_235 = arith.constant 0 : index
    %c0_236 = arith.constant 0 : index
    %187 = vector.load %arg7[%c7_234, %c0_235, %c0_236] : memref<16x32x128xbf16, #tpu.memory_space<vmem>>, vector<1x32x128xbf16>
    %188 = vector.shape_cast %187 : vector<1x32x128xbf16> to vector<32x128xbf16>
    %cst_237 = arith.constant dense<0.000000e+00> : vector<1x128xf32>
    %189 = tpu.matmul %186, %188, %cst_237 {dimension_numbers = #tpu.dot_dimension_numbers<[1], [0], [0], [1], [0, 0, 1, 1], [], []>} : vector<1x32xbf16>, vector<32x128xbf16>, vector<1x128xf32> -> vector<1x128xf32>
    %190 = arith.addf %184, %189 : vector<1x128xf32>
    %c8_238 = arith.constant 8 : index
    %c0_239 = arith.constant 0 : index
    %191 = vector.load %arg19[%c8_238, %c0_239] : memref<16x32xf32, #tpu.memory_space<vmem>>, vector<1x32xf32>
    %192 = arith.truncf %191 : vector<1x32xf32> to vector<1x32xbf16>
    %c8_240 = arith.constant 8 : index
    %c0_241 = arith.constant 0 : index
    %c0_242 = arith.constant 0 : index
    %193 = vector.load %arg7[%c8_240, %c0_241, %c0_242] : memref<16x32x128xbf16, #tpu.memory_space<vmem>>, vector<1x32x128xbf16>
    %194 = vector.shape_cast %193 : vector<1x32x128xbf16> to vector<32x128xbf16>
    %cst_243 = arith.constant dense<0.000000e+00> : vector<1x128xf32>
    %195 = tpu.matmul %192, %194, %cst_243 {dimension_numbers = #tpu.dot_dimension_numbers<[1], [0], [0], [1], [0, 0, 1, 1], [], []>} : vector<1x32xbf16>, vector<32x128xbf16>, vector<1x128xf32> -> vector<1x128xf32>
    %196 = arith.addf %190, %195 : vector<1x128xf32>
    %c9 = arith.constant 9 : index
    %c0_244 = arith.constant 0 : index
    %197 = vector.load %arg19[%c9, %c0_244] : memref<16x32xf32, #tpu.memory_space<vmem>>, vector<1x32xf32>
    %198 = arith.truncf %197 : vector<1x32xf32> to vector<1x32xbf16>
    %c9_245 = arith.constant 9 : index
    %c0_246 = arith.constant 0 : index
    %c0_247 = arith.constant 0 : index
    %199 = vector.load %arg7[%c9_245, %c0_246, %c0_247] : memref<16x32x128xbf16, #tpu.memory_space<vmem>>, vector<1x32x128xbf16>
    %200 = vector.shape_cast %199 : vector<1x32x128xbf16> to vector<32x128xbf16>
    %cst_248 = arith.constant dense<0.000000e+00> : vector<1x128xf32>
    %201 = tpu.matmul %198, %200, %cst_248 {dimension_numbers = #tpu.dot_dimension_numbers<[1], [0], [0], [1], [0, 0, 1, 1], [], []>} : vector<1x32xbf16>, vector<32x128xbf16>, vector<1x128xf32> -> vector<1x128xf32>
    %202 = arith.addf %196, %201 : vector<1x128xf32>
    %c10 = arith.constant 10 : index
    %c0_249 = arith.constant 0 : index
    %203 = vector.load %arg19[%c10, %c0_249] : memref<16x32xf32, #tpu.memory_space<vmem>>, vector<1x32xf32>
    %204 = arith.truncf %203 : vector<1x32xf32> to vector<1x32xbf16>
    %c10_250 = arith.constant 10 : index
    %c0_251 = arith.constant 0 : index
    %c0_252 = arith.constant 0 : index
    %205 = vector.load %arg7[%c10_250, %c0_251, %c0_252] : memref<16x32x128xbf16, #tpu.memory_space<vmem>>, vector<1x32x128xbf16>
    %206 = vector.shape_cast %205 : vector<1x32x128xbf16> to vector<32x128xbf16>
    %cst_253 = arith.constant dense<0.000000e+00> : vector<1x128xf32>
    %207 = tpu.matmul %204, %206, %cst_253 {dimension_numbers = #tpu.dot_dimension_numbers<[1], [0], [0], [1], [0, 0, 1, 1], [], []>} : vector<1x32xbf16>, vector<32x128xbf16>, vector<1x128xf32> -> vector<1x128xf32>
    %208 = arith.addf %202, %207 : vector<1x128xf32>
    %c11 = arith.constant 11 : index
    %c0_254 = arith.constant 0 : index
    %209 = vector.load %arg19[%c11, %c0_254] : memref<16x32xf32, #tpu.memory_space<vmem>>, vector<1x32xf32>
    %210 = arith.truncf %209 : vector<1x32xf32> to vector<1x32xbf16>
    %c11_255 = arith.constant 11 : index
    %c0_256 = arith.constant 0 : index
    %c0_257 = arith.constant 0 : index
    %211 = vector.load %arg7[%c11_255, %c0_256, %c0_257] : memref<16x32x128xbf16, #tpu.memory_space<vmem>>, vector<1x32x128xbf16>
    %212 = vector.shape_cast %211 : vector<1x32x128xbf16> to vector<32x128xbf16>
    %cst_258 = arith.constant dense<0.000000e+00> : vector<1x128xf32>
    %213 = tpu.matmul %210, %212, %cst_258 {dimension_numbers = #tpu.dot_dimension_numbers<[1], [0], [0], [1], [0, 0, 1, 1], [], []>} : vector<1x32xbf16>, vector<32x128xbf16>, vector<1x128xf32> -> vector<1x128xf32>
    %214 = arith.addf %208, %213 : vector<1x128xf32>
    %c12 = arith.constant 12 : index
    %c0_259 = arith.constant 0 : index
    %215 = vector.load %arg19[%c12, %c0_259] : memref<16x32xf32, #tpu.memory_space<vmem>>, vector<1x32xf32>
    %216 = arith.truncf %215 : vector<1x32xf32> to vector<1x32xbf16>
    %c12_260 = arith.constant 12 : index
    %c0_261 = arith.constant 0 : index
    %c0_262 = arith.constant 0 : index
    %217 = vector.load %arg7[%c12_260, %c0_261, %c0_262] : memref<16x32x128xbf16, #tpu.memory_space<vmem>>, vector<1x32x128xbf16>
    %218 = vector.shape_cast %217 : vector<1x32x128xbf16> to vector<32x128xbf16>
    %cst_263 = arith.constant dense<0.000000e+00> : vector<1x128xf32>
    %219 = tpu.matmul %216, %218, %cst_263 {dimension_numbers = #tpu.dot_dimension_numbers<[1], [0], [0], [1], [0, 0, 1, 1], [], []>} : vector<1x32xbf16>, vector<32x128xbf16>, vector<1x128xf32> -> vector<1x128xf32>
    %220 = arith.addf %214, %219 : vector<1x128xf32>
    %c13 = arith.constant 13 : index
    %c0_264 = arith.constant 0 : index
    %221 = vector.load %arg19[%c13, %c0_264] : memref<16x32xf32, #tpu.memory_space<vmem>>, vector<1x32xf32>
    %222 = arith.truncf %221 : vector<1x32xf32> to vector<1x32xbf16>
    %c13_265 = arith.constant 13 : index
    %c0_266 = arith.constant 0 : index
    %c0_267 = arith.constant 0 : index
    %223 = vector.load %arg7[%c13_265, %c0_266, %c0_267] : memref<16x32x128xbf16, #tpu.memory_space<vmem>>, vector<1x32x128xbf16>
    %224 = vector.shape_cast %223 : vector<1x32x128xbf16> to vector<32x128xbf16>
    %cst_268 = arith.constant dense<0.000000e+00> : vector<1x128xf32>
    %225 = tpu.matmul %222, %224, %cst_268 {dimension_numbers = #tpu.dot_dimension_numbers<[1], [0], [0], [1], [0, 0, 1, 1], [], []>} : vector<1x32xbf16>, vector<32x128xbf16>, vector<1x128xf32> -> vector<1x128xf32>
    %226 = arith.addf %220, %225 : vector<1x128xf32>
    %c14 = arith.constant 14 : index
    %c0_269 = arith.constant 0 : index
    %227 = vector.load %arg19[%c14, %c0_269] : memref<16x32xf32, #tpu.memory_space<vmem>>, vector<1x32xf32>
    %228 = arith.truncf %227 : vector<1x32xf32> to vector<1x32xbf16>
    %c14_270 = arith.constant 14 : index
    %c0_271 = arith.constant 0 : index
    %c0_272 = arith.constant 0 : index
    %229 = vector.load %arg7[%c14_270, %c0_271, %c0_272] : memref<16x32x128xbf16, #tpu.memory_space<vmem>>, vector<1x32x128xbf16>
    %230 = vector.shape_cast %229 : vector<1x32x128xbf16> to vector<32x128xbf16>
    %cst_273 = arith.constant dense<0.000000e+00> : vector<1x128xf32>
    %231 = tpu.matmul %228, %230, %cst_273 {dimension_numbers = #tpu.dot_dimension_numbers<[1], [0], [0], [1], [0, 0, 1, 1], [], []>} : vector<1x32xbf16>, vector<32x128xbf16>, vector<1x128xf32> -> vector<1x128xf32>
    %232 = arith.addf %226, %231 : vector<1x128xf32>
    %c15 = arith.constant 15 : index
    %c0_274 = arith.constant 0 : index
    %233 = vector.load %arg19[%c15, %c0_274] : memref<16x32xf32, #tpu.memory_space<vmem>>, vector<1x32xf32>
    %234 = arith.truncf %233 : vector<1x32xf32> to vector<1x32xbf16>
    %c15_275 = arith.constant 15 : index
    %c0_276 = arith.constant 0 : index
    %c0_277 = arith.constant 0 : index
    %235 = vector.load %arg7[%c15_275, %c0_276, %c0_277] : memref<16x32x128xbf16, #tpu.memory_space<vmem>>, vector<1x32x128xbf16>
    %236 = vector.shape_cast %235 : vector<1x32x128xbf16> to vector<32x128xbf16>
    %cst_278 = arith.constant dense<0.000000e+00> : vector<1x128xf32>
    %237 = tpu.matmul %234, %236, %cst_278 {dimension_numbers = #tpu.dot_dimension_numbers<[1], [0], [0], [1], [0, 0, 1, 1], [], []>} : vector<1x32xbf16>, vector<32x128xbf16>, vector<1x128xf32> -> vector<1x128xf32>
    %238 = arith.addf %232, %237 : vector<1x128xf32>
    %cst_279 = arith.constant 0.000000e+00 : f32
    %239 = vector.broadcast %cst_279 : f32 to vector<1x128xf32>
    %240 = arith.maximumf %238, %239 : vector<1x128xf32>
    %241 = arith.truncf %240 : vector<1x128xf32> to vector<1x128xbf16>
    %c0_280 = arith.constant 0 : index
    %c0_281 = arith.constant 0 : index
    %242 = vector.load %arg9[%c0_280, %c0_281] : memref<128x128xbf16, #tpu.memory_space<vmem>>, vector<128x128xbf16>
    %cst_282 = arith.constant dense<0.000000e+00> : vector<1x128xf32>
    %243 = tpu.matmul %241, %242, %cst_282 {dimension_numbers = #tpu.dot_dimension_numbers<[1], [0], [0], [1], [0, 0, 1, 1], [], []>} : vector<1x128xbf16>, vector<128x128xbf16>, vector<1x128xf32> -> vector<1x128xf32>
    %c0_283 = arith.constant 0 : index
    %c0_284 = arith.constant 0 : index
    %244 = vector.load %arg10[%c0_283, %c0_284] : memref<1x128xf32, #tpu.memory_space<vmem>>, vector<1x128xf32>
    %245 = arith.addf %243, %244 : vector<1x128xf32>
    %cst_285 = arith.constant 0.000000e+00 : f32
    %246 = vector.broadcast %cst_285 : f32 to vector<1x128xf32>
    %247 = arith.maximumf %245, %246 : vector<1x128xf32>
    %248 = arith.truncf %247 : vector<1x128xf32> to vector<1x128xbf16>
    %c0_286 = arith.constant 0 : index
    %c0_287 = arith.constant 0 : index
    %249 = vector.load %arg11[%c0_286, %c0_287] : memref<128x128xbf16, #tpu.memory_space<vmem>>, vector<128x128xbf16>
    %cst_288 = arith.constant dense<0.000000e+00> : vector<1x128xf32>
    %250 = tpu.matmul %248, %249, %cst_288 {dimension_numbers = #tpu.dot_dimension_numbers<[1], [0], [0], [1], [0, 0, 1, 1], [], []>} : vector<1x128xbf16>, vector<128x128xbf16>, vector<1x128xf32> -> vector<1x128xf32>
    %c0_289 = arith.constant 0 : index
    %c0_290 = arith.constant 0 : index
    %251 = vector.load %arg12[%c0_289, %c0_290] : memref<1x128xf32, #tpu.memory_space<vmem>>, vector<1x128xf32>
    %252 = arith.addf %250, %251 : vector<1x128xf32>
    %253 = tpu.iota {dimensions = array<i32: 1>} : vector<1x128xi32>
    %c10_i32 = arith.constant 10 : i32
    %254 = vector.broadcast %c10_i32 : i32 to vector<1x128xi32>
    %255 = arith.cmpi slt, %253, %254 : vector<1x128xi32>
    %cst_291 = arith.constant 0xFF800000 : f32
    %256 = vector.broadcast %cst_291 : f32 to vector<1x128xf32>
    %257 = arith.select %255, %252, %256 : vector<1x128xi1>, vector<1x128xf32>
    %cst_292 = arith.constant dense<0xFF800000> : vector<1xf32>
    %258 = vector.multi_reduction <maximumf>, %257, %cst_292 [1] : vector<1x128xf32> to vector<1xf32>
    %259 = vector.shape_cast %258 : vector<1xf32> to vector<1x1xf32>
    %260 = vector.broadcast %259 : vector<1x1xf32> to vector<1x128xf32>
    %261 = arith.subf %257, %260 : vector<1x128xf32>
    %262 = math.exp %261 : vector<1x128xf32>
    %cst_293 = arith.constant dense<0.000000e+00> : vector<1xf32>
    %263 = vector.multi_reduction <add>, %262, %cst_293 [1] : vector<1x128xf32> to vector<1xf32>
    %264 = vector.shape_cast %263 : vector<1xf32> to vector<1x1xf32>
    %265 = vector.broadcast %264 : vector<1x1xf32> to vector<1x128xf32>
    %266 = arith.divf %262, %265 : vector<1x128xf32>
    %267 = vector.extract_strided_slice %266 {offsets = [0, 0], sizes = [1, 10], strides = [1, 1]} : vector<1x128xf32> to vector<1x10xf32>
    %c0_294 = arith.constant 0 : index
    %c0_295 = arith.constant 0 : index
    %c0_296 = arith.constant 0 : index
    %268 = vector.load %arg13[%c0_294, %c0_295, %c0_296] : memref<1x1x10xf32, #tpu.memory_space<vmem>>, vector<1x1x10xf32>
    %269 = vector.shape_cast %268 : vector<1x1x10xf32> to vector<1x10xf32>
    %270 = vector.shape_cast %267 : vector<1x10xf32> to vector<1x1x10xf32>
    tpu.vector_store %arg13[%c0_294, %c0_295, %c0_296], %270 {strides = array<i32>} : memref<1x1x10xf32, #tpu.memory_space<vmem>>, vector<1x1x10xf32>,
    return
  }
  func.func @transform_0(%arg0: i32) -> (i32, i32, i32) {
    %c0_i32 = arith.constant 0 : i32
    %c0_i32_0 = arith.constant 0 : i32
    %c0_i32_1 = arith.constant 0 : i32
    return %arg0, %c0_i32, %c0_i32_0 : i32, i32, i32
  }
  func.func @transform_1(%arg0: i32) -> (i32, i32) {
    %c0_i32 = arith.constant 0 : i32
    %c0_i32_0 = arith.constant 0 : i32
    %c0_i32_1 = arith.constant 0 : i32
    return %c0_i32, %c0_i32_0 : i32, i32
  }
  func.func @transform_2(%arg0: i32) -> (i32, i32) {
    %c0_i32 = arith.constant 0 : i32
    %c0_i32_0 = arith.constant 0 : i32
    %c0_i32_1 = arith.constant 0 : i32
    return %c0_i32, %c0_i32_0 : i32, i32
  }
  func.func @transform_3(%arg0: i32) -> (i32, i32) {
    %c0_i32 = arith.constant 0 : i32
    %c0_i32_0 = arith.constant 0 : i32
    %c0_i32_1 = arith.constant 0 : i32
    return %c0_i32, %c0_i32_0 : i32, i32
  }
  func.func @transform_4(%arg0: i32) -> (i32, i32) {
    %c0_i32 = arith.constant 0 : i32
    %c0_i32_0 = arith.constant 0 : i32
    %c0_i32_1 = arith.constant 0 : i32
    return %c0_i32, %c0_i32_0 : i32, i32
  }
  func.func @transform_5(%arg0: i32) -> (i32, i32) {
    %c0_i32 = arith.constant 0 : i32
    %c0_i32_0 = arith.constant 0 : i32
    %c0_i32_1 = arith.constant 0 : i32
    return %c0_i32, %c0_i32_0 : i32, i32
  }
  func.func @transform_6(%arg0: i32) -> (i32, i32, i32) {
    %c0_i32 = arith.constant 0 : i32
    %c0_i32_0 = arith.constant 0 : i32
    %c0_i32_1 = arith.constant 0 : i32
    %c0_i32_2 = arith.constant 0 : i32
    return %c0_i32, %c0_i32_0, %c0_i32_1 : i32, i32, i32
  }
  func.func @transform_7(%arg0: i32) -> (i32, i32) {
    %c0_i32 = arith.constant 0 : i32
    %c0_i32_0 = arith.constant 0 : i32
    %c0_i32_1 = arith.constant 0 : i32
    return %c0_i32, %c0_i32_0 : i32, i32
  }
  func.func @transform_8(%arg0: i32) -> (i32, i32) {
    %c0_i32 = arith.constant 0 : i32
    %c0_i32_0 = arith.constant 0 : i32
    %c0_i32_1 = arith.constant 0 : i32
    return %c0_i32, %c0_i32_0 : i32, i32
  }
  func.func @transform_9(%arg0: i32) -> (i32, i32) {
    %c0_i32 = arith.constant 0 : i32
    %c0_i32_0 = arith.constant 0 : i32
    %c0_i32_1 = arith.constant 0 : i32
    return %c0_i32, %c0_i32_0 : i32, i32
  }
  func.func @transform_10(%arg0: i32) -> (i32, i32) {
    %c0_i32 = arith.constant 0 : i32
    %c0_i32_0 = arith.constant 0 : i32
    %c0_i32_1 = arith.constant 0 : i32
    return %c0_i32, %c0_i32_0 : i32, i32
  }
  func.func @transform_11(%arg0: i32) -> (i32, i32) {
    %c0_i32 = arith.constant 0 : i32
    %c0_i32_0 = arith.constant 0 : i32
    %c0_i32_1 = arith.constant 0 : i32
    return %c0_i32, %c0_i32_0 : i32, i32
  }
  func.func @transform_12(%arg0: i32) -> (i32, i32, i32) {
    %c0_i32 = arith.constant 0 : i32
    %c0_i32_0 = arith.constant 0 : i32
    %c0_i32_1 = arith.constant 0 : i32
    return %arg0, %c0_i32, %c0_i32_0 : i32, i32, i32
  }
}

</mosaic_0001>

<bundles_post_ra>
// kernel: lenet_forward.1
= control target key start
LH: loop header
LB: loop body
LE: loop exit
PB: predicated region body
PF: predicated region fallthrough
CT: control target
= control target key end

     0   :  { %s8375_s0 = inlined_call_operand.vmem [shape: f32[2,8,1152], index: 0, kind: input, shape index: {}]   ;;  %s8376_s1 = inlined_call_operand.vmem [shape: bf16[8,200], index: 1, kind: input, shape index: {}]   ;;  %s8377_s2 = inlined_call_operand.vmem [shape: f32[8,1], index: 2, kind: input, shape index: {}]   ;;  %s8378_s3 = inlined_call_operand.vmem [shape: bf16[16,200], index: 3, kind: input, shape index: {}]   ;;  %s8379_s4 = inlined_call_operand.vmem [shape: f32[16,1], index: 4, kind: input, shape index: {}]   ;;  %s8380_s5 = inlined_call_operand.vmem [shape: bf16[544,32], index: 5, kind: input, shape index: {}]   ;;  %s8381_s6 = inlined_call_operand.vmem [shape: bf16[16,32,128], index: 6, kind: input, shape index: {}]   ;;  %s8382_s7 = inlined_call_operand.vmem [shape: f32[1,128], index: 7, kind: input, shape index: {}]   ;;  %s8383_s8 = inlined_call_operand.vmem [shape: bf16[128,128], index: 8, kind: input, shape index: {}]   ;;  %s8384_s9 = inlined_call_operand.vmem [shape: f32[1,128], index: 9, kind: input, shape index: {}]   ;;  %s8385_s10 = inlined_call_operand.vmem [shape: bf16[128,128], index: 10, kind: input, shape index: {}]   ;;  %s8386_s11 = inlined_call_operand.vmem [shape: f32[1,128], index: 11, kind: input, shape index: {}]   ;;  %s8387_s12 = inlined_call_operand.hbm [shape: f32[2,1,10], index: 12, kind: output, shape index: {}]  }
   0x1   :  { %8445 = sst [smem:[#allocation17_spill]] %s8375_s0 }
   0x2   :  { %17 = vsyncpa [#allocation9], 0 }
   0x3   :  { %19 = vsyncpa [#allocation9 + $0x1], 0  ;;  %s6429_s21 = smov 0   ;;  %s6431_s22 = smov 0  }
   0x4   :  { %s6433_s23 = smov 0   ;;  %s6435_s24 = smov 0  }
   0x5 LB: > { %8446 = sst [smem:[#allocation11_spill]] %s6326_s21  ;;  %s6450_s25 = sadd.s32 4294967295, %s6338_s24   ;;  %s6338_s24 = sphi %s6435_s24, %s8544_s24   ;;  %s6334_s23 = sphi %s6433_s23, %s8546_s23   ;;  %s6330_s22 = sphi %s6431_s22, %s8548_s22   ;;  %s6326_s21 = sphi %s6429_s21, %s8547_s21  }
   0x6   : > { %8447 = sst [smem:[#allocation12_spill]] %s6334_s23  ;;  %s4819_s26 = sadd.s32 4294967294, %s6338_s24  }
   0x7   : > { %8448 = sst [smem:[#allocation13_spill]] %s6338_s24  ;;  %s6454_s27 = sadd.s32 1, %s6338_s24  }
   0x8   : > { %8449 = sst [smem:[#allocation14_spill]] %s6454_s27  ;;  %s289_s28 = sadd.s32 1, %s6334_s23 }
   0x9   : > { %s286_s29 = ssub.s32 %s6338_s24, %s6454_s27  ;;  %p299_p0 = scmp.ne.s32.totalorder %s6334_s23, %s6330_s22 }
   0xa   : > { %p287_p1 = scmp.eq.s32.totalorder %s286_s29, 0  ;;  %p300_p2 = scmp.eq.s32.totalorder %s6450_s25, 1 }
   0xb   : > { %p305_p3 = scmp.ne.s32.totalorder %s6330_s22, %s6326_s21  ;;  %p306_p4 = scmp.eq.s32.totalorder %s4819_s26, 1 }
   0xc   : > { %s6465_s30 = scalar_select %p287_p1, %s6334_s23, %s289_s28  }
   0xd   : > { %p6467_p5 = por %p300_p2, %p299_p0  ;;  %p6471_p6 = por %p306_p4, %p305_p3 }
   0xe   : > { %8450 = sst [smem:[#allocation15_spill]] %s6465_s30  ;;  %p4822_p7 = scmp.ge.s32.totalorder %s6338_s24, 1 }
   0xf   : > { %s8452_s14 = scalar_select %p6471_p6, 1, 0 }
  0x10   : > { %p365_p8 = scmp.lt.s32.totalorder %s6338_s24, 3 }
  0x11   : > { %8453 = sst [smem:[#allocation16_spill]] %s8452_s14 }
  0x12   : > { %p366_p9 = pnand %p4822_p7, %p365_p8 }
  0x13   : > { %p406_p10 = scmp.lt.s32.totalorder (!%p366_p9), %s6450_s25, 1  ;;  %s8454_s0 = sld [smem:[#allocation17_spill]] (!%p366_p9) }
  0x14   : > { %369 = sbr.rel (%p366_p9) target bundleno = 2406 (0x966), region = 68  ;;  %s8420_s20 = smov (!%p366_p9), 32  }
  0x15   : > { %s8421_s26 = smov (!%p366_p9), 60   ;;  %s8406_s28 = smov (!%p366_p9), 62  }
  0x16   : > { %s8392_s29 = smov (!%p366_p9), 61   ;;  %s8416_s17 = smov (!%p366_p9), 124  }
  0x17   : > { %s8394_s18 = smov (!%p366_p9), 93   ;;  %s8465_s30 = smov (!%p366_p9), 127  }
  0x18   : > { %s8466_s23 = smov (!%p366_p9), 96   ;;  %s8467_s27 = smov (!%p366_p9), 29  }
  0x19   : > { %s407_s15 = scalar_select %p406_p10, %s6450_s25, 1  ;;  %vm438_vm0 = vcmask 1043456   ;;  %vm8443_vm1 = vcmask 506880   ;;  %vm8433_vm2 = vcmask 261120   ;;  %vm8441_vm3 = vcmask 490496  }
  0x1a   : > { %vm913_vm4 = vcmask 498688   ;;  %vm8431_vm5 = vcmask 523264   ;;  %vm829_vm6 = vcmask 515072   ;;  %vm572_vm7 = vcmask 1014784   ;;  %s8468_s14 = smov 28   ;;  %s8469_s21 = smov 125  }
  0x1b   : > { %s6116_s16 = smul.u32 72, %s407_s15  ;;  %s8388_s15 = smov 64   ;;  %vm716_vm8 = vcmask 760832   ;;  %vm752_vm9 = vcmask 752640   ;;  %vm8438_vm10 = vcmask 777216   ;;  %vm500_vm11 = vcmask 1031168  }
  0x1c   : > { %vm8432_vm12 = vcmask 769024   ;;  %vm536_vm13 = vcmask 1022976   ;;  %vm608_vm14 = vcmask 785408   ;;  %s8470_s24 = smov 31   ;;  %vm464_vm15 = vcmask 1039360  }
  0x1d   : > { %s6482_s19 = scalar_lea.vmem %s8454_s0, %s6116_s16  ;;  %s8390_s16 = smov 63  }
  0x1e   : > { %v412_v0 = vld [vmem:[%s6482_s19] sm:$0xff]  ;;  %v413_v1 = vld [vmem:[%s6482_s19 + $0x8] sm:$0xff]  ;;  %v414_v2 = vld [vmem:[%s6482_s19 + $0x10] sm:$0xff]  ;;  %s8463_s0 = smov 94  }
  0x1f   : > { %v6487_v3 = vpack.c.bf16 %v413_v1, %v412_v0  ;;  %v415_v4 = vld [vmem:[%s6482_s19 + $0x18] sm:$0xff]  ;;  %v416_v5 = vld [vmem:[%s6482_s19 + $0x20] sm:$0xff]  ;;  %v417_v6 = vld [vmem:[%s6482_s19 + $0x28] sm:$0xff] }
  0x20   : > { %v6492_v7 = vpack.c.bf16 %v415_v4, %v414_v2  ;;  %v6494_v8 = vpack.c.bf16 %v417_v6, %v416_v5  ;;  %v418_v11 = vld [vmem:[%s6482_s19 + $0x30] sm:$0xff]  ;;  %v419_v12 = vld [vmem:[%s6482_s19 + $0x38] sm:$0xff] }
  0x21   : > { %426 = vst [vmem:[#allocation2] sm:$0xff] %v6487_v3  ;;  %981 = vrot.lane.b32.xlu1 %v6487_v3, %s8420_s20  ;;  %939 = vrot.lane.b32.xlu0 %v6487_v3, %s8421_s26  ;;  %v6549_v13 = vpack.c.bf16 %v419_v12, %v418_v11 }
  0x22   : > { %855 = vrot.lane.b32.xlu2 %v6487_v3, %s8406_s28  ;;  %427 = vst [vmem:[#allocation2 + $0x8] sm:$0xff] %v6492_v7 }
  0x23   : > { %428 = vst [vmem:[#allocation2 + $0x10] sm:$0xff] %v6494_v8 }
  0x24   : > { %429 = vst [vmem:[#allocation2 + $0x18] sm:$0xff] %v6549_v13 }
  0x29   : > { %983 = vrot.lane.b32.xlu1 %v6492_v7, %s8420_s20  ;;  %941 = vrot.lane.b32.xlu0 %v6492_v7, %s8421_s26  ;;  %v1294_v9 = vld [vmem:[#allocation2 + $0x4] sm:$0xff] }
  0x2a   : > { %857 = vrot.lane.b32.xlu2 %v6492_v7, %s8406_s28  ;;  %1185 = vst [vmem:[#allocation3 + $0x280] sm:$0xff] %v1294_v9  ;;  %v1295_v10 = vld [vmem:[#allocation2 + $0xc] sm:$0xff] }
  0x2b   : > { %v6589_v21 = vld [vmem:[#allocation2 + $0x14] sm:$0xff] }
  0x31   : > { %899 = vrot.lane.b32.xlu1 %v6492_v7, %s8392_s29  ;;  %897 = vrot.lane.b32.xlu0 %v6487_v3, %s8392_s29  ;;  %s8400_s29 = smov 94  }
  0x32   : > { %775 = vrot.lane.b32.xlu2 %v6487_v3, %s8388_s15 }
  0x39   : > { %777 = vrot.lane.b32.xlu0 %v6492_v7, %s8388_s15  ;;  %813 = vrot.lane.b32.xlu1 %v6487_v3, %s8390_s16  ;;  %s8396_s15 = smov 92  }
  0x3a   : > { %815 = vrot.lane.b32.xlu2 %v6492_v7, %s8390_s16  ;;  %s8398_s16 = smov 95  }
  0x41   : > { %1302 = vrot.lane.b32.xlu0 %v1294_v9, %s8416_s17  ;;  %1304 = vrot.lane.b32.xlu1 %v1295_v10, %s8416_s17 }
  0x42   : > { %703 = vrot.lane.b32.xlu2 %v6487_v3, %s8394_s18 }
  0x49   : > { %705 = vrot.lane.b32.xlu0 %v6492_v7, %s8394_s18  ;;  %739 = vrot.lane.b32.xlu1 %v6487_v3, %s8396_s15  ;;  %s8404_s18 = smov 126  }
  0x4a   : > { %741 = vrot.lane.b32.xlu2 %v6492_v7, %s8396_s15  ;;  %s8423_s15 = smov 125  }
  0x51   : > { %633 = vrot.lane.b32.xlu1 %v6492_v7, %s8398_s16  ;;  %631 = vrot.lane.b32.xlu0 %v6487_v3, %s8398_s16  ;;  %s8402_s16 = smov 96  }
  0x52   : > { %667 = vrot.lane.b32.xlu2 %v6487_v3, %s8400_s29 }
  0x59   : > { %1232 = vrot.lane.b32.xlu1 %v1294_v9, %s8404_s18  ;;  %669 = vrot.lane.b32.xlu0 %v6492_v7, %s8400_s29  ;;  %s8412_s29 = smov 127  }
  0x5a   : > { %1234 = vrot.lane.b32.xlu2 %v1295_v10, %s8404_s18 }
  0x61   : > { %1269 = vrot.lane.b32.xlu1 %v1295_v10, %s8423_s15  ;;  %1267 = vrot.lane.b32.xlu0 %v1294_v9, %s8423_s15 }
  0x62   : > { %559 = vrot.lane.b32.xlu2 %v6487_v3, %s8416_s17 }
  0x69   : > { %561 = vrot.lane.b32.xlu0 %v6492_v7, %s8416_s17  ;;  %595 = vrot.lane.b32.xlu1 %v6487_v3, %s8402_s16 }
  0x6a   : > { %597 = vrot.lane.b32.xlu2 %v6492_v7, %s8402_s16  ;;  %s8455_s16 = smov 61  }
  0x71   : > { %943 = vrot.lane.b32.xlu0 %v6494_v8, %s8421_s26  ;;  %985 = vrot.lane.b32.xlu1 %v6494_v8, %s8420_s20 }
  0x72   : > { %1197 = vrot.lane.b32.xlu2 %v1294_v9, %s8412_s29 }
  0x79   : > { %1199 = vrot.lane.b32.xlu0 %v1295_v10, %s8412_s29  ;;  %487 = vrot.lane.b32.xlu1 %v6487_v3, %s8404_s18 }
  0x7a   : > { %489 = vrot.lane.b32.xlu2 %v6492_v7, %s8404_s18  ;;  %s8408_s18 = smov 29  }
  0x7c   : > { %v856_v14 = vpop.permute.xlu2 %855 }
  0x7d   : > { %v865_v15 = vrot.slane %v856_v14, 4 }
  0x81   : > { %523 = vrot.lane.b32.xlu0 %v6487_v3, %s8423_s15  ;;  %525 = vrot.lane.b32.xlu1 %v6492_v7, %s8423_s15 }
  0x82   : > { %859 = vrot.lane.b32.xlu2 %v6494_v8, %s8406_s28  ;;  %s8410_s28 = smov 28  }
  0x84   : > { %v6574_v16 = vpop.permute.xlu2 %857 }
  0x85   : > { %v866_v17 = vrot.slane %v6574_v16, 4 }
  0x87   : > { %v870_v18 = vsel %vm438_vm0, %v865_v15, %v866_v17 }
  0x88   : > { %v872_v19 = vsel %vm8443_vm1, %v856_v14, %v870_v18 }
  0x89   : > { %883 = vst [vmem:[#allocation3 + $0x180] sm:$0xff] %v872_v19  ;;  %901 = vrot.lane.b32.xlu0 %v6494_v8, %s8455_s16  ;;  %1107 = vrot.lane.b32.xlu1 %v6487_v3, %s8408_s18 }
  0x8a   : > { %1109 = vrot.lane.b32.xlu2 %v6492_v7, %s8408_s18  ;;  %s8456_s18 = smov 64  }
  0x8c   : > { %v6587_v20 = vpop.permute.xlu2 %775 }
  0x8d   : > { %v783_v49 = vrot.slane %v6587_v20, 4 }
  0x90   : > { %v5018_v58 = vld [vmem:[#allocation3 + $0x180] sm:$0xf]  ;;  %v5924_v62 = vld [vmem:[#allocation3 + $0x184] sm:$0xf] }
  0x91   : > { %1149 = vrot.lane.b32.xlu0 %v6487_v3, %s8410_s28  ;;  %1151 = vrot.lane.b32.xlu1 %v6492_v7, %s8410_s28  ;;  %s8414_s28 = smov 31  }
  0x92   : > { %1306 = vrot.lane.b32.xlu2 %v6589_v21, %s8416_s17  ;;  %s8458_s17 = smov 93  }
  0x93   : > { %v982_v22 = vpop.permute.xlu1 %981  ;;  %v940_v23 = vpop.permute.xlu0 %939 }
  0x94   : > { %v6597_v24 = vpop.permute.xlu2 %815  ;;  %v991_v27 = vrot.slane %v982_v22, 4  ;;  %v949_v28 = vrot.slane %v940_v23, 4 }
  0x95   : > { %v824_v50 = vrot.slane %v6597_v24, 4 }
  0x99   : > { %452 = vrot.lane.b32.xlu1 %v6492_v7, %s8412_s29  ;;  %450 = vrot.lane.b32.xlu0 %v6487_v3, %s8412_s29  ;;  %s8457_s29 = smov 63  }
  0x9a   : > { %779 = vrot.lane.b32.xlu2 %v6494_v8, %s8456_s18 }
  0x9b   : > { %v6605_v25 = vpop.permute.xlu1 %983  ;;  %v6607_v26 = vpop.permute.xlu0 %941 }
  0x9c   : > { %v992_v29 = vrot.slane %v6605_v25, 4  ;;  %v950_v30 = vrot.slane %v6607_v26, 4  ;;  %v6611_v31 = vpop.permute.xlu2 %703 }
  0x9e   : > { %v996_v32 = vsel %vm438_vm0, %v991_v27, %v992_v29  ;;  %v954_v33 = vsel %vm438_vm0, %v949_v28, %v950_v30 }
  0x9f   : > { %v998_v34 = vsel %vm8433_vm2, %v982_v22, %v996_v32  ;;  %v956_v35 = vsel %vm8441_vm3, %v940_v23, %v954_v33  ;;  %v711_v22 = vrot.slane %v6611_v31, 4 }
  0xa0   : > { %1009 = vst [vmem:[#allocation3 + $0x1e0] sm:$0xff] %v998_v34 }
  0xa1   : > { %967 = vst [vmem:[#allocation3 + $0x1c0] sm:$0xff] %v956_v35  ;;  %1023 = vrot.lane.b32.xlu1 %v6487_v3, %s8414_s28  ;;  %817 = vrot.lane.b32.xlu0 %v6494_v8, %s8457_s29 }
  0xa2   : > { %1025 = vrot.lane.b32.xlu2 %v6492_v7, %s8414_s28  ;;  %s8418_s28 = smov 30  }
  0xa3   : > { %v6627_v36 = vpop.permute.xlu1 %899  ;;  %v898_v37 = vpop.permute.xlu0 %897 }
  0xa4   : > { %v908_v38 = vrot.slane %v6627_v36, 4  ;;  %v907_v39 = vrot.slane %v898_v37, 4  ;;  %v6630_v40 = vpop.permute.xlu2 %741 }
  0xa5   : > { %v748_v23 = vrot.slane %v6630_v40, 4 }
  0xa6   : > { %v912_v41 = vsel %vm438_vm0, %v907_v39, %v908_v38 }
  0xa7   : > { %v914_v42 = vsel %vm913_vm4, %v898_v37, %v912_v41  ;;  %v5936_v43 = vld [vmem:[#allocation3 + $0x1dc] sm:$0xf0]  ;;  %v5052_v44 = vld [vmem:[#allocation3 + $0x1e0] sm:$0xf0] }
  0xa8   : > { %925 = vst [vmem:[#allocation3 + $0x1a0] sm:$0xff] %v914_v42  ;;  %v5050_v45 = vld [vmem:[#allocation3 + $0x1c0] sm:$0xf]  ;;  %v5932_v46 = vld [vmem:[#allocation3 + $0x1c4] sm:$0xf] }
  0xa9   : > { %1067 = vrot.lane.b32.xlu1 %v6492_v7, %s8418_s28  ;;  %1065 = vrot.lane.b32.xlu0 %v6487_v3, %s8418_s28  ;;  %v5051_v47 = vor.u32 %v5936_v43, %v5050_v45  ;;  %v5055_v48 = vor.u32 %v5932_v46, %v5052_v44  ;;  %s8459_s28 = smov 92   ;;  %v420_v46 = vld [vmem:[%s6482_s19 + $0x40] sm:$0xff]  ;;  %s8464_s19 = smov 124  }
  0xaa   : > { %707 = vrot.lane.b32.xlu2 %v6494_v8, %s8458_s17 }
  0xab   : > { %1970 = vmatpush.bf16.msra.mxu0 %v5051_v47  ;;  %1996 = vmatpush.bf16.msra.mxu2 %v5055_v48  ;;  %v6644_v51 = vpop.permute.xlu0 %777  ;;  %v814_v52 = vpop.permute.xlu1 %813  ;;  %v425_v47 = vpack.c.bf16 %v420_v46, %v420_v46 }
  0xac   : > { %v784_v53 = vrot.slane %v6644_v51, 4  ;;  %v823_v54 = vrot.slane %v814_v52, 4  ;;  %v6647_v55 = vpop.permute.xlu2 %667 }
  0xad   : > { %430 = vst [vmem:[#allocation2 + $0x20] sm:$0xf] %v425_v47 }
  0xae   : > { %v787_v56 = vsel %vm438_vm0, %v783_v49, %v784_v53  ;;  %v828_v57 = vsel %vm438_vm0, %v823_v54, %v824_v50 }
  0xaf   : > { %v789_v59 = vsel %vm8431_vm5, %v6587_v20, %v787_v56  ;;  %v830_v60 = vsel %vm829_vm6, %v814_v52, %v828_v57  ;;  %v5928_v61 = vld [vmem:[#allocation3 + $0x19c] sm:$0xf0]  ;;  %v5020_v63 = vld [vmem:[#allocation3 + $0x1a0] sm:$0xf0] }
  0xb0   : > { %799 = vst [vmem:[#allocation3 + $0x140] sm:$0xff] %v789_v59  ;;  %v5019_v0 = vor.u32 %v5928_v61, %v5018_v58  ;;  %v5023_v1 = vor.u32 %v5924_v62, %v5020_v63 }
  0xb1   : > { %841 = vst [vmem:[#allocation3 + $0x160] sm:$0xff] %v830_v60  ;;  %945 = vrot.lane.b32.xlu1 %v6549_v13, %s8421_s26  ;;  %743 = vrot.lane.b32.xlu0 %v6494_v8, %s8459_s28  ;;  %s8461_s26 = smov 95  }
  0xb2   : > { %987 = vrot.lane.b32.xlu2 %v6549_v13, %s8420_s20  ;;  %1971 = vmatpush.bf16.msra.mxu0 %v5019_v0  ;;  %s8460_s20 = smov 126   ;;  %v675_v0 = vrot.slane %v6647_v55, 4 }
  0xb3   : > { %1997 = vmatpush.bf16.msra.mxu2 %v5023_v1  ;;  %v1303_v2 = vpop.permute.xlu0 %1302  ;;  %v6664_v3 = vpop.permute.xlu1 %1304 }
  0xb4   : > { %v1310_v4 = vrot.slane %v1303_v2, 4  ;;  %v1311_v5 = vrot.slane %v6664_v3, 4  ;;  %v6667_v6 = vpop.permute.xlu2 %1234 }
  0xb5   : > { %v1241_v1 = vrot.slane %v6667_v6, 4 }
  0xb6   : > { %v1314_v7 = vsel %vm438_vm0, %v1310_v4, %v1311_v5 }
  0xb7   : > { %v1315_v9 = vsel %vm572_vm7, %v1303_v2, %v1314_v7  ;;  %v4986_v10 = vld [vmem:[#allocation3 + $0x140] sm:$0xf]  ;;  %v5916_v11 = vld [vmem:[#allocation3 + $0x144] sm:$0xf] }
  0xb8   : > { %v5920_v12 = vld [vmem:[#allocation3 + $0x15c] sm:$0xf0]  ;;  %v4988_v14 = vld [vmem:[#allocation3 + $0x160] sm:$0xf0]  ;;  %v1734_v15 = vunpack.c.l.b16 %v1315_v9  ;;  %v1735_v18 = vunpack.c.h.b16 %v1315_v9 }
  0xb9   : > { %1271 = vrot.lane.b32.xlu1 %v6589_v21, %s8423_s15  ;;  %1236 = vrot.lane.b32.xlu0 %v6589_v21, %s8460_s20  ;;  %v4987_v19 = vor.u32 %v5920_v12, %v4986_v10  ;;  %v4991_v20 = vor.u32 %v5916_v11, %v4988_v14  ;;  %s8462_s15 = smov 62  }
  0xba   : > { %635 = vrot.lane.b32.xlu2 %v6494_v8, %s8461_s26  ;;  %v1838_v27 = vpack.c.b16 %v1734_v15, %v1734_v15  ;;  %v1839_v28 = vpack.c.b16 %v1735_v18, %v1735_v18 }
  0xbb   : > { %1972 = vmatpush.bf16.msra.mxu0 %v4987_v19  ;;  %1998 = vmatpush.bf16.msra.mxu2 %v4991_v20  ;;  %v6681_v32 = vpop.permute.xlu0 %705  ;;  %v740_v33 = vpop.permute.xlu1 %739 }
  0xbc   : > { %v712_v34 = vrot.slane %v6681_v32, 4  ;;  %v747_v35 = vrot.slane %v740_v33, 4  ;;  %v6684_v37 = vpop.permute.xlu2 %559  ;;  %v1947_v39 = vsel %vm438_vm0, %v1838_v27, 0  ;;  %v1950_v41 = vsel %vm438_vm0, %v1839_v28, 0 }
  0xbd   : > { %1986 = vmatpush.bf16.msra.mxu1 %v1947_v39  ;;  %2012 = vmatpush.bf16.msra.mxu3 %v1950_v41 }
  0xbe   : > { %v715_v42 = vsel %vm438_vm0, %v711_v22, %v712_v34  ;;  %v751_v43 = vsel %vm438_vm0, %v747_v35, %v748_v23 }
  0xbf   : > { %v717_v44 = vsel %vm716_vm8, %v6611_v31, %v715_v42  ;;  %v753_v45 = vsel %vm752_vm9, %v740_v33, %v751_v43  ;;  %v567_v43 = vrot.slane %v6684_v37, 4 }
  0xc0   : > { %727 = vst [vmem:[#allocation3 + $0x100] sm:$0xff] %v717_v44 }
  0xc1   : > { %763 = vst [vmem:[#allocation3 + $0x120] sm:$0xff] %v753_v45  ;;  %861 = vrot.lane.b32.xlu1 %v6549_v13, %s8462_s15  ;;  %671 = vrot.lane.b32.xlu0 %v6494_v8, %s8463_s0 }
  0xc2   : > { %903 = vrot.lane.b32.xlu2 %v6549_v13, %s8455_s16 }
  0xc3   : > { %v6704_v48 = vpop.permute.xlu1 %633  ;;  %v632_v49 = vpop.permute.xlu0 %631 }
  0xc4   : > { %v640_v31 = vrot.slane %v6704_v48, 4  ;;  %v639_v52 = vrot.slane %v632_v49, 4  ;;  %v6707_v54 = vpop.permute.xlu2 %597 }
  0xc5   : > { %v604_v44 = vrot.slane %v6707_v54, 4 }
  0xc6   : > { %v643_v56 = vsel %vm438_vm0, %v639_v52, %v640_v31 }
  0xc7   : > { %v645_v57 = vsel %vm8438_vm10, %v632_v49, %v643_v56  ;;  %v4954_v58 = vld [vmem:[#allocation3 + $0x100] sm:$0xf]  ;;  %v5908_v59 = vld [vmem:[#allocation3 + $0x104] sm:$0xf] }
  0xc8   : > { %655 = vst [vmem:[#allocation3 + $0xc0] sm:$0xff] %v645_v57  ;;  %v5912_v60 = vld [vmem:[#allocation3 + $0x11c] sm:$0xf0]  ;;  %v4956_v61 = vld [vmem:[#allocation3 + $0x120] sm:$0xf0] }
  0xc9   : > { %563 = vrot.lane.b32.xlu1 %v6494_v8, %s8464_s19  ;;  %1201 = vrot.lane.b32.xlu0 %v6589_v21, %s8465_s30  ;;  %v4955_v62 = vor.u32 %v5912_v60, %v4954_v58  ;;  %v4959_v63 = vor.u32 %v5908_v59, %v4956_v61 }
  0xca   : > { %599 = vrot.lane.b32.xlu2 %v6494_v8, %s8466_s23 }
  0xcb   : > { %1973 = vmatpush.bf16.msra.mxu0 %v4955_v62  ;;  %1999 = vmatpush.bf16.msra.mxu2 %v4959_v63  ;;  %v1233_v2 = vpop.permute.xlu1 %1232  ;;  %v6721_v4 = vpop.permute.xlu0 %669 }
  0xcc   : > { %v1240_v7 = vrot.slane %v1233_v2, 4  ;;  %v676_v9 = vrot.slane %v6721_v4, 4  ;;  %v6724_v21 = vpop.permute.xlu2 %1197 }
  0xce   : > { %v1244_v10 = vsel %vm438_vm0, %v1240_v7, %v1241_v1  ;;  %v679_v11 = vsel %vm438_vm0, %v675_v0, %v676_v9 }
  0xcf   : > { %v1245_v12 = vsel %vm500_vm11, %v1233_v2, %v1244_v10  ;;  %v681_v14 = vsel %vm8432_vm12, %v6647_v55, %v679_v11  ;;  %v4922_v28 = vld [vmem:[#allocation3 + $0xc0] sm:$0xf]  ;;  %v5900_v33 = vld [vmem:[#allocation3 + $0xc4] sm:$0xf]  ;;  %vm1165_vm12 = vcmask 228352  }
  0xd0   : > { %1255 = vst [vmem:[#allocation3 + $0x2c0] sm:$0xff] %v1245_v12 }
  0xd1   : > { %691 = vst [vmem:[#allocation3 + $0xe0] sm:$0xff] %v681_v14  ;;  %819 = vrot.lane.b32.xlu1 %v6549_v13, %s8457_s29  ;;  %781 = vrot.lane.b32.xlu0 %v6549_v13, %s8456_s18 }
  0xd2   : > { %1111 = vrot.lane.b32.xlu2 %v6494_v8, %s8467_s27 }
  0xd3   : > { %v6741_v15 = vpop.permute.xlu1 %1269  ;;  %v1268_v18 = vpop.permute.xlu0 %1267 }
  0xd4   : > { %v1276_v19 = vrot.slane %v6741_v15, 4  ;;  %v1275_v20 = vrot.slane %v1268_v18, 4  ;;  %v6744_v22 = vpop.permute.xlu2 %489 }
  0xd6   : > { %v1279_v55 = vsel %vm438_vm0, %v1275_v20, %v1276_v19 }
  0xd7   : > { %v1280_v27 = vsel %vm536_vm13, %v1268_v18, %v1279_v55  ;;  %v5178_v59 = vld [vmem:[#allocation3 + $0x2c0] sm:$0xf]  ;;  %v5964_v0 = vld [vmem:[#allocation3 + $0x2c4] sm:$0xf]  ;;  %v6804_v55 = vld [vmem:[#allocation2 + $0x1c] sm:$0xff] }
  0xd8   : > { %1290 = vst [vmem:[#allocation3 + $0x2e0] sm:$0xff] %v1280_v27  ;;  %v5904_v35 = vld [vmem:[#allocation3 + $0xdc] sm:$0xf0]  ;;  %v4924_v39 = vld [vmem:[#allocation3 + $0xe0] sm:$0xf0] }
  0xd9   : > { %491 = vrot.lane.b32.xlu1 %v6494_v8, %s8460_s20  ;;  %1153 = vrot.lane.b32.xlu0 %v6494_v8, %s8468_s14  ;;  %v4923_v41 = vor.u32 %v5904_v35, %v4922_v28  ;;  %v4927_v42 = vor.u32 %v5900_v33, %v4924_v39 }
  0xda   : > { %527 = vrot.lane.b32.xlu2 %v6494_v8, %s8469_s21 }
  0xdb   : > { %1974 = vmatpush.bf16.msra.mxu0 %v4923_v41  ;;  %2000 = vmatpush.bf16.msra.mxu2 %v4927_v42  ;;  %v6758_v45 = vpop.permute.xlu0 %561  ;;  %v596_v46 = vpop.permute.xlu1 %595  ;;  %v1205_v42 = vrot.slane %v6724_v21, 4 }
  0xdc   : > { %v568_v47 = vrot.slane %v6758_v45, 4  ;;  %v603_v49 = vrot.slane %v596_v46, 4  ;;  %v6761_v52 = vpop.permute.xlu2 %859 }
  0xdd   : > { %v867_v56 = vrot.slane %v6761_v52, 4 }
  0xde   : > { %v571_v57 = vsel %vm438_vm0, %v567_v43, %v568_v47  ;;  %v607_v58 = vsel %vm438_vm0, %v603_v49, %v604_v44 }
  0xdf   : > { %v573_v60 = vsel %vm572_vm7, %v6684_v37, %v571_v57  ;;  %v609_v61 = vsel %vm608_vm14, %v596_v46, %v607_v58  ;;  %v873_v62 = vsel %vm438_vm0, %v866_v17, %v867_v56  ;;  %v5968_v63 = vld [vmem:[#allocation3 + $0x2dc] sm:$0xf0]  ;;  %v5180_v2 = vld [vmem:[#allocation3 + $0x2e0] sm:$0xf0] }
  0xe0   : > { %583 = vst [vmem:[#allocation3 + $0x80] sm:$0xff] %v573_v60  ;;  %v874_v7 = vsel %vm8443_vm1, %v6574_v16, %v873_v62  ;;  %v5179_v10 = vor.u32 %v5968_v63, %v5178_v59  ;;  %v5183_v11 = vor.u32 %v5964_v0, %v5180_v2 }
  0xe1   : > { %619 = vst [vmem:[#allocation3 + $0xa0] sm:$0xff] %v609_v61  ;;  %745 = vrot.lane.b32.xlu1 %v6549_v13, %s8459_s28  ;;  %709 = vrot.lane.b32.xlu0 %v6549_v13, %s8458_s17  ;;  %s8471_s28 = smov 30   ;;  %v431_v61 = vld [vmem:[#allocation2] sm:$0xff] }
  0xe2   : > { %884 = vst [vmem:[#allocation3 + $0x188] sm:$0xff] %v874_v7  ;;  %1027 = vrot.lane.b32.xlu2 %v6494_v8, %s8470_s24  ;;  %1987 = vmatpush.bf16.msra.mxu1 %v5179_v10  ;;  %v5146_v10 = vld [vmem:[#allocation3 + $0x280] sm:$0xf] }
  0xe3   : > { %2013 = vmatpush.bf16.msra.mxu3 %v5183_v11  ;;  %v6786_v17 = vpop.permute.xlu0 %943  ;;  %v6788_v37 = vpop.permute.xlu1 %985  ;;  %435 = vst [vmem:[#allocation3] sm:$0xff] %v431_v61  ;;  %v5956_v11 = vld [vmem:[#allocation3 + $0x284] sm:$0xf] }
  0xe4   : > { %v951_v16 = vrot.slane %v6786_v17, 4  ;;  %v993_v12 = vrot.slane %v6788_v37, 4  ;;  %v6792_v14 = vpop.permute.xlu2 %1109 }
  0xe6   : > { %v957_v18 = vsel %vm438_vm0, %v950_v30, %v951_v16  ;;  %v999_v20 = vsel %vm438_vm0, %v992_v29, %v993_v12 }
  0xe7   : > { %v958_v27 = vsel %vm8441_vm3, %v6607_v26, %v957_v18  ;;  %v1000_v28 = vsel %vm8433_vm2, %v6605_v25, %v999_v20  ;;  %v4890_v33 = vld [vmem:[#allocation3 + $0x80] sm:$0xf]  ;;  %v5892_v35 = vld [vmem:[#allocation3 + $0x84] sm:$0xf]  ;;  %v496_v26 = vrot.slane %v6744_v22, 4 }
  0xe8   : > { %968 = vst [vmem:[#allocation3 + $0x1c8] sm:$0xff] %v958_v27  ;;  %v5896_v39 = vld [vmem:[#allocation3 + $0x9c] sm:$0xf0]  ;;  %v4892_v41 = vld [vmem:[#allocation3 + $0xa0] sm:$0xf0] }
  0xe9   : > { %1010 = vst [vmem:[#allocation3 + $0x1e8] sm:$0xff] %v1000_v28  ;;  %1308 = vrot.lane.b32.xlu1 %v6804_v55, %s8464_s19  ;;  %1069 = vrot.lane.b32.xlu0 %v6494_v8, %s8471_s28  ;;  %v4891_v29 = vor.u32 %v5896_v39, %v4890_v33  ;;  %v4895_v30 = vor.u32 %v5892_v35, %v4892_v41  ;;  %v933_v20 = vld [vmem:[#allocation2 + $0x20] sm:$0xf] }
  0xea   : > { %454 = vrot.lane.b32.xlu2 %v6494_v8, %s8465_s30  ;;  %v975_v33 = vld [vmem:[#allocation2 + $0x20] sm:$0xf] }
  0xeb   : > { %1975 = vmatpush.bf16.msra.mxu0 %v4891_v29  ;;  %2001 = vmatpush.bf16.msra.mxu2 %v4895_v30  ;;  %v6818_v25 = vpop.permute.xlu0 %1199  ;;  %v488_v43 = vpop.permute.xlu1 %487 }
  0xec   : > { %v1206_v46 = vrot.slane %v6818_v25, 4  ;;  %v6821_v49 = vpop.permute.xlu2 %1306  ;;  %v495_v57 = vrot.slane %v488_v43, 4 }
  0xee   : > { %v1209_v58 = vsel %vm438_vm0, %v1205_v42, %v1206_v46  ;;  %v499_v59 = vsel %vm438_vm0, %v495_v57, %v496_v26  ;;  %v1118_v42 = vrot.slane %v6792_v14, 4 }
  0xef   : > { %v1210_v8 = vsel %vm464_vm15, %v6724_v21, %v1209_v58  ;;  %v501_v60 = vsel %vm500_vm11, %v488_v43, %v499_v59 }
  0xf0   : > { %1220 = vst [vmem:[#allocation3 + $0x2a0] sm:$0xff] %v1210_v8 }
  0xf1   : > { %511 = vst [vmem:[#allocation3 + $0x40] sm:$0xff] %v501_v60  ;;  %673 = vrot.lane.b32.xlu1 %v6549_v13, %s8463_s0  ;;  %637 = vrot.lane.b32.xlu0 %v6549_v13, %s8461_s26  ;;  %s8472_s0 = smov 60   ;;  %s8473_s26 = smov 32  }
  0xf2   : > { %565 = vrot.lane.b32.xlu2 %v6549_v13, %s8464_s19 }
  0xf3   : > { %v524_v62 = vpop.permute.xlu0 %523  ;;  %v6838_v63 = vpop.permute.xlu1 %525 }
  0xf4   : > { %v6840_v0 = vpop.permute.xlu2 %779  ;;  %v531_v21 = vrot.slane %v524_v62, 4  ;;  %v532_v2 = vrot.slane %v6838_v63, 4 }
  0xf5   : > { %v785_v7 = vrot.slane %v6840_v0, 4 }
  0xf6   : > { %v535_v18 = vsel %vm438_vm0, %v531_v21, %v532_v2 }
  0xf7   : > { %v790_v27 = vsel %vm438_vm0, %v784_v53, %v785_v7  ;;  %v537_v28 = vsel %vm536_vm13, %v524_v62, %v535_v18  ;;  %v5960_v35 = vld [vmem:[#allocation3 + $0x29c] sm:$0xf0]  ;;  %v5148_v39 = vld [vmem:[#allocation3 + $0x2a0] sm:$0xf0] }
  0xf8   : > { %v791_v41 = vsel %vm8431_vm5, %v6644_v51, %v790_v27  ;;  %547 = vst [vmem:[#allocation3 + $0x60] sm:$0xff] %v537_v28  ;;  %v5147_v29 = vor.u32 %v5960_v35, %v5146_v10  ;;  %v5151_v30 = vor.u32 %v5956_v11, %v5148_v39  ;;  %vm8442_vm5 = vcmask 236544   ;;  %v4858_v60 = vld [vmem:[#allocation3 + $0x40] sm:$0xf]  ;;  %v5884_v10 = vld [vmem:[#allocation3 + $0x44] sm:$0xf] }
  0xf9   : > { %800 = vst [vmem:[#allocation3 + $0x148] sm:$0xff] %v791_v41  ;;  %947 = vrot.lane.b32.xlu1 %v933_v20, %s8472_s0  ;;  %601 = vrot.lane.b32.xlu0 %v6549_v13, %s8466_s23  ;;  %v849_v41 = vld [vmem:[#allocation2 + $0x20] sm:$0xf] }
  0xfa   : > { %989 = vrot.lane.b32.xlu2 %v975_v33, %s8473_s26  ;;  %1988 = vmatpush.bf16.msra.mxu1 %v5147_v29 }
  0xfb   : > { %2014 = vmatpush.bf16.msra.mxu3 %v5151_v30  ;;  %v6860_v53 = vpop.permute.xlu0 %901  ;;  %v1108_v43 = vpop.permute.xlu1 %1107 }
  0xfc   : > { %v6862_v57 = vpop.permute.xlu2 %1025  ;;  %v909_v51 = vrot.slane %v6860_v53, 4  ;;  %v1117_v58 = vrot.slane %v1108_v43, 4 }
  0xfe   : > { %v915_v59 = vsel %vm438_vm0, %v908_v38, %v909_v51  ;;  %v1122_v8 = vsel %vm438_vm0, %v1117_v58, %v1118_v42 }
  0xff   : > { %v916_v61 = vsel %vm913_vm4, %v6627_v36, %v915_v59  ;;  %v1124_v62 = vsel %vm8442_vm5, %v1108_v43, %v1122_v8  ;;  %v5888_v21 = vld [vmem:[#allocation3 + $0x5c] sm:$0xf0]  ;;  %v4860_v11 = vld [vmem:[#allocation3 + $0x60] sm:$0xf0]  ;;  %v891_v43 = vld [vmem:[#allocation2 + $0x20] sm:$0xf] }
 0x100   : > { %926 = vst [vmem:[#allocation3 + $0x1a8] sm:$0xff] %v916_v61  ;;  %v4859_v18 = vor.u32 %v5888_v21, %v4858_v60  ;;  %v4863_v20 = vor.u32 %v5884_v10, %v4860_v11  ;;  %v8434_v59 = vrot.slane %v6821_v49, 4  ;;  %v807_v11 = vld [vmem:[#allocation2 + $0x20] sm:$0xf] }
 0x101   : > { %1135 = vst [vmem:[#allocation3 + $0x240] sm:$0xff] %v1124_v62  ;;  %1273 = vrot.lane.b32.xlu1 %v6804_v55, %s8469_s21  ;;  %1238 = vrot.lane.b32.xlu0 %v6804_v55, %s8460_s20 }
 0x102   : > { %493 = vrot.lane.b32.xlu2 %v6549_v13, %s8460_s20  ;;  %1976 = vmatpush.bf16.msra.mxu0 %v4859_v18 }
 0x103   : > { %2002 = vmatpush.bf16.msra.mxu2 %v4863_v20  ;;  %v1150_v36 = vpop.permute.xlu0 %1149  ;;  %v6882_v38 = vpop.permute.xlu1 %1151 }
 0x104   : > { %v6884_v27 = vpop.permute.xlu2 %707  ;;  %v1159_v28 = vrot.slane %v1150_v36, 4  ;;  %v8437_v33 = vrot.slane %v6882_v38, 4 }
 0x105   : > { %v8436_v35 = vrot.slane %v6884_v27, 4 }
 0x106   : > { %v1164_v39 = vsel %vm438_vm0, %v1159_v28, %v8437_v33 }
 0x107   : > { %v718_v29 = vsel %vm438_vm0, %v712_v34, %v8436_v35  ;;  %v1166_v30 = vsel %vm1165_vm12, %v1150_v36, %v1164_v39 }
 0x108   : > { %v719_v58 = vsel %vm716_vm8, %v6681_v32, %v718_v29  ;;  %1177 = vst [vmem:[#allocation3 + $0x260] sm:$0xff] %v1166_v30  ;;  %v1316_v32 = vsel %vm438_vm0, %v1311_v5, %v8434_v59  ;;  %v5114_v18 = vld [vmem:[#allocation3 + $0x240] sm:$0xf]  ;;  %v5948_v39 = vld [vmem:[#allocation3 + $0x244] sm:$0xf] }
 0x109   : > { %728 = vst [vmem:[#allocation3 + $0x108] sm:$0xff] %v719_v58  ;;  %863 = vrot.lane.b32.xlu1 %v849_v41, %s8462_s15  ;;  %529 = vrot.lane.b32.xlu0 %v6549_v13, %s8469_s21  ;;  %v6926_v5 = vsel %vm572_vm7, %v6664_v3, %v1316_v32 }
 0x10a   : > { %905 = vrot.lane.b32.xlu2 %v891_v43, %s8455_s16 }
 0x10b   : > { %v6904_v8 = vpop.permute.xlu1 %452  ;;  %v451_v34 = vpop.permute.xlu0 %450 }
 0x10c   : > { %v6906_v60 = vpop.permute.xlu2 %987  ;;  %v459_v61 = vrot.slane %v6904_v8, 4  ;;  %v458_v62 = vrot.slane %v451_v34, 4 }
 0x10d   : > { %v8435_v21 = vrot.slane %v6906_v60, 4 }
 0x10e   : > { %v463_v10 = vsel %vm438_vm0, %v458_v62, %v459_v61 }
 0x10f   : > { %v1001_v20 = vsel %vm438_vm0, %v993_v12, %v8435_v21  ;;  %v465_v36 = vsel %vm464_vm15, %v451_v34, %v463_v10  ;;  %v5952_v28 = vld [vmem:[#allocation3 + $0x25c] sm:$0xf0]  ;;  %v5116_v41 = vld [vmem:[#allocation3 + $0x260] sm:$0xf0]  ;;  %v1034_v12 = vrot.slane %v6862_v57, 4 }
 0x110   : > { %v1002_v29 = vsel %vm8433_vm2, %v6788_v37, %v1001_v20  ;;  %475 = vst [vmem:[#allocation3 + $0x20] sm:$0xff] %v465_v36  ;;  %v5115_v30 = vor.u32 %v5952_v28, %v5114_v18  ;;  %v5119_v43 = vor.u32 %v5948_v39, %v5116_v41  ;;  %v1737_v37 = vunpack.c.h.b16 %v6926_v5  ;;  %v6942_v34 = vld [vmem:[%s8376_s1] sm:$0xff]  ;;  %v5876_v18 = vld [vmem:[#allocation3 + $0x4] sm:$0xf]  ;;  %v5933_v28 = vld [vmem:[#allocation3 + $0x1cc] sm:$0xf] }
 0x111   : > { %1011 = vst [vmem:[#allocation3 + $0x1f0] sm:$0xff] %v1002_v29  ;;  %456 = vrot.lane.b32.xlu1 %v6549_v13, %s8465_s30  ;;  %1203 = vrot.lane.b32.xlu0 %v6804_v55, %s8465_s30  ;;  %vm8444_vm2 = vcmask 252928   ;;  %v5060_v39 = vld [vmem:[#allocation3 + $0x1e8] sm:$0xf0]  ;;  %v1437_v41 = vunpack.c.l.b16 %v6942_v34 }
 0x112   : > { %821 = vrot.lane.b32.xlu2 %v807_v11, %s8457_s29  ;;  %1989 = vmatpush.bf16.msra.mxu1 %v5115_v30  ;;  %v4826_v11 = vld [vmem:[#allocation3] sm:$0xf]  ;;  %v1841_v21 = vpack.c.b16 %v1737_v37, %v1737_v37  ;;  %s6363_s29 = smov 122  }
 0x113   : > { %2015 = vmatpush.bf16.msra.mxu3 %v5119_v43  ;;  %v1024_v3 = vpop.permute.xlu1 %1023  ;;  %v6936_v58 = vpop.permute.xlu0 %817 }
 0x114   : > { %v6944_v62 = vpop.permute.xlu2 %635  ;;  %v1033_v55 = vrot.slane %v1024_v3, 4  ;;  %v825_v32 = vrot.slane %v6936_v58, 4  ;;  %v1956_v37 = vsel %vm438_vm0, %v1841_v21, 0 }
 0x115   : > { %v641_v10 = vrot.slane %v6944_v62, 4 }
 0x116   : > { %v1038_v20 = vsel %vm438_vm0, %v1033_v55, %v1034_v12  ;;  %v831_v36 = vsel %vm438_vm0, %v824_v50, %v825_v32 }
 0x117   : > { %v646_v29 = vsel %vm438_vm0, %v640_v31, %v641_v10  ;;  %v1040_v30 = vsel %vm8444_vm2, %v1024_v3, %v1038_v20  ;;  %v832_v43 = vsel %vm829_vm6, %v6597_v24, %v831_v36  ;;  %v5880_v55 = vld [vmem:[#allocation3 + $0x1c] sm:$0xf0]  ;;  %v4828_v59 = vld [vmem:[#allocation3 + $0x20] sm:$0xf0]  ;;  %v5063_v31 = vor.u32 %v5933_v28, %v5060_v39  ;;  %v5028_v24 = vld [vmem:[#allocation3 + $0x1a8] sm:$0xf0] }
 0x118   : > { %v647_v50 = vsel %vm8438_vm10, %v6704_v48, %v646_v29  ;;  %1051 = vst [vmem:[#allocation3 + $0x200] sm:$0xff] %v1040_v30  ;;  %v4827_v35 = vor.u32 %v5880_v55, %v4826_v11  ;;  %v4831_v33 = vor.u32 %v5876_v18, %v4828_v59  ;;  %v6973_v3 = vpack.c.b16 %v1437_v41, %v1437_v41  ;;  %v5925_v36 = vld [vmem:[#allocation3 + $0x18c] sm:$0xf]  ;;  %v1101_v39 = vld [vmem:[#allocation2 + $0x20] sm:$0xf] }
 0x119   : > { %656 = vst [vmem:[#allocation3 + $0xc8] sm:$0xff] %v647_v50  ;;  %1155 = vrot.lane.b32.xlu1 %v6549_v13, %s8468_s14  ;;  %1113 = vrot.lane.b32.xlu0 %v6549_v13, %s8467_s27  ;;  %vm1081_vm10 = vcmask 244736   ;;  %v5031_v28 = vor.u32 %v5925_v36, %v5028_v24  ;;  %v1143_v29 = vld [vmem:[#allocation2 + $0x20] sm:$0xf]  ;;  %v5058_v36 = vld [vmem:[#allocation3 + $0x1c8] sm:$0xf] }
 0x11a   : > { %842 = vst [vmem:[#allocation3 + $0x168] sm:$0xff] %v832_v43  ;;  %1029 = vrot.lane.b32.xlu2 %v6549_v13, %s8470_s24  ;;  %1977 = vmatpush.bf16.msra.mxu0 %v4827_v35  ;;  %v5917_v43 = vld [vmem:[#allocation3 + $0x14c] sm:$0xf] }
 0x11b   : > { %2003 = vmatpush.bf16.msra.mxu2 %v4831_v33  ;;  %v6975_v48 = vpop.permute.xlu1 %1067  ;;  %v1066_v59 = vpop.permute.xlu0 %1065 }
 0x11c   : > { %v6978_v11 = vpop.permute.xlu2 %903  ;;  %v1076_v18 = vrot.slane %v6975_v48, 4  ;;  %v1075_v20 = vrot.slane %v1066_v59, 4 }
 0x11d   : > { %v910_v35 = vrot.slane %v6978_v11, 4  ;;  %1978 = vmatmul.bf16.vlgmr.msra.gmra.mxu0 %v6973_v3 }
 0x11e   : > { %2048 = vmatpush.bf16.msrb.mxu0 %v5063_v31  ;;  %v1080_v33 = vsel %vm438_vm0, %v1075_v20, %v1076_v18  ;;  %2004 = vmatmul.bf16.vlgmr.msra.gmra.mxu2 %v6973_v3  ;;  %v1736_v31 = vunpack.c.l.b16 %v6926_v5  ;;  %v1438_v5 = vunpack.c.h.b16 %v6942_v34 }
 0x11f   : > { %2064 = vmatpush.bf16.msrb.mxu2 %v1956_v37  ;;  %v917_v21 = vsel %vm438_vm0, %v909_v51, %v910_v35  ;;  %v1082_v41 = vsel %vm1081_vm10, %v1066_v59, %v1080_v33  ;;  %v1182_v51 = vld [vmem:[#allocation2 + $0xc] sm:$0xff] }
 0x120   : > { %v918_v30 = vsel %vm913_vm4, %v6860_v53, %v917_v21  ;;  %1093 = vst [vmem:[#allocation3 + $0x220] sm:$0xff] %v1082_v41  ;;  %v1059_v21 = vld [vmem:[#allocation2 + $0x20] sm:$0xf] }
 0x121   : > { %927 = vst [vmem:[#allocation3 + $0x1b0] sm:$0xff] %v918_v30  ;;  %1115 = vrot.lane.b32.xlu1 %v1101_v39, %s8467_s27  ;;  %1071 = vrot.lane.b32.xlu0 %v6549_v13, %s8471_s28  ;;  %v4996_v55 = vld [vmem:[#allocation3 + $0x168] sm:$0xf0]  ;;  %v1017_v41 = vld [vmem:[#allocation2 + $0x20] sm:$0xf]  ;;  %v1840_v30 = vpack.c.b16 %v1736_v31, %v1736_v31 }
 0x122   : > { %2049 = vmatpush.bf16.msrb.mxu0 %v5031_v28  ;;  %v4999_v50 = vor.u32 %v5917_v43, %v4996_v55  ;;  %1157 = vrot.lane.b32.xlu2 %v1143_v29, %s8468_s14  ;;  %1186 = vst [vmem:[#allocation3 + $0x288] sm:$0xff] %v1182_v51  ;;  %v5937_v28 = vld [vmem:[#allocation3 + $0x1e4] sm:$0xf0]  ;;  %v5082_v29 = vld [vmem:[#allocation3 + $0x200] sm:$0xf]  ;;  %s6361_s14 = smov 58  }
 0x123   : > { %v7000_v24 = vpop.permute.xlu1 %945  ;;  %v7002_v59 = vpop.permute.xlu0 %743 }
 0x124   : > { %v7004_v53 = vpop.permute.xlu2 %599  ;;  %v8439_v37 = vrot.slane %v7000_v24, 4  ;;  %v749_v20 = vrot.slane %v7002_v59, 4 }
 0x125   : > { %v8440_v13 = vrot.slane %v7004_v53, 4 }
 0x126   : > { %2050 = vmatpush.bf16.msrb.mxu0 %v4999_v50  ;;  %v959_v33 = vsel %vm438_vm0, %v951_v16, %v8439_v37  ;;  %v754_v39 = vsel %vm438_vm0, %v748_v23, %v749_v20  ;;  %v5940_v50 = vld [vmem:[#allocation3 + $0x204] sm:$0xf] }
 0x127   : > { %v610_v34 = vsel %vm438_vm0, %v604_v44, %v8440_v13  ;;  %v960_v43 = vsel %vm8441_vm3, %v6786_v17, %v959_v33  ;;  %v755_v16 = vsel %vm752_vm9, %v6630_v40, %v754_v39  ;;  %v5944_v55 = vld [vmem:[#allocation3 + $0x21c] sm:$0xf0]  ;;  %v5084_v51 = vld [vmem:[#allocation3 + $0x220] sm:$0xf0]  ;;  %v5059_v44 = vor.u32 %v5937_v28, %v5058_v36  ;;  %v5929_v17 = vld [vmem:[#allocation3 + $0x1a4] sm:$0xf0] }
 0x128   : > { %v611_v23 = vsel %vm608_vm14, %v6707_v54, %v610_v34  ;;  %969 = vst [vmem:[#allocation3 + $0x1d0] sm:$0xff] %v960_v43  ;;  %v5083_v31 = vor.u32 %v5944_v55, %v5082_v29  ;;  %v5087_v37 = vor.u32 %v5940_v50, %v5084_v51  ;;  %v7033_v13 = vpack.c.b16 %v1438_v5, %v1438_v5  ;;  %v432_v39 = vld [vmem:[#allocation2 + $0x8] sm:$0xff] }
 0x129   : > { %620 = vst [vmem:[#allocation3 + $0xa8] sm:$0xff] %v611_v23  ;;  %1073 = vrot.lane.b32.xlu1 %v1059_v21, %s8471_s28  ;;  %1031 = vrot.lane.b32.xlu0 %v1017_v41, %s8470_s24  ;;  %v1953_v40 = vsel %vm438_vm0, %v1840_v30, 0  ;;  %vm1942_vm3 = vcmask 588800   ;;  %v5026_v5 = vld [vmem:[#allocation3 + $0x188] sm:$0xf]  ;;  %s404_s24 = sand.u32 1, %s6330_s22  }
 0x12a   : > { %764 = vst [vmem:[#allocation3 + $0x128] sm:$0xff] %v755_v16  ;;  %1990 = vmatpush.bf16.msra.mxu1 %v5083_v31  ;;  %2016 = vmatpush.bf16.msra.mxu3 %v5087_v37  ;;  %v5027_v41 = vor.u32 %v5929_v17, %v5026_v5  ;;  %v5921_v34 = vld [vmem:[#allocation3 + $0x164] sm:$0xf0] }
 0x12b   : > { %v7036_v33 = vpop.permute.xlu1 %1271  ;;  %v7038_v54 = vpop.permute.xlu0 %1236  ;;  %436 = vst [vmem:[#allocation3 + $0x8] sm:$0xff] %v432_v39  ;;  %v4994_v50 = vld [vmem:[#allocation3 + $0x148] sm:$0xf]  ;;  %v6359_v39 = vmov 0  }
 0x12c   : > { %v7040_v21 = vpop.permute.xlu2 %1111  ;;  %v1277_v36 = vrot.slane %v7036_v33, 4  ;;  %v1242_v28 = vrot.slane %v7038_v54, 4  ;;  %v4995_v23 = vor.u32 %v5921_v34, %v4994_v50  ;;  %v4962_v17 = vld [vmem:[#allocation3 + $0x108] sm:$0xf]  ;;  %6180 = vset.pattern.permute.xlu2 %v6359_v39  ;;  %6221 = vset.pattern.permute.xlu0 %v6359_v39 }
 0x12d   : > { %v1119_v37 = vrot.slane %v7040_v21, 4  ;;  %5209 = vmatmul.msk.bf16.vlgmr.msra.gmra.mxu3 %vm1942_vm3, %v7033_v13  ;;  %5208 = vmatmul.msk.bf16.vlgmr.msra.gmra.mxu1 %vm1942_vm3, %v7033_v13 }
 0x12e   : > { %2022 = vmatpush.bf16.msrb.mxu1 %v5059_v44  ;;  %2038 = vmatpush.bf16.msrb.mxu3 %v1953_v40  ;;  %v1281_v29 = vsel %vm438_vm0, %v1276_v19, %v1277_v36  ;;  %v1246_v30 = vsel %vm438_vm0, %v1241_v1, %v1242_v28  ;;  %v5909_v1 = vld [vmem:[#allocation3 + $0x10c] sm:$0xf] }
 0x12f   : > { %v1125_v43 = vsel %vm438_vm0, %v1118_v42, %v1119_v37  ;;  %v1282_v16 = vsel %vm536_vm13, %v6741_v15, %v1281_v29  ;;  %v1247_v55 = vsel %vm500_vm11, %v6667_v6, %v1246_v30 }
 0x130   : > { %v1126_v19 = vsel %vm8442_vm5, %v6792_v14, %v1125_v43  ;;  %1291 = vst [vmem:[#allocation3 + $0x2e8] sm:$0xff] %v1282_v16  ;;  %vm8474_vm5 = vcmask 769024  }
 0x131   : > { %1136 = vst [vmem:[#allocation3 + $0x248] sm:$0xff] %v1126_v19  ;;  %v4964_v51 = vld [vmem:[#allocation3 + $0x128] sm:$0xf0]  ;;  %v5913_v44 = vld [vmem:[#allocation3 + $0x124] sm:$0xf0]  ;;  %v1430_v19 = vld [vmem:[%s8377_s2] sm:$0xff] }
 0x132   : > { %2023 = vmatpush.bf16.msrb.mxu1 %v5027_v41  ;;  %1256 = vst [vmem:[#allocation3 + $0x2c8] sm:$0xff] %v1247_v55  ;;  %v4967_v31 = vor.u32 %v5909_v1, %v4964_v51  ;;  %v4963_v41 = vor.u32 %v5913_v44, %v4962_v17  ;;  %1433 = vperm.xlu2 %6180, %v1430_v19  }
 0x133   : > { %v7070_v42 = vpop.permute.xlu1 %861  ;;  %v7072_v15 = vpop.permute.xlu0 %671 }
 0x134   : > { %2051 = vmatpush.bf16.msrb.mxu0 %v4967_v31  ;;  %v7074_v6 = vpop.permute.xlu2 %527  ;;  %v868_v40 = vrot.slane %v7070_v42, 4  ;;  %v677_v14 = vrot.slane %v7072_v15, 4 }
 0x135   : > { %v533_v5 = vrot.slane %v7074_v6, 4 }
 0x136   : > { %2024 = vmatpush.bf16.msrb.mxu1 %v4995_v23  ;;  %v875_v29 = vsel %vm438_vm0, %v867_v56, %v868_v40  ;;  %v682_v30 = vsel %vm438_vm0, %v676_v9, %v677_v14 }
 0x137   : > { %v538_v34 = vsel %vm438_vm0, %v532_v2, %v533_v5  ;;  %v876_v43 = vsel %vm8443_vm1, %v6761_v52, %v875_v29  ;;  %v683_v16 = vsel %vm8474_vm5, %v6721_v4, %v682_v30  ;;  %v5969_v56 = vld [vmem:[#allocation3 + $0x2e4] sm:$0xf0]  ;;  %v5188_v55 = vld [vmem:[#allocation3 + $0x2e8] sm:$0xf0]  ;;  %vm439_vm5 = vcmask 523268  }
 0x138   : > { %v539_v9 = vsel %vm536_vm13, %v6838_v63, %v538_v34  ;;  %885 = vst [vmem:[#allocation3 + $0x190] sm:$0xff] %v876_v43  ;;  %v4930_v34 = vld [vmem:[#allocation3 + $0xc8] sm:$0xf]  ;;  %v5901_v43 = vld [vmem:[#allocation3 + $0xcc] sm:$0xf]  ;;  %vm7139_vm1 = vmor %vm439_vm5, %vm438_vm0 }
 0x139   : > { %548 = vst [vmem:[#allocation3 + $0x68] sm:$0xff] %v539_v9  ;;  %v5186_v2 = vld [vmem:[#allocation3 + $0x2c8] sm:$0xf]  ;;  %v5965_v50 = vld [vmem:[#allocation3 + $0x2cc] sm:$0xf] }
 0x13a   : > { %2025 = vmatpush.bf16.msrb.mxu1 %v4963_v41  ;;  %692 = vst [vmem:[#allocation3 + $0xe8] sm:$0xff] %v683_v16  ;;  %v5187_v52 = vor.u32 %v5969_v56, %v5186_v2  ;;  %v5191_v1 = vor.u32 %v5965_v50, %v5188_v55  ;;  %v5154_v50 = vld [vmem:[#allocation3 + $0x288] sm:$0xf] }
 0x13b   : > { %v7103_v51 = vpop.permute.xlu1 %563  ;;  %v7105_v4 = vpop.permute.xlu0 %1201 }
 0x13c   : > { %2039 = vmatpush.bf16.msrb.mxu3 %v5187_v52  ;;  %2065 = vmatpush.bf16.msrb.mxu2 %v5191_v1  ;;  %v7107_v23 = vpop.permute.xlu2 %1027  ;;  %v569_v31 = vrot.slane %v7103_v51, 4  ;;  %v1207_v63 = vrot.slane %v7105_v4, 4 }
 0x13d   : > { %v1035_v44 = vrot.slane %v7107_v23, 4 }
 0x13e   : > { %v574_v17 = vsel %vm438_vm0, %v568_v47, %v569_v31  ;;  %v1211_v39 = vsel %vm438_vm0, %v1206_v46, %v1207_v63 }
 0x13f   : > { %v1041_v41 = vsel %vm438_vm0, %v1034_v12, %v1035_v44  ;;  %v575_v29 = vsel %vm572_vm7, %v6758_v45, %v574_v17  ;;  %v1212_v30 = vsel %vm464_vm15, %v6818_v25, %v1211_v39  ;;  %v5897_v39 = vld [vmem:[#allocation3 + $0xa4] sm:$0xf0] }
 0x140   : > { %v1042_v47 = vsel %vm8444_vm2, %v6862_v57, %v1041_v41  ;;  %584 = vst [vmem:[#allocation3 + $0x88] sm:$0xff] %v575_v29  ;;  %vm8477_vm2 = vcmask 523264   ;;  %v4900_v41 = vld [vmem:[#allocation3 + $0xa8] sm:$0xf0] }
 0x141   : > { %1052 = vst [vmem:[#allocation3 + $0x208] sm:$0xff] %v1042_v47  ;;  %v5905_v46 = vld [vmem:[#allocation3 + $0xe4] sm:$0xf0]  ;;  %v4932_v16 = vld [vmem:[#allocation3 + $0xe8] sm:$0xf0]  ;;  %vm8478_vm5 = vmmov %vm8477_vm2 }
 0x142   : > { %1221 = vst [vmem:[#allocation3 + $0x2a8] sm:$0xff] %v1212_v30  ;;  %v4931_v56 = vor.u32 %v5905_v46, %v4930_v34  ;;  %v4935_v55 = vor.u32 %v5901_v43, %v4932_v16  ;;  %v5957_v29 = vld [vmem:[#allocation3 + $0x28c] sm:$0xf] }
 0x143   : > { %v7133_v12 = vpop.permute.xlu1 %819  ;;  %v782_v19 = vpop.permute.xlu0 %781 }
 0x144   : > { %2026 = vmatpush.bf16.msrb.mxu1 %v4931_v56  ;;  %2052 = vmatpush.bf16.msrb.mxu0 %v4935_v55  ;;  %v7135_v45 = vpop.permute.xlu2 %454  ;;  %v826_v25 = vrot.slane %v7133_v12, 4  ;;  %v786_v9 = vrot.slane %v782_v19, 4 }
 0x145   : > { %v460_v2 = vrot.slane %v7135_v45, 4 }
 0x146   : > { %v833_v52 = vsel %vm438_vm0, %v825_v32, %v826_v25  ;;  %v792_v1 = vsel %vm438_vm0, %v785_v7, %v786_v9  ;;  %v794_v17 = vsel %vm8477_vm2, %v782_v19, %v786_v9  ;;  %vm8482_vm2 = vcmask 261120  }
 0x147   : > { %v466_v30 = vsel %vm438_vm0, %v459_v61, %v460_v2  ;;  %v834_v47 = vsel %vm829_vm6, %v6936_v58, %v833_v52  ;;  %v793_v32 = vsel %vm8478_vm5, %v6840_v0, %v792_v1  ;;  %802 = vst.msk [vmem:[#allocation3 + $0x158] sm:$0xff] %vm7139_vm1, %v794_v17  ;;  %v4898_v7 = vld [vmem:[#allocation3 + $0x88] sm:$0xf]  ;;  %v5893_v34 = vld [vmem:[#allocation3 + $0x8c] sm:$0xf]  ;;  %v8479_v17 = vrot.slane %v6882_v38, 4 }
 0x148   : > { %v467_v43 = vsel %vm464_vm15, %v6904_v8, %v466_v30  ;;  %843 = vst [vmem:[#allocation3 + $0x170] sm:$0xff] %v834_v47  ;;  %v4899_v46 = vor.u32 %v5897_v39, %v4898_v7  ;;  %v4903_v16 = vor.u32 %v5893_v34, %v4900_v41  ;;  %vm8486_vm5 = vcmask 777216  }
 0x149   : > { %476 = vst [vmem:[#allocation3 + $0x28] sm:$0xff] %v467_v43  ;;  %v5961_v56 = vld [vmem:[#allocation3 + $0x2a4] sm:$0xf0]  ;;  %v5156_v61 = vld [vmem:[#allocation3 + $0x2a8] sm:$0xf0] }
 0x14a   : > { %801 = vst [vmem:[#allocation3 + $0x150] sm:$0xff] %v793_v32  ;;  %2027 = vmatpush.bf16.msrb.mxu1 %v4899_v46  ;;  %v5155_v58 = vor.u32 %v5961_v56, %v5154_v50  ;;  %2053 = vmatpush.bf16.msrb.mxu0 %v4903_v16  ;;  %v5159_v55 = vor.u32 %v5957_v29, %v5156_v61  ;;  %v8480_v16 = vrot.slane %v6884_v27, 4 }
 0x14b   : > { %v7166_v0 = vpop.permute.xlu1 %491  ;;  %v7168_v19 = vpop.permute.xlu0 %1153 }
 0x14c   : > { %2040 = vmatpush.bf16.msrb.mxu3 %v5155_v58  ;;  %2066 = vmatpush.bf16.msrb.mxu2 %v5159_v55  ;;  %v566_v9 = vpop.permute.xlu2 %565  ;;  %v497_v8 = vrot.slane %v7166_v0, 4  ;;  %v1161_v52 = vrot.slane %v7168_v19, 4 }
 0x14d   : > { %v570_v1 = vrot.slane %v566_v9, 4 }
 0x14e   : > { %v502_v50 = vsel %vm438_vm0, %v496_v26, %v497_v8  ;;  %v1167_v39 = vsel %vm438_vm0, %v8479_v17, %v1161_v52  ;;  %v4868_v17 = vld [vmem:[#allocation3 + $0x68] sm:$0xf0] }
 0x14f   : > { %v576_v41 = vsel %vm438_vm0, %v569_v31, %v570_v1  ;;  %v578_v29 = vsel %vm572_vm7, %v566_v9, %v570_v1  ;;  %v503_v30 = vsel %vm500_vm11, %v6744_v22, %v502_v50  ;;  %v1168_v26 = vsel %vm1165_vm12, %v6882_v38, %v1167_v39  ;;  %v5122_v50 = vld [vmem:[#allocation3 + $0x248] sm:$0xf]  ;;  %v5949_v39 = vld [vmem:[#allocation3 + $0x24c] sm:$0xf] }
 0x150   : > { %v577_v47 = vsel %vm572_vm7, %v7103_v51, %v576_v41  ;;  %586 = vst.msk [vmem:[#allocation3 + $0x98] sm:$0xff] %vm7139_vm1, %v578_v29  ;;  %v8481_v38 = vrot.slane %v6906_v60, 4  ;;  %v4834_v41 = vld [vmem:[#allocation3 + $0x8] sm:$0xf] }
 0x151   : > { %585 = vst [vmem:[#allocation3 + $0x90] sm:$0xff] %v577_v47  ;;  %v5881_v29 = vld [vmem:[#allocation3 + $0x24] sm:$0xf0] }
 0x152   : > { %512 = vst [vmem:[#allocation3 + $0x48] sm:$0xff] %v503_v30 }
 0x153   : > { %1178 = vst [vmem:[#allocation3 + $0x268] sm:$0xff] %v1168_v26  ;;  %v746_v32 = vpop.permute.xlu1 %745  ;;  %v710_v7 = vpop.permute.xlu0 %709 }
 0x154   : > { %v990_v31 = vpop.permute.xlu2 %989  ;;  %v750_v34 = vrot.slane %v746_v32, 4  ;;  %v714_v43 = vrot.slane %v710_v7, 4 }
 0x155   : > { %v995_v46 = vrot.slane %v990_v31, 4 }
 0x156   : > { %v756_v22 = vsel %vm438_vm0, %v749_v20, %v750_v34  ;;  %v758_v51 = vsel %vm752_vm9, %v746_v32, %v750_v34  ;;  %v720_v56 = vsel %vm438_vm0, %v8480_v16, %v714_v43  ;;  %v5889_v20 = vld [vmem:[#allocation3 + $0x64] sm:$0xf0]  ;;  %v722_v1 = vsel %vm716_vm8, %v710_v7, %v714_v43  ;;  %v5877_v43 = vld [vmem:[#allocation3 + $0xc] sm:$0xf] }
 0x157   : > { %v1003_v61 = vsel %vm438_vm0, %v8481_v38, %v995_v46  ;;  %v757_v58 = vsel %vm752_vm9, %v7002_v59, %v756_v22  ;;  %766 = vst.msk [vmem:[#allocation3 + $0x138] sm:$0xff] %vm7139_vm1, %v758_v51  ;;  %v721_v55 = vsel %vm716_vm8, %v6884_v27, %v720_v56  ;;  %v4836_v46 = vld [vmem:[#allocation3 + $0x28] sm:$0xf0]  ;;  %v4835_v38 = vor.u32 %v5881_v29, %v4834_v41 }
 0x158   : > { %v1004_v9 = vsel %vm8482_vm2, %v6906_v60, %v1003_v61  ;;  %765 = vst [vmem:[#allocation3 + $0x130] sm:$0xff] %v757_v58  ;;  %v8483_v61 = vrot.slane %v6821_v49, 4  ;;  %vm8484_vm8 = vcmask 769024   ;;  %vm8487_vm2 = vmmov %vm8486_vm5 }
 0x159   : > { %1012 = vst.msk [vmem:[#allocation3 + $0x1f8] sm:$0xff] %vm7139_vm1, %v1004_v9  ;;  %v4866_v59 = vld [vmem:[#allocation3 + $0x48] sm:$0xf]  ;;  %v5885_v30 = vld [vmem:[#allocation3 + $0x4c] sm:$0xf]  ;;  %v4839_v9 = vor.u32 %v5877_v43, %v4836_v46  ;;  %vm8485_vm9 = vmmov %vm8484_vm8 }
 0x15a   : > { %729 = vst [vmem:[#allocation3 + $0x110] sm:$0xff] %v721_v55  ;;  %v4867_v47 = vor.u32 %v5889_v20, %v4866_v59  ;;  %v5953_v27 = vld [vmem:[#allocation3 + $0x264] sm:$0xf0]  ;;  %v4871_v26 = vor.u32 %v5885_v30, %v4868_v17  ;;  %v5124_v32 = vld [vmem:[#allocation3 + $0x268] sm:$0xf0] }
 0x15b   : > { %730 = vst.msk [vmem:[#allocation3 + $0x118] sm:$0xff] %vm7139_vm1, %v722_v1  ;;  %v5123_v60 = vor.u32 %v5953_v27, %v5122_v50  ;;  %v5127_v7 = vor.u32 %v5949_v39, %v5124_v32  ;;  %v1309_v31 = vpop.permute.xlu1 %1308  ;;  %v7217_v34 = vpop.permute.xlu0 %1069 }
 0x15c   : > { %2028 = vmatpush.bf16.msrb.mxu1 %v4867_v47  ;;  %2054 = vmatpush.bf16.msrb.mxu0 %v4871_v26  ;;  %v494_v22 = vpop.permute.xlu2 %493  ;;  %v1313_v51 = vrot.slane %v1309_v31, 4  ;;  %v1077_v16 = vrot.slane %v7217_v34, 4 }
 0x15d   : > { %2041 = vmatpush.bf16.msrb.mxu3 %v5123_v60  ;;  %2067 = vmatpush.bf16.msrb.mxu2 %v5127_v7  ;;  %v498_v56 = vrot.slane %v494_v22, 4 }
 0x15e   : > { %v1318_v58 = vsel %vm438_vm0, %v8483_v61, %v1313_v51  ;;  %v1320_v55 = vsel %vm572_vm7, %v1309_v31, %v1313_v51  ;;  %v1083_v20 = vsel %vm438_vm0, %v1076_v18, %v1077_v16  ;;  %v5068_v61 = vld [vmem:[#allocation3 + $0x1f0] sm:$0xf0] }
 0x15f   : > { %v504_v1 = vsel %vm438_vm0, %v497_v8, %v498_v56  ;;  %v506_v50 = vsel %vm500_vm11, %v494_v22, %v498_v56  ;;  %v1319_v17 = vsel %vm572_vm7, %v6821_v49, %v1318_v58  ;;  %1328 = vst.msk [vmem:[#allocation3 + $0x318] sm:$0xff] %vm7139_vm1, %v1320_v55  ;;  %v1084_v18 = vsel %vm1081_vm10, %v6975_v48, %v1083_v20  ;;  %v5934_v56 = vld [vmem:[#allocation3 + $0x1d4] sm:$0xf] }
 0x160   : > { %v505_v39 = vsel %vm500_vm11, %v7166_v0, %v504_v1  ;;  %514 = vst.msk [vmem:[#allocation3 + $0x58] sm:$0xff] %vm7139_vm1, %v506_v50  ;;  %2029 = vmatpush.bf16.msrb.mxu1 %v4835_v38  ;;  %2055 = vmatpush.bf16.msrb.mxu0 %v4839_v9  ;;  %v1738_v8 = vunpack.c.l.b16 %v1319_v17  ;;  %v1739_v41 = vunpack.c.h.b16 %v1319_v17  ;;  %v5941_v38 = vld [vmem:[#allocation3 + $0x20c] sm:$0xf]  ;;  %v1183_v50 = vld [vmem:[#allocation2 + $0x14] sm:$0xff] }
 0x161   : > { %513 = vst [vmem:[#allocation3 + $0x50] sm:$0xff] %v505_v39  ;;  %v433_v1 = vld [vmem:[#allocation2 + $0x10] sm:$0xff] }
 0x162   : > { %1327 = vst [vmem:[#allocation3 + $0x310] sm:$0xff] %v1319_v17  ;;  %v1842_v29 = vpack.c.b16 %v1738_v8, %v1738_v8  ;;  %v1843_v49 = vpack.c.b16 %v1739_v41, %v1739_v41  ;;  %v1184_v17 = vld [vmem:[#allocation2 + $0x1c] sm:$0xff] }
 0x163   : > { %1094 = vst [vmem:[#allocation3 + $0x228] sm:$0xff] %v1084_v18  ;;  %v674_v59 = vpop.permute.xlu1 %673  ;;  %v638_v30 = vpop.permute.xlu0 %637  ;;  %2030 = vmatmul.bf16.vlgmr.msrb.gmra.mxu1 %v6973_v3  ;;  %2056 = vmatmul.bf16.vlgmr.msrb.gmra.mxu0 %v6973_v3 }
 0x164   : > { %v906_v0 = vpop.permute.xlu2 %905  ;;  %v678_v47 = vrot.slane %v674_v59, 4  ;;  %v642_v27 = vrot.slane %v638_v30, 4  ;;  %v1959_v48 = vsel %vm438_vm0, %v1842_v29, 0  ;;  %v1962_v26 = vsel %vm438_vm0, %v1843_v49, 0  ;;  %437 = vst [vmem:[#allocation3 + $0x10] sm:$0xff] %v433_v1 }
 0x165   : > { %v911_v32 = vrot.slane %v906_v0, 4  ;;  %2090 = vmatpush.bf16.msra.mxu1 %v1959_v48  ;;  %2116 = vmatpush.bf16.msra.mxu0 %v1962_v26  ;;  %v5071_v29 = vor.u32 %v5934_v56, %v5068_v61  ;;  %1187 = vst [vmem:[#allocation3 + $0x290] sm:$0xff] %v1183_v50  ;;  %v8488_v0 = vrot.slane %v7000_v24, 4  ;;  %v5910_v50 = vld [vmem:[#allocation3 + $0x114] sm:$0xf] }
 0x166   : > { %v684_v60 = vsel %vm438_vm0, %v677_v14, %v678_v47  ;;  %v686_v7 = vsel %vm8484_vm8, %v674_v59, %v678_v47  ;;  %v648_v31 = vsel %vm438_vm0, %v641_v10, %v642_v27  ;;  %v650_v51 = vsel %vm8487_vm2, %v638_v30, %v642_v27  ;;  %v5066_v10 = vld [vmem:[#allocation3 + $0x1d0] sm:$0xf]  ;;  %v5926_v30 = vld [vmem:[#allocation3 + $0x194] sm:$0xf]  ;;  %1188 = vst.msk [vmem:[#allocation3 + $0x298] sm:$0xff] %vm7139_vm1, %v1184_v17 }
 0x167   : > { %v919_v43 = vsel %vm438_vm0, %v910_v35, %v911_v32  ;;  %v685_v46 = vsel %vm8485_vm9, %v7072_v15, %v684_v60  ;;  %694 = vst.msk [vmem:[#allocation3 + $0xf8] sm:$0xff] %vm7139_vm1, %v686_v7  ;;  %v649_v22 = vsel %vm8486_vm5, %v6944_v62, %v648_v31  ;;  %v5090_v35 = vld [vmem:[#allocation3 + $0x208] sm:$0xf]  ;;  %v5938_v15 = vld [vmem:[#allocation3 + $0x1ec] sm:$0xf0]  ;;  %v8489_v27 = vrot.slane %v7004_v53, 4 }
 0x168   : > { %v920_v14 = vsel %vm913_vm4, %v6978_v11, %v919_v43  ;;  %693 = vst [vmem:[#allocation3 + $0xf0] sm:$0xff] %v685_v46  ;;  %v5067_v8 = vor.u32 %v5938_v15, %v5066_v10  ;;  %v5034_v59 = vld [vmem:[#allocation3 + $0x190] sm:$0xf]  ;;  %vm8490_vm4 = vcmask 490496   ;;  %v5036_v43 = vld [vmem:[#allocation3 + $0x1b0] sm:$0xf0] }
 0x169   : > { %928 = vst.msk [vmem:[#allocation3 + $0x1b8] sm:$0xff] %vm7139_vm1, %v920_v14  ;;  %v5930_v31 = vld [vmem:[#allocation3 + $0x1ac] sm:$0xf0]  ;;  %v4972_v17 = vld [vmem:[#allocation3 + $0x130] sm:$0xf0]  ;;  %vm8492_vm8 = vcmask 506880  }
 0x16a   : > { %657 = vst [vmem:[#allocation3 + $0xd0] sm:$0xff] %v649_v22  ;;  %v5945_v58 = vld [vmem:[#allocation3 + $0x224] sm:$0xf0]  ;;  %v5092_v55 = vld [vmem:[#allocation3 + $0x228] sm:$0xf0]  ;;  %vm2542_vm5 = vcmask 457728  }
 0x16b   : > { %658 = vst.msk [vmem:[#allocation3 + $0xd8] sm:$0xff] %vm7139_vm1, %v650_v51  ;;  %v5091_v62 = vor.u32 %v5945_v58, %v5090_v35  ;;  %v5095_v11 = vor.u32 %v5941_v38, %v5092_v55  ;;  %v948_v20 = vpop.permute.xlu1 %947  ;;  %v602_v9 = vpop.permute.xlu0 %601  ;;  %v5002_v22 = vld [vmem:[#allocation3 + $0x150] sm:$0xf]  ;;  %v5004_v51 = vld [vmem:[#allocation3 + $0x170] sm:$0xf0]  ;;  %vm2410_vm2 = vcmask 982016  }
 0x16c   : > { %v822_v39 = vpop.permute.xlu2 %821  ;;  %v953_v18 = vrot.slane %v948_v20, 4  ;;  %v606_v41 = vrot.slane %v602_v9, 4  ;;  %v5922_v14 = vld [vmem:[#allocation3 + $0x16c] sm:$0xf0] }
 0x16d   : > { %2042 = vmatpush.bf16.msrb.mxu3 %v5091_v62  ;;  %2068 = vmatpush.bf16.msrb.mxu2 %v5095_v11  ;;  %v827_v49 = vrot.slane %v822_v39, 4  ;;  %v5003_v15 = vor.u32 %v5922_v14, %v5002_v22  ;;  %v4970_v62 = vld [vmem:[#allocation3 + $0x110] sm:$0xf] }
 0x16e   : > { %v961_v47 = vsel %vm438_vm0, %v8488_v0, %v953_v18  ;;  %v612_v48 = vsel %vm438_vm0, %v8489_v27, %v606_v41  ;;  %v614_v26 = vsel %vm608_vm14, %v602_v9, %v606_v41  ;;  %v5914_v11 = vld [vmem:[#allocation3 + $0x12c] sm:$0xf0] }
 0x16f   : > { %v835_v32 = vsel %vm438_vm0, %v826_v25, %v827_v49  ;;  %v962_v60 = vsel %vm8490_vm4, %v7000_v24, %v961_v47  ;;  %v613_v7 = vsel %vm608_vm14, %v7004_v53, %v612_v48  ;;  %622 = vst.msk [vmem:[#allocation3 + $0xb8] sm:$0xff] %vm7139_vm1, %v614_v26  ;;  %v5035_v24 = vor.u32 %v5930_v31, %v5034_v59  ;;  %v434_v53 = vld [vmem:[#allocation2 + $0x18] sm:$0xff]  ;;  %v5906_v49 = vld [vmem:[#allocation3 + $0xec] sm:$0xf0] }
 0x170   : > { %v836_v46 = vsel %vm829_vm6, %v7133_v12, %v835_v32  ;;  %970 = vst.msk [vmem:[#allocation3 + $0x1d8] sm:$0xff] %vm7139_vm1, %v962_v60  ;;  %5210 = vmatmul.msk.bf16.vlgmr.msrb.gmra.mxu3 %vm1942_vm3, %v7033_v13  ;;  %5211 = vmatmul.msk.bf16.vlgmr.msrb.gmra.mxu2 %vm1942_vm3, %v7033_v13  ;;  %v5039_v25 = vor.u32 %v5926_v30, %v5036_v43  ;;  %v5918_v12 = vld [vmem:[#allocation3 + $0x154] sm:$0xf]  ;;  %vm8491_vm6 = vcmask 252928   ;;  %v5931_v57 = vld [vmem:[#allocation3 + $0x1b4] sm:$0xf0] }
 0x171   : > { %2074 = vmatpush.bf16.msra.mxu3 %v5067_v8  ;;  %2100 = vmatpush.bf16.msra.mxu2 %v5071_v29  ;;  %844 = vst.msk [vmem:[#allocation3 + $0x178] sm:$0xff] %vm7139_vm1, %v836_v46  ;;  %v5007_v55 = vor.u32 %v5918_v12, %v5004_v51  ;;  %v4971_v41 = vor.u32 %v5914_v11, %v4970_v62  ;;  %v4940_v59 = vld [vmem:[#allocation3 + $0xf0] sm:$0xf0]  ;;  %vm8495_vm9 = vmmov %vm8491_vm6  ;;  %vm2383_vm4 = vcmask 998400  }
 0x172   : > { %621 = vst [vmem:[#allocation3 + $0xb0] sm:$0xff] %v613_v7  ;;  %v4975_v29 = vor.u32 %v5910_v50, %v4972_v17  ;;  %v4906_v7 = vld [vmem:[#allocation3 + $0x90] sm:$0xf] }
 0x173   : > { %v1274_v10 = vpop.permute.xlu1 %1273  ;;  %v1239_v56 = vpop.permute.xlu0 %1238  ;;  %441 = vst.msk [vmem:[#allocation3 + $0x18] sm:$0xff] %vm7139_vm1, %v434_v53 }
 0x174   : > { %v7300_v35 = vpop.permute.xlu2 %1029  ;;  %v1278_v38 = vrot.slane %v1274_v10, 4  ;;  %v1243_v61 = vrot.slane %v1239_v56, 4 }
 0x175   : > { %2075 = vmatpush.bf16.msra.mxu3 %v5035_v24  ;;  %2101 = vmatpush.bf16.msra.mxu2 %v5039_v25  ;;  %v1036_v58 = vrot.slane %v7300_v35, 4  ;;  %v5894_v25 = vld [vmem:[#allocation3 + $0x94] sm:$0xf] }
 0x176   : > { %v1283_v20 = vsel %vm438_vm0, %v1277_v36, %v1278_v38  ;;  %v1285_v9 = vsel %vm536_vm13, %v1274_v10, %v1278_v38  ;;  %v1248_v1 = vsel %vm438_vm0, %v1242_v28, %v1243_v61  ;;  %v1250_v8 = vsel %vm500_vm11, %v1239_v56, %v1243_v61 }
 0x177   : > { %v1043_v39 = vsel %vm438_vm0, %v1035_v44, %v1036_v58  ;;  %v1284_v18 = vsel %vm536_vm13, %v7036_v33, %v1283_v20  ;;  %1293 = vst.msk [vmem:[#allocation3 + $0x2f8] sm:$0xff] %vm7139_vm1, %v1285_v9  ;;  %v1249_v36 = vsel %vm500_vm11, %v7038_v54, %v1248_v1  ;;  %v4938_v44 = vld [vmem:[#allocation3 + $0xd0] sm:$0xf]  ;;  %v5902_v33 = vld [vmem:[#allocation3 + $0xd4] sm:$0xf] }
 0x178   : > { %v1044_v28 = vsel %vm8491_vm6, %v7107_v23, %v1043_v39  ;;  %1292 = vst [vmem:[#allocation3 + $0x2f0] sm:$0xff] %v1284_v18  ;;  %v4939_v23 = vor.u32 %v5906_v49, %v4938_v44  ;;  %v4943_v27 = vor.u32 %v5902_v33, %v4940_v59  ;;  %v4874_v9 = vld [vmem:[#allocation3 + $0x50] sm:$0xf]  ;;  %v5878_v44 = vld [vmem:[#allocation3 + $0x14] sm:$0xf]  ;;  %vm2515_vm6 = vcmask 474112  }
 0x179   : > { %2076 = vmatpush.bf16.msra.mxu3 %v5003_v15  ;;  %2102 = vmatpush.bf16.msra.mxu2 %v5007_v55  ;;  %1053 = vst [vmem:[#allocation3 + $0x210] sm:$0xff] %v1044_v28  ;;  %v5898_v48 = vld [vmem:[#allocation3 + $0xac] sm:$0xf0]  ;;  %v4908_v31 = vld [vmem:[#allocation3 + $0xb0] sm:$0xf0]  ;;  %v1429_v55 = vld [vmem:[#allocation3 + $0x318] sm:$0xff] }
 0x17a   : > { %1257 = vst [vmem:[#allocation3 + $0x2d0] sm:$0xff] %v1249_v36  ;;  %v4911_v53 = vor.u32 %v5894_v25, %v4908_v31  ;;  %v1740_v18 = vunpack.c.l.b16 %v1429_v55  ;;  %v1741_v36 = vunpack.c.h.b16 %v1429_v55 }
 0x17b   : > { %1258 = vst.msk [vmem:[#allocation3 + $0x2d8] sm:$0xff] %vm7139_vm1, %v1250_v8  ;;  %v864_v54 = vpop.permute.xlu1 %863  ;;  %v530_v30 = vpop.permute.xlu0 %529 }
 0x17c   : > { %v869_v0 = vrot.slane %v864_v54, 4  ;;  %v534_v47 = vrot.slane %v530_v30, 4  ;;  %v1158_v1 = vpop.permute.xlu2 %1157  ;;  %v1844_v49 = vpack.c.b16 %v1740_v18, %v1740_v18 }
 0x17d   : > { %2077 = vmatpush.bf16.msra.mxu3 %v4971_v41  ;;  %2103 = vmatpush.bf16.msra.mxu2 %v4975_v29  ;;  %v4842_v29 = vld [vmem:[#allocation3 + $0x10] sm:$0xf] }
 0x17e   : > { %v877_v26 = vsel %vm438_vm0, %v868_v40, %v869_v0  ;;  %v540_v32 = vsel %vm438_vm0, %v533_v5, %v534_v47  ;;  %v542_v60 = vsel %vm536_vm13, %v530_v30, %v534_v47  ;;  %v4907_v5 = vor.u32 %v5898_v48, %v4906_v7  ;;  %v5162_v30 = vld [vmem:[#allocation3 + $0x290] sm:$0xf]  ;;  %v5958_v0 = vld [vmem:[#allocation3 + $0x294] sm:$0xf] }
 0x17f   : > { %v878_v43 = vsel %vm8492_vm8, %v7070_v42, %v877_v26  ;;  %v541_v46 = vsel %vm536_vm13, %v7074_v6, %v540_v32  ;;  %550 = vst.msk [vmem:[#allocation3 + $0x78] sm:$0xff] %vm7139_vm1, %v542_v60  ;;  %v5970_v40 = vld [vmem:[#allocation3 + $0x2ec] sm:$0xf0]  ;;  %v5196_v24 = vld [vmem:[#allocation3 + $0x2f0] sm:$0xf0]  ;;  %vm8493_vm13 = vcmask 236544  }
 0x180   : > { %886 = vst.msk [vmem:[#allocation3 + $0x198] sm:$0xff] %vm7139_vm1, %v878_v43 }
 0x181   : > { %2078 = vmatpush.bf16.msra.mxu3 %v4939_v23  ;;  %2104 = vmatpush.bf16.msra.mxu2 %v4943_v27  ;;  %549 = vst [vmem:[#allocation3 + $0x70] sm:$0xff] %v541_v46  ;;  %v5194_v22 = vld [vmem:[#allocation3 + $0x2d0] sm:$0xf]  ;;  %v5966_v14 = vld [vmem:[#allocation3 + $0x2d4] sm:$0xf]  ;;  %v1845_v23 = vpack.c.b16 %v1741_v36, %v1741_v36 }
 0x182   : > { %v5195_v42 = vor.u32 %v5970_v40, %v5194_v22  ;;  %v5199_v12 = vor.u32 %v5966_v14, %v5196_v24  ;;  %v5971_v46 = vld [vmem:[#allocation3 + $0x2f4] sm:$0xf0]  ;;  %v5967_v25 = vld [vmem:[#allocation3 + $0x2dc] sm:$0xf] }
 0x183   : > { %v457_v6 = vpop.permute.xlu1 %456  ;;  %v1204_v51 = vpop.permute.xlu0 %1203  ;;  %v5935_v36 = vld [vmem:[#allocation3 + $0x1dc] sm:$0xf] }
 0x184   : > { %2091 = vmatpush.bf16.msra.mxu1 %v5195_v42  ;;  %2117 = vmatpush.bf16.msra.mxu0 %v5199_v12  ;;  %v461_v10 = vrot.slane %v457_v6, 4  ;;  %v1208_v56 = vrot.slane %v1204_v51, 4 }
 0x185   : > { %2079 = vmatpush.bf16.msra.mxu3 %v4907_v5  ;;  %2105 = vmatpush.bf16.msra.mxu2 %v4911_v53  ;;  %v5202_v5 = vld [vmem:[#allocation3 + $0x2d8] sm:$0xf]  ;;  %v5204_v53 = vld [vmem:[#allocation3 + $0x2f8] sm:$0xf0] }
 0x186   : > { %v468_v38 = vsel %vm438_vm0, %v460_v2, %v461_v10  ;;  %v470_v15 = vsel %vm464_vm15, %v457_v6, %v461_v10  ;;  %v1213_v61 = vsel %vm438_vm0, %v1207_v63, %v1208_v56  ;;  %v1215_v20 = vsel %vm464_vm15, %v1204_v51, %v1208_v56  ;;  %v5886_v2 = vld [vmem:[#allocation3 + $0x54] sm:$0xf]  ;;  %v5170_v10 = vld [vmem:[#allocation3 + $0x298] sm:$0xf] }
 0x187   : > { %v469_v62 = vsel %vm464_vm15, %v7135_v45, %v468_v38  ;;  %478 = vst.msk [vmem:[#allocation3 + $0x38] sm:$0xff] %vm7139_vm1, %v470_v15  ;;  %v1214_v11 = vsel %vm464_vm15, %v7105_v4, %v1213_v61  ;;  %v1163_v45 = vrot.slane %v1158_v1, 4  ;;  %v5203_v6 = vor.u32 %v5971_v46, %v5202_v5  ;;  %v5959_v38 = vld [vmem:[#allocation3 + $0x29c] sm:$0xf]  ;;  %v5923_v46 = vld [vmem:[#allocation3 + $0x174] sm:$0xf0] }
 0x188   : > { %477 = vst [vmem:[#allocation3 + $0x30] sm:$0xff] %v469_v62  ;;  %v5890_v50 = vld [vmem:[#allocation3 + $0x6c] sm:$0xf0]  ;;  %v4876_v17 = vld [vmem:[#allocation3 + $0x70] sm:$0xf0]  ;;  %v5207_v51 = vor.u32 %v5967_v25, %v5204_v53 }
 0x189   : > { %1222 = vst [vmem:[#allocation3 + $0x2b0] sm:$0xff] %v1214_v11  ;;  %v4875_v63 = vor.u32 %v5890_v50, %v4874_v9  ;;  %v4879_v39 = vor.u32 %v5886_v2, %v4876_v17  ;;  %v5012_v5 = vld [vmem:[#allocation3 + $0x178] sm:$0xf0] }
 0x18a   : > { %1223 = vst.msk [vmem:[#allocation3 + $0x2b8] sm:$0xff] %vm7139_vm1, %v1215_v20 }
 0x18b   : > { %2080 = vmatpush.bf16.msra.mxu3 %v4875_v63  ;;  %2106 = vmatpush.bf16.msra.mxu2 %v4879_v39  ;;  %v1156_v4 = vpop.permute.xlu1 %1155  ;;  %v1114_v28 = vpop.permute.xlu0 %1113 }
 0x18c   : > { %v1162_v8 = vrot.slane %v1156_v4, 4  ;;  %v1120_v41 = vrot.slane %v1114_v28, 4 }
 0x18e   : > { %v1169_v33 = vsel %vm438_vm0, %v1161_v52, %v1162_v8  ;;  %v1127_v59 = vsel %vm438_vm0, %v1119_v37, %v1120_v41  ;;  %v1171_v54 = vsel %vm438_vm0, %v1162_v8, %v1163_v45  ;;  %v5074_v45 = vld [vmem:[#allocation3 + $0x1d8] sm:$0xf]  ;;  %v5098_v8 = vld [vmem:[#allocation3 + $0x210] sm:$0xf] }
 0x18f   : > { %v1170_v47 = vsel %vm1165_vm12, %v7168_v19, %v1169_v33  ;;  %v1128_v27 = vsel %vm8493_vm13, %v7040_v21, %v1127_v59  ;;  %v1172_v48 = vsel %vm1165_vm12, %v1156_v4, %v1171_v54  ;;  %v5882_v26 = vld [vmem:[#allocation3 + $0x2c] sm:$0xf0]  ;;  %v4844_v32 = vld [vmem:[#allocation3 + $0x30] sm:$0xf0]  ;;  %v1965_v19 = vsel %vm438_vm0, %v1844_v49, 0  ;;  %vm8494_vm12 = vmmov %vm8493_vm13 }
 0x190   : > { %1179 = vst [vmem:[#allocation3 + $0x270] sm:$0xff] %v1170_v47  ;;  %v4843_v52 = vor.u32 %v5882_v26, %v4842_v29  ;;  %v5962_v60 = vld [vmem:[#allocation3 + $0x2ac] sm:$0xf0]  ;;  %v4847_v7 = vor.u32 %v5878_v44, %v4844_v32  ;;  %v5164_v37 = vld [vmem:[#allocation3 + $0x2b0] sm:$0xf0]  ;;  %v1968_v21 = vsel %vm438_vm0, %v1845_v23, 0 }
 0x191   : > { %1137 = vst [vmem:[#allocation3 + $0x250] sm:$0xff] %v1128_v27  ;;  %v5163_v31 = vor.u32 %v5962_v60, %v5162_v30  ;;  %v5167_v43 = vor.u32 %v5958_v0, %v5164_v37  ;;  %v5963_v56 = vld [vmem:[#allocation3 + $0x2b4] sm:$0xf0]  ;;  %v5172_v11 = vld [vmem:[#allocation3 + $0x2b8] sm:$0xf0] }
 0x192   : > { %1180 = vst.msk [vmem:[#allocation3 + $0x278] sm:$0xff] %vm7139_vm1, %v1172_v48  ;;  %2081 = vmatpush.bf16.msra.mxu3 %v4843_v52  ;;  %2107 = vmatpush.bf16.msra.mxu2 %v4847_v7  ;;  %v5171_v1 = vor.u32 %v5963_v56, %v5170_v10  ;;  %v5175_v50 = vor.u32 %v5959_v38, %v5172_v11  ;;  %v5939_v48 = vld [vmem:[#allocation3 + $0x1f4] sm:$0xf0]  ;;  %v5076_v26 = vld [vmem:[#allocation3 + $0x1f8] sm:$0xf0] }
 0x193   : > { %2092 = vmatpush.bf16.msra.mxu1 %v5163_v31  ;;  %2118 = vmatpush.bf16.msra.mxu0 %v5167_v43  ;;  %v1116_v40 = vpop.permute.xlu1 %1115  ;;  %v1072_v24 = vpop.permute.xlu0 %1071  ;;  %v5079_v52 = vor.u32 %v5935_v36, %v5076_v26  ;;  %v5042_v7 = vld [vmem:[#allocation3 + $0x198] sm:$0xf]  ;;  %v5927_v37 = vld [vmem:[#allocation3 + $0x19c] sm:$0xf] }
 0x194   : > { %v1121_v22 = vrot.slane %v1116_v40, 4  ;;  %v1078_v14 = vrot.slane %v1072_v24, 4  ;;  %v7395_v31 = vpop.permute.xlu2 %1433  ;;  %v5044_v43 = vld [vmem:[#allocation3 + $0x1b8] sm:$0xf0]  ;;  %v5915_v38 = vld [vmem:[#allocation3 + $0x134] sm:$0xf0] }
 0x195   : > { %2082 = vmatmul.bf16.vlgmr.msra.gmra.mxu3 %v6973_v3  ;;  %2108 = vmatmul.bf16.vlgmr.msra.gmra.mxu2 %v6973_v3  ;;  %v4852_v26 = vld [vmem:[#allocation3 + $0x38] sm:$0xf0] }
 0x196   : > { %2142 = vmatpush.bf16.msrb.mxu3 %v1965_v19  ;;  %2168 = vmatpush.bf16.msrb.mxu2 %v1968_v21  ;;  %v1129_v42 = vsel %vm438_vm0, %v1120_v41, %v1121_v22  ;;  %v1085_v12 = vsel %vm438_vm0, %v1077_v16, %v1078_v14  ;;  %v5942_v41 = vld [vmem:[#allocation3 + $0x214] sm:$0xf]  ;;  %v5043_v19 = vor.u32 %v5931_v57, %v5042_v7 }
 0x197   : > { %v1130_v15 = vsel %vm8494_vm12, %v1114_v28, %v1129_v42  ;;  %v1086_v61 = vsel %vm1081_vm10, %v7217_v34, %v1085_v12  ;;  %v5954_v55 = vld [vmem:[#allocation3 + $0x26c] sm:$0xf0]  ;;  %v5132_v62 = vld [vmem:[#allocation3 + $0x270] sm:$0xf0]  ;;  %v5047_v21 = vor.u32 %v5927_v37, %v5044_v43  ;;  %v5010_v12 = vld [vmem:[#allocation3 + $0x158] sm:$0xf] }
 0x198   : > { %1138 = vst.msk [vmem:[#allocation3 + $0x258] sm:$0xff] %vm7139_vm1, %v1130_v15  ;;  %v5130_v20 = vld [vmem:[#allocation3 + $0x250] sm:$0xf]  ;;  %v5950_v16 = vld [vmem:[#allocation3 + $0x254] sm:$0xf]  ;;  %v5011_v10 = vor.u32 %v5923_v46, %v5010_v12 }
 0x199   : > { %1095 = vst [vmem:[#allocation3 + $0x230] sm:$0xff] %v1086_v61  ;;  %v5131_v9 = vor.u32 %v5954_v55, %v5130_v20  ;;  %v5135_v2 = vor.u32 %v5950_v16, %v5132_v62  ;;  %v5955_v29 = vld [vmem:[#allocation3 + $0x274] sm:$0xf0]  ;;  %v5140_v54 = vld [vmem:[#allocation3 + $0x278] sm:$0xf0] }
 0x19a   : > { %2143 = vmatpush.bf16.msrb.mxu3 %v5203_v6  ;;  %2169 = vmatpush.bf16.msrb.mxu2 %v5207_v51  ;;  %v1979_v17 = vpop.f32.mrf.mxu0  ;;  %v5919_v6 = vld [vmem:[#allocation3 + $0x15c] sm:$0xf]  ;;  %v4978_v61 = vld [vmem:[#allocation3 + $0x118] sm:$0xf] }
 0x19b   : > { %2093 = vmatpush.bf16.msra.mxu1 %v5131_v9  ;;  %2119 = vmatpush.bf16.msra.mxu0 %v5135_v2  ;;  %v1074_v63 = vpop.permute.xlu1 %1073  ;;  %v1032_v34 = vpop.permute.xlu0 %1031  ;;  %v1980_v25 = vadd.f32 %v1979_v17, %v7395_v31  ;;  %v5015_v56 = vor.u32 %v5919_v6, %v5012_v5  ;;  %v5911_v55 = vld [vmem:[#allocation3 + $0x11c] sm:$0xf]  ;;  %v4979_v9 = vor.u32 %v5915_v38, %v4978_v61  ;;  %v4946_v17 = vld [vmem:[#allocation3 + $0xd8] sm:$0xf] }
 0x19c   : > { %v1079_v39 = vrot.slane %v1074_v63, 4  ;;  %v1037_v18 = vrot.slane %v1032_v34, 4  ;;  %v4980_v62 = vld [vmem:[#allocation3 + $0x138] sm:$0xf0] }
 0x19d   : > { %v4983_v2 = vor.u32 %v5911_v55, %v4980_v62  ;;  %v5903_v63 = vld [vmem:[#allocation3 + $0xdc] sm:$0xf] }
 0x19e   : > { %2144 = vmatpush.bf16.msrb.mxu3 %v5171_v1  ;;  %2170 = vmatpush.bf16.msrb.mxu2 %v5175_v50  ;;  %v1087_v4 = vsel %vm438_vm0, %v1078_v14, %v1079_v39  ;;  %v1045_v28 = vsel %vm438_vm0, %v1036_v58, %v1037_v18  ;;  %v5907_v1 = vld [vmem:[#allocation3 + $0xf4] sm:$0xf0]  ;;  %v4948_v50 = vld [vmem:[#allocation3 + $0xf8] sm:$0xf0] }
 0x19f   : > { %v1088_v44 = vsel %vm1081_vm10, %v1072_v24, %v1087_v4  ;;  %v1046_v49 = vsel %vm8495_vm9, %v7300_v35, %v1045_v28  ;;  %v5138_v33 = vld [vmem:[#allocation3 + $0x258] sm:$0xf]  ;;  %v5951_v59 = vld [vmem:[#allocation3 + $0x25c] sm:$0xf]  ;;  %v5075_v35 = vor.u32 %v5939_v48, %v5074_v45  ;;  %v4947_v18 = vor.u32 %v5907_v1, %v4946_v17 }
 0x1a0   : > { %1096 = vst.msk [vmem:[#allocation3 + $0x238] sm:$0xff] %vm7139_vm1, %v1088_v44  ;;  %v5946_v30 = vld [vmem:[#allocation3 + $0x22c] sm:$0xf0]  ;;  %v5100_v0 = vld [vmem:[#allocation3 + $0x230] sm:$0xf0]  ;;  %v5139_v23 = vor.u32 %v5955_v29, %v5138_v33  ;;  %v5143_v47 = vor.u32 %v5951_v59, %v5140_v54  ;;  %v4951_v45 = vor.u32 %v5903_v63, %v4948_v50  ;;  %vm2306_vm10 = vcmask 64516  }
 0x1a1   : > { %1054 = vst.msk [vmem:[#allocation3 + $0x218] sm:$0xff] %vm7139_vm1, %v1046_v49  ;;  %v5099_v58 = vor.u32 %v5946_v30, %v5098_v8  ;;  %v5103_v27 = vor.u32 %v5942_v41, %v5100_v0  ;;  %v2005_v32 = vpop.f32.mrf.mxu2  ;;  %v5899_v28 = vld [vmem:[#allocation3 + $0xb4] sm:$0xf0]  ;;  %v4916_v8 = vld [vmem:[#allocation3 + $0xb8] sm:$0xf0]  ;;  %vm8496_vm1 = vcmask 523264  }
 0x1a2   : > { %2145 = vmatpush.bf16.msrb.mxu3 %v5139_v23  ;;  %2171 = vmatpush.bf16.msrb.mxu2 %v5143_v47  ;;  %v1981_v60 = vpop.f32.mrf.mxu0  ;;  %v2006_v20 = vadd.f32 %v2005_v32, %v7395_v31  ;;  %v4914_v41 = vld [vmem:[#allocation3 + $0x98] sm:$0xf]  ;;  %v5895_v29 = vld [vmem:[#allocation3 + $0x9c] sm:$0xf]  ;;  %vm8499_vm13 = vmmov %vm8496_vm1 }
 0x1a3   : > { %2094 = vmatpush.bf16.msra.mxu1 %v5099_v58  ;;  %2120 = vmatpush.bf16.msra.mxu0 %v5103_v27  ;;  %v4915_v44 = vor.u32 %v5899_v28, %v4914_v41  ;;  %v4919_v49 = vor.u32 %v5895_v29, %v4916_v8  ;;  %v5891_v33 = vld [vmem:[#allocation3 + $0x74] sm:$0xf0]  ;;  %v4884_v59 = vld [vmem:[#allocation3 + $0x78] sm:$0xf0]  ;;  %vm8500_vm12 = vmmov %vm8496_vm1 }
 0x1a4   : > { %v4882_v30 = vld [vmem:[#allocation3 + $0x58] sm:$0xf]  ;;  %v5887_v0 = vld [vmem:[#allocation3 + $0x5c] sm:$0xf]  ;;  %vm8501_vm9 = vmmov %vm8496_vm1 }
 0x1a5   : > { %v4883_v23 = vor.u32 %v5891_v33, %v4882_v30  ;;  %v4887_v47 = vor.u32 %v5887_v0, %v4884_v59  ;;  %v4850_v58 = vld [vmem:[#allocation3 + $0x18] sm:$0xf]  ;;  %v5879_v48 = vld [vmem:[#allocation3 + $0x1c] sm:$0xf] }
 0x1a6   : > { %5212 = vmatmul.msk.bf16.vlgmr.msra.gmra.mxu1 %vm1942_vm3, %v7033_v13  ;;  %5213 = vmatmul.msk.bf16.vlgmr.msra.gmra.mxu0 %vm1942_vm3, %v7033_v13  ;;  %v5883_v27 = vld [vmem:[#allocation3 + $0x34] sm:$0xf0] }
 0x1a7   : > { %2126 = vmatpush.bf16.msrb.mxu1 %v5075_v35  ;;  %2152 = vmatpush.bf16.msrb.mxu0 %v5079_v52  ;;  %v5947_v40 = vld [vmem:[#allocation3 + $0x234] sm:$0xf0]  ;;  %v5108_v24 = vld [vmem:[#allocation3 + $0x238] sm:$0xf0]  ;;  %v4851_v32 = vor.u32 %v5883_v27, %v4850_v58  ;;  %v4855_v35 = vor.u32 %v5879_v48, %v4852_v26 }
 0x1a8   : > { %v5106_v53 = vld [vmem:[#allocation3 + $0x218] sm:$0xf]  ;;  %v5943_v22 = vld [vmem:[#allocation3 + $0x21c] sm:$0xf] }
 0x1a9   : > { %v5107_v14 = vor.u32 %v5947_v40, %v5106_v53  ;;  %v5111_v42 = vor.u32 %v5943_v22, %v5108_v24  ;;  %v2007_v51 = vpop.f32.mrf.mxu2 }
 0x1aa   : > { %v1992_v15 = vpop.f32.mrf.mxu1 }
 0x1ab   : > { %2127 = vmatpush.bf16.msrb.mxu1 %v5043_v19  ;;  %2153 = vmatpush.bf16.msrb.mxu0 %v5047_v21  ;;  %v7402_v11 = vadd.f32 %v1992_v15, %v1980_v25 }
 0x1ac   : > { %2146 = vmatpush.bf16.msrb.mxu3 %v5107_v14  ;;  %2172 = vmatpush.bf16.msrb.mxu2 %v5111_v42 }
 0x1ad   : > { %v2178_v16 = vmax.f32 %v7402_v11, 0.0 }
 0x1af   : > { %2128 = vmatpush.bf16.msrb.mxu1 %v5011_v10  ;;  %2154 = vmatpush.bf16.msrb.mxu0 %v5015_v56 }
 0x1b0   : > { %5214 = vmatmul.msk.bf16.vlgmr.msrb.gmra.mxu3 %vm1942_vm3, %v7033_v13  ;;  %5215 = vmatmul.msk.bf16.vlgmr.msrb.gmra.mxu2 %vm1942_vm3, %v7033_v13  ;;  %v2018_v34 = vpop.f32.mrf.mxu3 }
 0x1b1   : > { %v7410_v39 = vadd.f32 %v2018_v34, %v2006_v20 }
 0x1b2   : > { %v1994_v36 = vpop.f32.mrf.mxu1 }
 0x1b3   : > { %2129 = vmatpush.bf16.msrb.mxu1 %v4979_v9  ;;  %2155 = vmatpush.bf16.msrb.mxu0 %v4983_v2  ;;  %v2179_v4 = vmax.f32 %v7410_v39, 0.0 }
 0x1b5   : > { %v6181_v13 = vpack.i.bf16 %v2179_v4, %v2178_v16 }
 0x1b7   : > { %2130 = vmatpush.bf16.msrb.mxu1 %v4947_v18  ;;  %2156 = vmatpush.bf16.msrb.mxu0 %v4951_v45 }
 0x1b8   : > { %6182 = vrot.lane.b32.xlu0 %v6181_v13, %s8465_s30  ;;  %v2020_v54 = vpop.f32.mrf.mxu3 }
 0x1bb   : > { %2131 = vmatpush.bf16.msrb.mxu1 %v4915_v44  ;;  %2157 = vmatpush.bf16.msrb.mxu0 %v4919_v49 }
 0x1bf   : > { %2132 = vmatpush.bf16.msrb.mxu1 %v4883_v23  ;;  %2158 = vmatpush.bf16.msrb.mxu0 %v4887_v47 }
 0x1c3   : > { %2133 = vmatpush.bf16.msrb.mxu1 %v4851_v32  ;;  %2159 = vmatpush.bf16.msrb.mxu0 %v4855_v35 }
 0x1c6   : > { %2134 = vmatmul.bf16.vlgmr.msrb.gmra.mxu1 %v6973_v3  ;;  %2160 = vmatmul.bf16.vlgmr.msrb.gmra.mxu0 %v6973_v3 }
 0x1e0   : > { %v2031_v52 = vpop.f32.mrf.mxu1  ;;  %v2057_v60 = vpop.f32.mrf.mxu0 }
 0x1e1   : > { %v2032_v57 = vadd.f32 %v2031_v52, %v7395_v31  ;;  %v2058_v43 = vadd.f32 %v2057_v60, %v7395_v31 }
 0x1e8   : > { %v2033_v7 = vpop.f32.mrf.mxu1  ;;  %v2059_v37 = vpop.f32.mrf.mxu0 }
 0x1f3   : > { %v2044_v19 = vpop.f32.mrf.mxu3  ;;  %v2070_v21 = vpop.f32.mrf.mxu2 }
 0x1f4   : > { %v2045_v46 = vadd.f32 %v2044_v19, %v2032_v57  ;;  %v2071_v40 = vadd.f32 %v2070_v21, %v2058_v43 }
 0x1f6   : > { %v2180_v24 = vmax.f32 %v2045_v46, 0.0  ;;  %v2181_v5 = vmax.f32 %v2071_v40, 0.0 }
 0x1f8   : > { %v6186_v25 = vpack.i.bf16 %v2181_v5, %v2180_v24 }
 0x1fa   : > { %6187 = vrot.lane.b32.xlu1 %v6186_v25, %s8465_s30 }
 0x1fb   : > { %v2046_v53 = vpop.f32.mrf.mxu3  ;;  %v2072_v22 = vpop.f32.mrf.mxu2 }
 0x218   : > { %v2083_v3 = vpop.f32.mrf.mxu3  ;;  %v2109_v14 = vpop.f32.mrf.mxu2 }
 0x219   : > { %v2084_v42 = vadd.f32 %v2083_v3, %v7395_v31  ;;  %v2110_v12 = vadd.f32 %v2109_v14, %v7395_v31 }
 0x220   : > { %v2085_v6 = vpop.f32.mrf.mxu3  ;;  %v2111_v51 = vpop.f32.mrf.mxu2 }
 0x223   : > { %v2096_v10 = vpop.f32.mrf.mxu1  ;;  %v2122_v56 = vpop.f32.mrf.mxu0 }
 0x224   : > { %v2097_v38 = vadd.f32 %v2096_v10, %v2084_v42  ;;  %v2123_v15 = vadd.f32 %v2122_v56, %v2110_v12 }
 0x226   : > { %v2182_v61 = vmax.f32 %v2097_v38, 0.0  ;;  %v2183_v55 = vmax.f32 %v2123_v15, 0.0 }
 0x228   : > { %v6191_v62 = vpack.i.bf16 %v2183_v55, %v2182_v61 }
 0x22a   : > { %6192 = vrot.lane.b32.xlu2 %v6191_v62, %s8465_s30  ;;  %v6183_v33 = vpop.permute.xlu0 %6182 }
 0x22b   : > { %v2098_v20 = vpop.f32.mrf.mxu1  ;;  %v2124_v9 = vpop.f32.mrf.mxu0  ;;  %v6185_v59 = vunpack.i.h.bf16 %v6183_v33  ;;  %v6184_v54 = vunpack.i.l.bf16 %v6183_v33 }
 0x22d   : > { %v2228_v0 = vsel %vm464_vm15, %v6184_v54, %v6185_v59 }
 0x22e   : > { %v2243_v47 = vmax.f32 %v2178_v16, %v2228_v0 }
 0x233   : > { %v2148_v2 = vpop.f32.mrf.mxu3  ;;  %v2174_v1 = vpop.f32.mrf.mxu2 }
 0x23b   : > { %v2150_v50 = vpop.f32.mrf.mxu3  ;;  %v2176_v17 = vpop.f32.mrf.mxu2 }
 0x243   : > { %v2135_v63 = vpop.f32.mrf.mxu1  ;;  %v2161_v34 = vpop.f32.mrf.mxu0 }
 0x244   : > { %v2136_v18 = vadd.f32 %v2135_v63, %v7395_v31  ;;  %v2162_v45 = vadd.f32 %v2161_v34, %v7395_v31 }
 0x246   : > { %v2149_v36 = vadd.f32 %v2148_v2, %v2136_v18  ;;  %v2175_v28 = vadd.f32 %v2174_v1, %v2162_v45 }
 0x248   : > { %v2184_v8 = vmax.f32 %v2149_v36, 0.0  ;;  %v2185_v41 = vmax.f32 %v2175_v28, 0.0 }
 0x24a   : > { %2194 = vst.msk [vmem:[#allocation4 + $0x38] sm:$0xff] %vm8496_vm1, %v2185_v41 }
 0x24b   : > { %v2137_v29 = vpop.f32.mrf.mxu1  ;;  %v2163_v13 = vpop.f32.mrf.mxu0 }
 0x251   : > { %v2202_v44 = vld [vmem:[#allocation4 + $0x38] sm:$0xff] }
 0x252   : > { %v6196_v49 = vpack.i.bf16 %v2202_v44, %v2184_v8 }
 0x254   : > { %6197 = vrot.lane.b32.xlu0 %v6196_v49, %s8465_s30  ;;  %s6360_s30 = smov 56  }
 0x26c   : > { %v6188_v30 = vpop.permute.xlu1 %6187 }
 0x26d   : > { %v6189_v23 = vunpack.i.l.bf16 %v6188_v30  ;;  %v6190_v48 = vunpack.i.h.bf16 %v6188_v30 }
 0x26f   : > { %v2229_v31 = vsel %vm464_vm15, %v6185_v59, %v6189_v23  ;;  %v2230_v32 = vsel %vm464_vm15, %v6189_v23, %v6190_v48 }
 0x270   : > { %v2244_v58 = vmax.f32 %v2179_v4, %v2229_v31  ;;  %v7439_v60 = vmax.f32 %v2180_v24, %v2230_v32 }
 0x272   : > { %v6201_v27 = vpack.i.bf16 %v2244_v58, %v2243_v47 }
 0x274   : > { %6202 = vrot.lane.b32.xlu1 %v6201_v27, %s8466_s23 }
 0x284   : > { %v6193_v26 = vpop.permute.xlu2 %6192 }
 0x285   : > { %v6194_v35 = vunpack.i.l.bf16 %v6193_v26  ;;  %v6195_v16 = vunpack.i.h.bf16 %v6193_v26 }
 0x287   : > { %v2231_v52 = vsel %vm464_vm15, %v6190_v48, %v6194_v35  ;;  %v2232_v4 = vsel %vm464_vm15, %v6194_v35, %v6195_v16 }
 0x288   : > { %v7441_v7 = vmax.f32 %v2181_v5, %v2231_v52  ;;  %v2247_v46 = vmax.f32 %v2182_v61, %v2232_v4 }
 0x28a   : > { %v6206_v11 = vpack.i.bf16 %v7441_v7, %v7439_v60 }
 0x28c   : > { %6207 = vrot.lane.b32.xlu2 %v6206_v11, %s8466_s23 }
 0x2c6   : > { %v6198_v39 = vpop.permute.xlu0 %6197 }
 0x2c7   : > { %v6200_v37 = vunpack.i.h.bf16 %v6198_v39  ;;  %v6199_v57 = vunpack.i.l.bf16 %v6198_v39 }
 0x2c9   : > { %v2250_v43 = vmax.f32 %v2202_v44, %v6200_v37  ;;  %v2233_v19 = vsel %vm464_vm15, %v6195_v16, %v6199_v57  ;;  %v2234_v21 = vsel %vm464_vm15, %v6199_v57, %v6200_v37  ;;  %vm2307_vm15 = vmor %vm2306_vm10, %vm438_vm0 }
 0x2ca   : > { %v2248_v40 = vmax.f32 %v2183_v55, %v2233_v19  ;;  %v2249_v24 = vmax.f32 %v2184_v8, %v2234_v21 }
 0x2cc   : > { %v6211_v5 = vpack.i.bf16 %v2248_v40, %v2247_v46  ;;  %v6216_v25 = vpack.i.bf16 %v2250_v43, %v2249_v24 }
 0x2ce   : > { %6212 = vrot.lane.b32.xlu0 %v6211_v5, %s8466_s23  ;;  %6217 = vrot.lane.b32.xlu1 %v6216_v25, %s8466_s23  ;;  %s6362_s23 = smov 120  }
 0x2e6   : > { %v6203_v53 = vpop.permute.xlu1 %6202  ;;  %v6208_v22 = vpop.permute.xlu2 %6207 }
 0x2e7   : > { %v6205_v3 = vunpack.i.h.bf16 %v6203_v53  ;;  %v6204_v14 = vunpack.i.l.bf16 %v6203_v53  ;;  %v6209_v42 = vunpack.i.l.bf16 %v6208_v22  ;;  %v6210_v38 = vunpack.i.h.bf16 %v6208_v22 }
 0x2e9   : > { %v2276_v12 = vsel %vm608_vm14, %v6204_v14, %v6205_v3  ;;  %v2277_v6 = vsel %vm608_vm14, %v6205_v3, %v6209_v42  ;;  %v2278_v15 = vsel %vm608_vm14, %v6209_v42, %v6210_v38 }
 0x2ea   : > { %v2291_v51 = vmax.f32 %v2243_v47, %v2276_v12  ;;  %v2292_v10 = vmax.f32 %v2244_v58, %v2277_v6  ;;  %v2293_v1 = vmax.f32 %v7439_v60, %v2278_v15 }
 0x2ec   : > { %v2299_v56 = vpack.c.bf16 %v2292_v10, %v2291_v51 }
 0x2ee   : > { %2303 = vst [vmem:[#allocation5] sm:$0xff] %v2299_v56  ;;  %2532 = vrot.lane.b32.xlu2 %v2299_v56, %s6360_s30  ;;  %2505 = vrot.lane.b32.xlu0 %v2299_v56, %s6361_s14 }
 0x2ef   : > { %2453 = vrot.lane.b32.xlu1 %v2299_v56, %s8462_s15  ;;  %2312 = vst [vmem:[#allocation3] sm:$0xff] %v2299_v56 }
 0x2f6   : > { %2479 = vrot.lane.b32.xlu0 %v2299_v56, %s8472_s0  ;;  %2347 = vrot.lane.b32.xlu2 %v2299_v56, %s8464_s19 }
 0x2f7   : > { %2400 = vrot.lane.b32.xlu1 %v2299_v56, %s6362_s23 }
 0x2fe   : > { %2427 = vrot.lane.b32.xlu0 %v2299_v56, %s8456_s18 }
 0x2ff   : > { %2373 = vrot.lane.b32.xlu1 %v2299_v56, %s6363_s29 }
 0x307   : > { %2321 = vrot.lane.b32.xlu1 %v2299_v56, %s8460_s20 }
 0x340   : > { %v6213_v61 = vpop.permute.xlu0 %6212  ;;  %v6218_v55 = vpop.permute.xlu1 %6217 }
 0x341   : > { %v6215_v62 = vunpack.i.h.bf16 %v6213_v61  ;;  %v6214_v20 = vunpack.i.l.bf16 %v6213_v61  ;;  %v6220_v9 = vunpack.i.h.bf16 %v6218_v55  ;;  %v6219_v2 = vunpack.i.l.bf16 %v6218_v55 }
 0x343   : > { %v2279_v50 = vsel %vm608_vm14, %v6210_v38, %v6214_v20  ;;  %v2280_v17 = vsel %vm608_vm14, %v6214_v20, %v6215_v62  ;;  %v2298_v63 = vmax.f32 %v2250_v43, %v6220_v9  ;;  %v2281_v34 = vsel %vm608_vm14, %v6215_v62, %v6219_v2 }
 0x344   : > { %v2294_v18 = vmax.f32 %v7441_v7, %v2279_v50  ;;  %v2295_v45 = vmax.f32 %v2247_v46, %v2280_v17  ;;  %v2282_v36 = vsel %vm608_vm14, %v6219_v2, %v6220_v9  ;;  %v2296_v28 = vmax.f32 %v2248_v40, %v2281_v34  ;;  %vm8497_vm14 = vmmov %vm8492_vm8 }
 0x345   : > { %v2297_v8 = vmax.f32 %v2249_v24, %v2282_v36  ;;  %vm8498_vm8 = vcmask 490496   ;;  %vm8502_vm10 = vmmov %vm8497_vm14 }
 0x346   : > { %v2300_v41 = vpack.c.bf16 %v2294_v18, %v2293_v1  ;;  %v7469_v29 = vpack.c.bf16 %v2296_v28, %v2295_v45 }
 0x347   : > { %v2302_v13 = vpack.c.bf16 %v2298_v63, %v2297_v8 }
 0x348   : > { %2304 = vst [vmem:[#allocation5 + $0x8] sm:$0xff] %v2300_v41  ;;  %v2533_v23 = vpop.permute.xlu2 %2532 }
 0x349   : > { %2305 = vst [vmem:[#allocation5 + $0x10] sm:$0xff] %v7469_v29  ;;  %v2538_v19 = vrot.slane %v2533_v23, 4 }
 0x34a   : > { %2308 = vst.msk [vmem:[#allocation5 + $0x18] sm:$0xff] %vm2307_vm15, %v2302_v13  ;;  %vm8503_vm15 = vmmov %vm8498_vm8 }
 0x34b   : > { %2313 = vst [vmem:[#allocation3 + $0x8] sm:$0xff] %v2300_v41 }
 0x34c   : > { %2796 = vst [vmem:[#allocation3 + $0x280] sm:$0xff] %v2300_v41 }
 0x34d   : > { %2797 = vst [vmem:[#allocation3 + $0x288] sm:$0xff] %v7469_v29 }
 0x34f   : > { %v2585_v44 = vld [vmem:[#allocation5 + $0x4] sm:$0xff] }
 0x350   : > { %v2311_v49 = vld [vmem:[#allocation5 + $0x10] sm:$0xf]  ;;  %v2555_v59 = vld [vmem:[#allocation5 + $0x14] sm:$0xf]  ;;  %2591 = vrot.lane.b32.xlu0 %v2585_v44, %s8464_s19  ;;  %2643 = vrot.lane.b32.xlu2 %v2585_v44, %s6362_s23  ;;  %2556 = vst [vmem:[#allocation3 + $0x140] sm:$0xff] %v2585_v44  ;;  %v7522_v47 = vpop.permute.xlu2 %2347 }
 0x351   : > { %v7474_v33 = vld [vmem:[#allocation5 + $0xc] sm:$0xff]  ;;  %2314 = vst [vmem:[#allocation3 + $0x10] sm:$0xf] %v2311_v49  ;;  %2669 = vrot.lane.b32.xlu1 %v2585_v44, %s8456_s18  ;;  %v2795_v54 = vld [vmem:[#allocation5 + $0x18] sm:$0xf]  ;;  %v2353_v42 = vrot.slane %v7522_v47, 4 }
 0x352   : > { %2557 = vst [vmem:[#allocation3 + $0x148] sm:$0xff] %v7474_v33  ;;  %v7501_v30 = vld [vmem:[#allocation5 + $0x14] sm:$0xff] }
 0x353   : > { %2558 = vst [vmem:[#allocation3 + $0x150] sm:$0xf] %v2555_v59  ;;  %v2879_v0 = vld [vmem:[#allocation5 + $0x18] sm:$0xff] }
 0x354   : > { %2798 = vst [vmem:[#allocation3 + $0x290] sm:$0xf] %v2795_v54 }
 0x358   : > { %2534 = vrot.lane.b32.xlu0 %v2300_v41, %s6360_s30  ;;  %2617 = vrot.lane.b32.xlu2 %v2585_v44, %s6363_s29 }
 0x359   : > { %2565 = vrot.lane.b32.xlu1 %v2585_v44, %s8460_s20 }
 0x360   : > { %2349 = vrot.lane.b32.xlu0 %v2300_v41, %s8464_s19  ;;  %2455 = vrot.lane.b32.xlu2 %v2300_v41, %s8462_s15  ;;  %v7524_v58 = vpop.permute.xlu0 %2505 }
 0x361   : > { %2507 = vrot.lane.b32.xlu1 %v2300_v41, %s6361_s14  ;;  %v2454_v31 = vpop.permute.xlu1 %2453  ;;  %v2511_v15 = vrot.slane %v7524_v58, 4 }
 0x362   : > { %v2459_v7 = vrot.slane %v2454_v31, 4 }
 0x368   : > { %2721 = vrot.lane.b32.xlu0 %v2585_v44, %s8472_s0  ;;  %2883 = vrot.lane.b32.xlu2 %v2300_v41, %s6362_s23  ;;  %v7534_v26 = vpop.permute.xlu0 %2479 }
 0x369   : > { %2481 = vrot.lane.b32.xlu1 %v2300_v41, %s8472_s0  ;;  %v2401_v27 = vpop.permute.xlu1 %2400  ;;  %v2485_v34 = vrot.slane %v7534_v26, 4 }
 0x36a   : > { %v2406_v21 = vrot.slane %v2401_v27, 4 }
 0x370   : > { %2645 = vrot.lane.b32.xlu0 %v7474_v33, %s6362_s23  ;;  %2402 = vrot.lane.b32.xlu2 %v2300_v41, %s6362_s23  ;;  %v7548_v52 = vpop.permute.xlu0 %2427 }
 0x371   : > { %2429 = vrot.lane.b32.xlu1 %v2300_v41, %s8456_s18  ;;  %v2374_v32 = vpop.permute.xlu1 %2373  ;;  %v2433_v59 = vrot.slane %v7548_v52, 4 }
 0x372   : > { %v2379_v51 = vrot.slane %v2374_v32, 4 }
 0x378   : > { %2619 = vrot.lane.b32.xlu0 %v7474_v33, %s6363_s29  ;;  %2375 = vrot.lane.b32.xlu2 %v2300_v41, %s6363_s29 }
 0x379   : > { %2857 = vrot.lane.b32.xlu1 %v2300_v41, %s6363_s29  ;;  %v7552_v11 = vpop.permute.xlu1 %2321 }
 0x380   : > { %2885 = vrot.lane.b32.xlu0 %v7469_v29, %s6362_s23  ;;  %2831 = vrot.lane.b32.xlu2 %v2300_v41, %s8464_s19 }
 0x381   : > { %2773 = vrot.lane.b32.xlu1 %v2585_v44, %s6360_s30 }
 0x388   : > { %2647 = vrot.lane.b32.xlu0 %v7501_v30, %s6362_s23  ;;  %2323 = vrot.lane.b32.xlu2 %v2300_v41, %s8460_s20 }
 0x389   : > { %2695 = vrot.lane.b32.xlu1 %v2585_v44, %s8462_s15 }
 0x390   : > { %2833 = vrot.lane.b32.xlu0 %v7469_v29, %s8464_s19  ;;  %2805 = vrot.lane.b32.xlu2 %v2300_v41, %s8460_s20  ;;  %v2327_v41 = vrot.slane %v7552_v11, 4 }
 0x391   : > { %2593 = vrot.lane.b32.xlu1 %v7474_v33, %s8464_s19 }
 0x398   : > { %2887 = vrot.lane.b32.xlu0 %v2879_v0, %s6362_s23  ;;  %2747 = vrot.lane.b32.xlu2 %v2585_v44, %s6361_s14 }
 0x399   : > { %2673 = vrot.lane.b32.xlu1 %v7501_v30, %s8456_s18 }
 0x3a0   : > { %2595 = vrot.lane.b32.xlu0 %v7501_v30, %s8464_s19  ;;  %2671 = vrot.lane.b32.xlu2 %v7474_v33, %s8456_s18 }
 0x3a1   : > { %2621 = vrot.lane.b32.xlu1 %v7501_v30, %s6363_s29 }
 0x3a8   : > { %2807 = vrot.lane.b32.xlu0 %v7469_v29, %s8460_s20  ;;  %2567 = vrot.lane.b32.xlu2 %v7474_v33, %s8460_s20 }
 0x3a9   : > { %2569 = vrot.lane.b32.xlu1 %v7501_v30, %s8460_s20 }
 0x3aa   : > { %v7532_v48 = vpop.permute.xlu2 %2643 }
 0x3ab   : > { %v2649_v13 = vrot.slane %v7532_v48, 4 }
 0x3b0   : > { %2749 = vrot.lane.b32.xlu0 %v7474_v33, %s6361_s14  ;;  %2859 = vrot.lane.b32.xlu2 %v7469_v29, %s6363_s29 }
 0x3b1   : > { %2861 = vrot.lane.b32.xlu1 %v2879_v0, %s6363_s29 }
 0x3b2   : > { %v7541_v35 = vpop.permute.xlu2 %2617 }
 0x3b8   : > { %2835 = vrot.lane.b32.xlu0 %v2879_v0, %s8464_s19  ;;  %2775 = vrot.lane.b32.xlu2 %v7474_v33, %s6360_s30 }
 0x3b9   : > { %2723 = vrot.lane.b32.xlu1 %v7474_v33, %s8472_s0 }
 0x3ba   : > { %v7550_v60 = vpop.permute.xlu2 %2455 }
 0x3bb   : > { %v2460_v16 = vrot.slane %v7550_v60, 4 }
 0x3bd   : > { %v2462_v39 = vsel %vm438_vm0, %v2459_v7, %v2460_v16 }
 0x3be   : > { %v2463_v4 = vsel %vm8497_vm14, %v2454_v31, %v2462_v39  ;;  %vm8504_vm14 = vmmov %vm8498_vm8 }
 0x3bf   : > { %2470 = vst [vmem:[#allocation3 + $0xc0] sm:$0xff] %v2463_v4 }
 0x3c0   : > { %2536 = vrot.lane.b32.xlu0 %v7469_v29, %s6360_s30  ;;  %2509 = vrot.lane.b32.xlu2 %v7469_v29, %s6361_s14 }
 0x3c1   : > { %2483 = vrot.lane.b32.xlu1 %v7469_v29, %s8472_s0 }
 0x3c2   : > { %v7565_v37 = vpop.permute.xlu0 %2591  ;;  %v7567_v57 = vpop.permute.xlu2 %2883 }
 0x3c3   : > { %v7569_v43 = vpop.permute.xlu1 %2669 }
 0x3c8   : > { %2457 = vrot.lane.b32.xlu0 %v7469_v29, %s8462_s15  ;;  %2697 = vrot.lane.b32.xlu2 %v7474_v33, %s8462_s15 }
 0x3c9   : > { %2404 = vrot.lane.b32.xlu1 %v7469_v29, %s6362_s23 }
 0x3ca   : > { %v7577_v46 = vpop.permute.xlu0 %2534  ;;  %v7579_v40 = vpop.permute.xlu2 %2402 }
 0x3cb   : > { %v2539_v24 = vrot.slane %v7577_v46, 4  ;;  %v2407_v5 = vrot.slane %v7579_v40, 4  ;;  %v7583_v25 = vpop.permute.xlu1 %2565 }
 0x3cd   : > { %v2541_v53 = vsel %vm438_vm0, %v2538_v19, %v2539_v24  ;;  %v2409_v22 = vsel %vm438_vm0, %v2406_v21, %v2407_v5  ;;  %v2889_v19 = vrot.slane %v7567_v57, 4 }
 0x3ce   : > { %v2543_v3 = vsel %vm2542_vm5, %v2533_v23, %v2541_v53  ;;  %v2411_v14 = vsel %vm2410_vm2, %v2401_v27, %v2409_v22 }
 0x3cf   : > { %2550 = vst [vmem:[#allocation3 + $0x120] sm:$0xff] %v2543_v3 }
 0x3d0   : > { %2418 = vst [vmem:[#allocation3 + $0x80] sm:$0xff] %v2411_v14  ;;  %2777 = vrot.lane.b32.xlu0 %v7501_v30, %s6360_s30  ;;  %2809 = vrot.lane.b32.xlu2 %v2879_v0, %s8460_s20 }
 0x3d1   : > { %2725 = vrot.lane.b32.xlu1 %v7501_v30, %s8472_s0  ;;  %s6296_s0 = scalar_lea.hbm %s8387_s12, 2 }
 0x3d2   : > { %v7599_v12 = vpop.permute.xlu0 %2349  ;;  %v7601_v6 = vpop.permute.xlu2 %2375 }
 0x3d3   : > { %v2354_v10 = vrot.slane %v7599_v12, 4  ;;  %v2380_v56 = vrot.slane %v7601_v6, 4  ;;  %v7605_v38 = vpop.permute.xlu1 %2507 }
 0x3d4   : > { %v2512_v61 = vrot.slane %v7605_v38, 4 }
 0x3d5   : > { %v2356_v55 = vsel %vm438_vm0, %v2353_v42, %v2354_v10  ;;  %v2382_v62 = vsel %vm438_vm0, %v2379_v51, %v2380_v56 }
 0x3d6   : > { %v2357_v20 = vsel %vm572_vm7, %v7522_v47, %v2356_v55  ;;  %v2384_v9 = vsel %vm2383_vm4, %v2374_v32, %v2382_v62  ;;  %v2514_v2 = vsel %vm438_vm0, %v2511_v15, %v2512_v61  ;;  %v2675_v15 = vrot.slane %v7569_v43, 4 }
 0x3d7   : > { %2364 = vst [vmem:[#allocation3 + $0x40] sm:$0xff] %v2357_v20  ;;  %v2516_v1 = vsel %vm2515_vm6, %v7524_v58, %v2514_v2 }
 0x3d8   : > { %2391 = vst [vmem:[#allocation3 + $0x60] sm:$0xff] %v2384_v9  ;;  %2699 = vrot.lane.b32.xlu0 %v7501_v30, %s8462_s15  ;;  %2751 = vrot.lane.b32.xlu2 %v7501_v30, %s6361_s14  ;;  %s4760_s14 = scalar_lea.hbm %s8387_s12, %s6450_s25  ;;  %s4752_s15 = scalar_lea.sflag [#allocation9], %s404_s24 }
 0x3d9   : > { %2523 = vst [vmem:[#allocation3 + $0x100] sm:$0xff] %v2516_v1  ;;  %2325 = vrot.lane.b32.xlu1 %v7469_v29, %s8460_s20 }
 0x3da   : > { %v7629_v50 = vpop.permute.xlu0 %2721  ;;  %v7631_v17 = vpop.permute.xlu2 %2831 }
 0x3db   : > { %v7633_v63 = vpop.permute.xlu1 %2481 }
 0x3dc   : > { %v2486_v18 = vrot.slane %v7633_v63, 4 }
 0x3de   : > { %v2488_v45 = vsel %vm438_vm0, %v2485_v34, %v2486_v18 }
 0x3df   : > { %v2489_v36 = vsel %vm8498_vm8, %v7534_v26, %v2488_v45 }
 0x3e0   : > { %2496 = vst [vmem:[#allocation3 + $0xe0] sm:$0xff] %v2489_v36  ;;  %2377 = vrot.lane.b32.xlu0 %v7469_v29, %s6363_s29  ;;  %2431 = vrot.lane.b32.xlu2 %v7469_v29, %s8456_s18  ;;  %s4764_s29 = sshll.u32 %s4760_s14, 4  ;;  %s4765_s29 = int_to_ptr.hbm [resolvable:$true] %s4764_s29 }
 0x3e1   : > { %s6290_s17 = sshra.s32 %s4765_s29, 4  ;;  %s6291_s17 = int_to_ptr.hbm [resolvable:$true] %s6290_s17 }
 0x3e2   : > { %v2646_v28 = vpop.permute.xlu0 %2645  ;;  %v7646_v8 = vpop.permute.xlu2 %2323  ;;  %s6292_s25 = scalar_lea.hbm %s6291_s17, 1  ;;  %p6297_p0 = scmp.lt.s32.totalorder %s6291_s17, %s8387_s12 }
 0x3e3   : > { %v2650_v44 = vrot.slane %v2646_v28, 4  ;;  %v2328_v49 = vrot.slane %v7646_v8, 4  ;;  %v7651_v33 = vpop.permute.xlu1 %2429  ;;  %p6293_p11 = scmp.ne.s32.totalorder %s6291_s17, %s6292_s25  ;;  %p6298_p1 = scmp.lt.s32.totalorder %s6296_s0, %s6292_s25 }
 0x3e4   : > { %v2434_v54 = vrot.slane %v7651_v33, 4 }
 0x3e5   : > { %v2652_v30 = vsel %vm438_vm0, %v2649_v13, %v2650_v44  ;;  %v2330_v0 = vsel %vm438_vm0, %v2327_v41, %v2328_v49  ;;  %p6294_p12 = pnand %p6293_p11, %p6467_p5  ;;  %p6299_p2 = por %p6298_p1, %p6297_p0 }
 0x3e6   : > { %v2653_v23 = vsel %vm2410_vm2, %v7532_v48, %v2652_v30  ;;  %v2331_v31 = vsel %vm500_vm11, %v7552_v11, %v2330_v0  ;;  %v2436_v47 = vsel %vm438_vm0, %v2433_v59, %v2434_v54  ;;  %v2623_v48 = vrot.slane %v7541_v35, 4 }
 0x3e7   : > { %2660 = vst [vmem:[#allocation3 + $0x1c0] sm:$0xff] %v2653_v23  ;;  %v2437_v58 = vsel %vm8499_vm13, %v7548_v52, %v2436_v47  ;;  %v2980_v52 = vld [vmem:[%s8379_s4] sm:$0xff]  ;;  %v2571_v0 = vrot.slane %v7583_v25, 4  ;;  %vm8507_vm13 = vmmov %vm8496_vm1  ;;  %p6295_p13 = pneg %p6294_p12 }
 0x3e8   : > { %2338 = vst [vmem:[#allocation3 + $0x20] sm:$0xff] %v2331_v31  ;;  %2351 = vrot.lane.b32.xlu2 %v7469_v29, %s8464_s19 }
 0x3e9   : > { %2444 = vst [vmem:[#allocation3 + $0xa0] sm:$0xff] %v2437_v58  ;;  %p6300_p3 = pnand %p6299_p2, %p6295_p13 }
 0x3ea   : > { %v7670_v27 = vpop.permute.xlu0 %2619  ;;  %v7672_v26 = vpop.permute.xlu2 %2805 }
 0x3eb   : > { %v2624_v32 = vrot.slane %v7670_v27, 4  ;;  %v7676_v7 = vpop.permute.xlu1 %2857 }
 0x3ed   : > { %v2626_v11 = vsel %vm438_vm0, %v2623_v48, %v2624_v32 }
 0x3ee   : > { %v2627_v29 = vsel %vm2383_vm4, %v7541_v35, %v2626_v11 }
 0x3ef   : > { %2634 = vst [vmem:[#allocation3 + $0x1a0] sm:$0xff] %v2627_v29 }
 0x3f0   : > { %2984 = vperm.xlu2 %6180, %v2980_v52  }
 0x3f2   : > { %v7686_v39 = vpop.permute.xlu0 %2885  ;;  %v7688_v4 = vpop.permute.xlu2 %2747 }
 0x3f3   : > { %v2890_v21 = vrot.slane %v7686_v39, 4  ;;  %v7692_v53 = vpop.permute.xlu1 %2773 }
 0x3f5   : > { %v2892_v22 = vsel %vm438_vm0, %v2889_v19, %v2890_v21  ;;  %v5366_v19 = vld [vmem:[#allocation3 + $0x1c0] sm:$0xf] }
 0x3f6   : > { %v2893_v3 = vsel %vm2410_vm2, %v7567_v57, %v2892_v22  ;;  %v6009_v22 = vld [vmem:[#allocation3 + $0x1c4] sm:$0xf] }
 0x3f7   : > { %v3196_v14 = vunpack.c.l.b16 %v2893_v3  ;;  %v3197_v42 = vunpack.c.h.b16 %v2893_v3 }
 0x3f9   : > { %v3261_v35 = vpack.c.b16 %v3196_v14, %v3196_v14  ;;  %v3262_v51 = vpack.c.b16 %v3197_v42, %v3197_v42 }
 0x3fa   : > { %v2648_v55 = vpop.permute.xlu0 %2647  ;;  %v2672_v62 = vpop.permute.xlu2 %2671 }
 0x3fb   : > { %v2651_v20 = vrot.slane %v2648_v55, 4  ;;  %v2676_v9 = vrot.slane %v2672_v62, 4  ;;  %v7698_v2 = vpop.permute.xlu1 %2695  ;;  %v3330_v1 = vsel %vm438_vm0, %v3261_v35, 0  ;;  %v3333_v34 = vsel %vm438_vm0, %v3262_v51, 0 }
 0x3fc   : > { %3361 = vmatpush.bf16.msra.mxu1 %v3330_v1  ;;  %3389 = vmatpush.bf16.msra.mxu0 %v3333_v34 }
 0x3fd   : > { %v2654_v57 = vsel %vm438_vm0, %v2650_v44, %v2651_v20  ;;  %v2656_v45 = vsel %vm2410_vm2, %v2648_v55, %v2651_v20  ;;  %v2678_v36 = vsel %vm438_vm0, %v2675_v15, %v2676_v9  ;;  %v2837_v44 = vrot.slane %v7631_v17, 4 }
 0x3fe   : > { %v2655_v41 = vsel %vm2410_vm2, %v2646_v28, %v2654_v57  ;;  %2662 = vst [vmem:[#allocation3 + $0x1d0] sm:$0xf] %v2656_v45  ;;  %v2679_v13 = vsel %vm8500_vm12, %v7569_v43, %v2678_v36  ;;  %v2597_v28 = vrot.slane %v7565_v37, 4 }
 0x3ff   : > { %2661 = vst [vmem:[#allocation3 + $0x1c8] sm:$0xff] %v2655_v41 }
 0x400   : > { %2686 = vst [vmem:[#allocation3 + $0x1e0] sm:$0xff] %v2679_v13 }
 0x402   : > { %v7708_v59 = vpop.permute.xlu0 %2833  ;;  %v7710_v30 = vpop.permute.xlu2 %2567 }
 0x403   : > { %v2838_v23 = vrot.slane %v7708_v59, 4  ;;  %v2572_v31 = vrot.slane %v7710_v30, 4  ;;  %v7716_v47 = vpop.permute.xlu1 %2593 }
 0x404   : > { %v2598_v43 = vrot.slane %v7716_v47, 4 }
 0x405   : > { %v2840_v58 = vsel %vm438_vm0, %v2837_v44, %v2838_v23  ;;  %v2574_v48 = vsel %vm438_vm0, %v2571_v0, %v2572_v31  ;;  %v6006_v44 = vld [vmem:[#allocation3 + $0x19c] sm:$0xf0] }
 0x406   : > { %v2841_v11 = vsel %vm572_vm7, %v7631_v17, %v2840_v58  ;;  %v2575_v52 = vsel %vm500_vm11, %v7583_v25, %v2574_v48  ;;  %v2600_v29 = vsel %vm438_vm0, %v2597_v28, %v2598_v43  ;;  %v2863_v25 = vrot.slane %v7676_v7, 4  ;;  %v5348_v28 = vld [vmem:[#allocation3 + $0x1a0] sm:$0xf0] }
 0x407   : > { %2848 = vst [vmem:[#allocation3 + $0x2c0] sm:$0xff] %v2841_v11  ;;  %v2601_v3 = vsel %vm572_vm7, %v7565_v37, %v2600_v29  ;;  %v6011_v14 = vld [vmem:[#allocation3 + $0x1dc] sm:$0xf0]  ;;  %v5368_v42 = vld [vmem:[#allocation3 + $0x1e0] sm:$0xf0] }
 0x408   : > { %2582 = vst [vmem:[#allocation3 + $0x160] sm:$0xff] %v2575_v52  ;;  %v5367_v35 = vor.u32 %v6011_v14, %v5366_v19  ;;  %v5371_v51 = vor.u32 %v6009_v22, %v5368_v42  ;;  %v5326_v14 = vld [vmem:[#allocation3 + $0x140] sm:$0xf] }
 0x409   : > { %2608 = vst [vmem:[#allocation3 + $0x180] sm:$0xff] %v2601_v3 }
 0x40a   : > { %3344 = vmatpush.bf16.msra.mxu3 %v5367_v35  ;;  %3372 = vmatpush.bf16.msra.mxu2 %v5371_v51  ;;  %v2888_v17 = vpop.permute.xlu0 %2887  ;;  %v7733_v15 = vpop.permute.xlu2 %2859  ;;  %v5999_v51 = vld [vmem:[#allocation3 + $0x144] sm:$0xf] }
 0x40b   : > { %v2891_v55 = vrot.slane %v2888_v17, 4  ;;  %v2864_v20 = vrot.slane %v7733_v15, 4  ;;  %v2674_v1 = vpop.permute.xlu1 %2673 }
 0x40c   : > { %v2677_v34 = vrot.slane %v2674_v1, 4 }
 0x40d   : > { %v2894_v37 = vsel %vm438_vm0, %v2890_v21, %v2891_v55  ;;  %v2896_v57 = vsel %vm2410_vm2, %v2888_v17, %v2891_v55  ;;  %v2866_v45 = vsel %vm438_vm0, %v2863_v25, %v2864_v20 }
 0x40e   : > { %v7744_v36 = vsel %vm2410_vm2, %v7686_v39, %v2894_v37  ;;  %2902 = vst [vmem:[#allocation3 + $0x310] sm:$0xf] %v2896_v57  ;;  %v2867_v41 = vsel %vm2383_vm4, %v7676_v7, %v2866_v45  ;;  %v2680_v13 = vsel %vm438_vm0, %v2676_v9, %v2677_v34  ;;  %v2682_v21 = vsel %vm8496_vm1, %v2674_v1, %v2677_v34  ;;  %v5306_v34 = vld [vmem:[#allocation3 + $0x100] sm:$0xf]  ;;  %v5994_v37 = vld [vmem:[#allocation3 + $0x104] sm:$0xf] }
 0x40f   : > { %v2681_v0 = vsel %vm8501_vm9, %v2672_v62, %v2680_v13  ;;  %2874 = vst [vmem:[#allocation3 + $0x2e0] sm:$0xff] %v2867_v41  ;;  %v6001_v39 = vld [vmem:[#allocation3 + $0x15c] sm:$0xf0]  ;;  %v5328_v7 = vld [vmem:[#allocation3 + $0x160] sm:$0xf0]  ;;  %v2779_v9 = vrot.slane %v7692_v53, 4  ;;  %vm8509_vm9 = vmmov %vm8496_vm1 }
 0x410   : > { %v5346_v58 = vld [vmem:[#allocation3 + $0x180] sm:$0xf]  ;;  %v6004_v48 = vld [vmem:[#allocation3 + $0x184] sm:$0xf]  ;;  %2687 = vst [vmem:[#allocation3 + $0x1e8] sm:$0xff] %v2681_v0  ;;  %v5327_v35 = vor.u32 %v6001_v39, %v5326_v14  ;;  %v5331_v1 = vor.u32 %v5999_v51, %v5328_v7  ;;  %v2811_v7 = vrot.slane %v7672_v26, 4 }
 0x411   : > { %v5347_v11 = vor.u32 %v6006_v44, %v5346_v58  ;;  %v5351_v52 = vor.u32 %v6004_v48, %v5348_v28  ;;  %2688 = vst [vmem:[#allocation3 + $0x1f0] sm:$0xf] %v2682_v21  ;;  %v5446_v41 = vld [vmem:[#allocation3 + $0x2c0] sm:$0xf]  ;;  %v6029_v13 = vld [vmem:[#allocation3 + $0x2c4] sm:$0xf] }
 0x412   : > { %v2596_v29 = vpop.permute.xlu0 %2595  ;;  %v7751_v19 = vpop.permute.xlu2 %2775  ;;  %v5996_v28 = vld [vmem:[#allocation3 + $0x11c] sm:$0xf0]  ;;  %v5989_v51 = vld [vmem:[#allocation3 + $0xc4] sm:$0xf] }
 0x413   : > { %3345 = vmatpush.bf16.msra.mxu3 %v5347_v11  ;;  %3373 = vmatpush.bf16.msra.mxu2 %v5351_v52  ;;  %v2599_v62 = vrot.slane %v2596_v29, 4  ;;  %v2780_v22 = vrot.slane %v7751_v19, 4  ;;  %v2622_v3 = vpop.permute.xlu1 %2621  ;;  %v5307_v11 = vor.u32 %v5996_v28, %v5306_v34  ;;  %v5991_v52 = vld [vmem:[#allocation3 + $0xdc] sm:$0xf0]  ;;  %v3198_v28 = vunpack.c.l.b16 %v7744_v36 }
 0x414   : > { %v2625_v42 = vrot.slane %v2622_v3, 4  ;;  %v5286_v14 = vld [vmem:[#allocation3 + $0xc0] sm:$0xf] }
 0x415   : > { %v2602_v17 = vsel %vm438_vm0, %v2598_v43, %v2599_v62  ;;  %v2604_v25 = vsel %vm572_vm7, %v2596_v29, %v2599_v62  ;;  %v2782_v55 = vsel %vm438_vm0, %v2779_v9, %v2780_v22  ;;  %v5288_v29 = vld [vmem:[#allocation3 + $0xe0] sm:$0xf0] }
 0x416   : > { %v2603_v57 = vsel %vm572_vm7, %v7716_v47, %v2602_v17  ;;  %2610 = vst [vmem:[#allocation3 + $0x190] sm:$0xf] %v2604_v25  ;;  %v2783_v45 = vsel %vm2542_vm5, %v7692_v53, %v2782_v55  ;;  %v2628_v43 = vsel %vm438_vm0, %v2624_v32, %v2625_v42  ;;  %v2630_v21 = vsel %vm2383_vm4, %v2622_v3, %v2625_v42  ;;  %v6031_v44 = vld [vmem:[#allocation3 + $0x2dc] sm:$0xf0]  ;;  %v5448_v47 = vld [vmem:[#allocation3 + $0x2e0] sm:$0xf0] }
 0x417   : > { %2609 = vst [vmem:[#allocation3 + $0x188] sm:$0xff] %v2603_v57  ;;  %v2629_v0 = vsel %vm2383_vm4, %v7670_v27, %v2628_v43  ;;  %3346 = vmatpush.bf16.msra.mxu3 %v5327_v35  ;;  %3374 = vmatpush.bf16.msra.mxu2 %v5331_v1  ;;  %v5447_v58 = vor.u32 %v6031_v44, %v5446_v41  ;;  %v5308_v53 = vld [vmem:[#allocation3 + $0x120] sm:$0xf0] }
 0x418   : > { %2790 = vst [vmem:[#allocation3 + $0x260] sm:$0xff] %v2783_v45  ;;  %v5451_v48 = vor.u32 %v6029_v13, %v5448_v47  ;;  %v5311_v32 = vor.u32 %v5994_v37, %v5308_v53  ;;  %v5287_v35 = vor.u32 %v5991_v52, %v5286_v14  ;;  %v5291_v1 = vor.u32 %v5989_v51, %v5288_v29  ;;  %v5986_v45 = vld [vmem:[#allocation3 + $0x9c] sm:$0xf0]  ;;  %v5268_v43 = vld [vmem:[#allocation3 + $0xa0] sm:$0xf0] }
 0x419   : > { %2635 = vst [vmem:[#allocation3 + $0x1a8] sm:$0xff] %v2629_v0  ;;  %3362 = vmatpush.bf16.msra.mxu1 %v5447_v58  ;;  %v5266_v13 = vld [vmem:[#allocation3 + $0x80] sm:$0xf]  ;;  %v3199_v58 = vunpack.c.h.b16 %v7744_v36  ;;  %v3263_v51 = vpack.c.b16 %v3198_v28, %v3198_v28 }
 0x41a   : > { %2636 = vst [vmem:[#allocation3 + $0x1b0] sm:$0xf] %v2630_v21  ;;  %3390 = vmatpush.bf16.msra.mxu0 %v5451_v48  ;;  %v7770_v39 = vpop.permute.xlu0 %2807  ;;  %v2510_v27 = vpop.permute.xlu2 %2509  ;;  %v5246_v0 = vld [vmem:[#allocation3 + $0x40] sm:$0xf]  ;;  %v5267_v21 = vor.u32 %v5986_v45, %v5266_v13  ;;  %v2753_v48 = vrot.slane %v7688_v4, 4 }
 0x41b   : > { %3347 = vmatpush.bf16.msra.mxu3 %v5307_v11  ;;  %3375 = vmatpush.bf16.msra.mxu2 %v5311_v32  ;;  %v2812_v9 = vrot.slane %v7770_v39, 4  ;;  %v2513_v62 = vrot.slane %v2510_v27, 4  ;;  %v2570_v3 = vpop.permute.xlu1 %2569  ;;  %v5981_v47 = vld [vmem:[#allocation3 + $0x5c] sm:$0xf0]  ;;  %v2701_v11 = vrot.slane %v7698_v2, 4  ;;  %v3336_v28 = vsel %vm438_vm0, %v3263_v51, 0 }
 0x41c   : > { %v2573_v42 = vrot.slane %v2570_v3, 4  ;;  %v5976_v14 = vld [vmem:[#allocation3 + $0x1c] sm:$0xf0]  ;;  %v5974_v13 = vld [vmem:[#allocation3 + $0x4] sm:$0xf] }
 0x41d   : > { %v2814_v17 = vsel %vm438_vm0, %v2811_v7, %v2812_v9  ;;  %v2517_v25 = vsel %vm438_vm0, %v2512_v61, %v2513_v62  ;;  %v2519_v55 = vsel %vm2515_vm6, %v2510_v27, %v2513_v62  ;;  %v5247_v7 = vor.u32 %v5981_v47, %v5246_v0 }
 0x41e   : > { %v2815_v34 = vsel %vm500_vm11, %v7672_v26, %v2814_v17  ;;  %v2518_v37 = vsel %vm2515_vm6, %v7605_v38, %v2517_v25  ;;  %2525 = vst [vmem:[#allocation3 + $0x110] sm:$0xf] %v2519_v55  ;;  %v2576_v57 = vsel %vm438_vm0, %v2572_v31, %v2573_v42  ;;  %v2578_v41 = vsel %vm500_vm11, %v2570_v3, %v2573_v42  ;;  %v5984_v26 = vld [vmem:[#allocation3 + $0x84] sm:$0xf]  ;;  %v5426_v42 = vld [vmem:[#allocation3 + $0x280] sm:$0xf] }
 0x41f   : > { %2822 = vst [vmem:[#allocation3 + $0x2a0] sm:$0xff] %v2815_v34  ;;  %v2577_v61 = vsel %vm500_vm11, %v7710_v30, %v2576_v57  ;;  %3348 = vmatpush.bf16.msra.mxu3 %v5287_v35  ;;  %3376 = vmatpush.bf16.msra.mxu2 %v5291_v1  ;;  %v5979_v38 = vld [vmem:[#allocation3 + $0x44] sm:$0xf]  ;;  %v5271_v44 = vor.u32 %v5984_v26, %v5268_v43 }
 0x420   : > { %2524 = vst [vmem:[#allocation3 + $0x108] sm:$0xff] %v2518_v37  ;;  %v5248_v31 = vld [vmem:[#allocation3 + $0x60] sm:$0xf0]  ;;  %v3264_v17 = vpack.c.b16 %v3199_v58, %v3199_v58 }
 0x421   : > { %2583 = vst [vmem:[#allocation3 + $0x168] sm:$0xff] %v2577_v61  ;;  %v5251_v62 = vor.u32 %v5979_v38, %v5248_v31  ;;  %v6024_v35 = vld [vmem:[#allocation3 + $0x284] sm:$0xf] }
 0x422   : > { %2584 = vst [vmem:[#allocation3 + $0x170] sm:$0xf] %v2578_v41  ;;  %v7793_v30 = vpop.permute.xlu0 %2749  ;;  %v7795_v53 = vpop.permute.xlu2 %2697  ;;  %v5228_v57 = vld [vmem:[#allocation3 + $0x20] sm:$0xf0]  ;;  %v5226_v41 = vld [vmem:[#allocation3] sm:$0xf] }
 0x423   : > { %3349 = vmatpush.bf16.msra.mxu3 %v5267_v21  ;;  %3377 = vmatpush.bf16.msra.mxu2 %v5271_v44  ;;  %v2754_v32 = vrot.slane %v7793_v30, 4  ;;  %v2702_v52 = vrot.slane %v7795_v53, 4  ;;  %v2862_v27 = vpop.permute.xlu1 %2861  ;;  %v5227_v26 = vor.u32 %v5976_v14, %v5226_v41  ;;  %v5231_v0 = vor.u32 %v5974_v13, %v5228_v57 }
 0x424   : > { %v2865_v29 = vrot.slane %v2862_v27, 4  ;;  %v3339_v58 = vsel %vm438_vm0, %v3264_v17, 0 }
 0x425   : > { %v2756_v36 = vsel %vm438_vm0, %v2753_v48, %v2754_v32  ;;  %v2704_v3 = vsel %vm438_vm0, %v2701_v11, %v2702_v52  ;;  %v2727_v48 = vrot.slane %v7629_v50, 4 }
 0x426   : > { %v2757_v25 = vsel %vm2515_vm6, %v7688_v4, %v2756_v36  ;;  %v2705_v55 = vsel %vm8502_vm10, %v7698_v2, %v2704_v3  ;;  %v2868_v1 = vsel %vm438_vm0, %v2864_v20, %v2865_v29  ;;  %v2870_v34 = vsel %vm2383_vm4, %v2862_v27, %v2865_v29  ;;  %v6026_v37 = vld [vmem:[#allocation3 + $0x29c] sm:$0xf0]  ;;  %v5428_v45 = vld [vmem:[#allocation3 + $0x2a0] sm:$0xf0]  ;;  %v5218_v2 = vld [vmem:[%s8378_s3] sm:$0xf] }
 0x427   : > { %2764 = vst [vmem:[#allocation3 + $0x240] sm:$0xff] %v2757_v25  ;;  %v2869_v43 = vsel %vm2383_vm4, %v7733_v15, %v2868_v1  ;;  %3350 = vmatpush.bf16.msra.mxu3 %v5247_v7  ;;  %3378 = vmatpush.bf16.msra.mxu2 %v5251_v62  ;;  %v5427_v61 = vor.u32 %v6026_v37, %v5426_v42  ;;  %v5973_v20 = vld [vmem:[%s8378_s3 + $0x4] sm:$0xf0]  ;;  %v6021_v36 = vld [vmem:[#allocation3 + $0x25c] sm:$0xf0] }
 0x428   : > { %v5431_v4 = vor.u32 %v6024_v35, %v5428_v45  ;;  %2712 = vst [vmem:[#allocation3 + $0x200] sm:$0xff] %v2705_v55  ;;  %v7823_v21 = vor.u32 %v5973_v20, %v5218_v2  ;;  %v5408_v3 = vld [vmem:[#allocation3 + $0x260] sm:$0xf0] }
 0x429   : > { %2875 = vst [vmem:[#allocation3 + $0x2e8] sm:$0xff] %v2869_v43  ;;  %3363 = vmatpush.bf16.msra.mxu1 %v5427_v61 }
 0x42a   : > { %3391 = vmatpush.bf16.msra.mxu0 %v5431_v4  ;;  %2876 = vst [vmem:[#allocation3 + $0x2f0] sm:$0xf] %v2870_v34  ;;  %v2836_v15 = vpop.permute.xlu0 %2835  ;;  %v2810_v38 = vpop.permute.xlu2 %2809 }
 0x42b   : > { %3351 = vmatpush.bf16.msra.mxu3 %v5227_v26  ;;  %3379 = vmatpush.bf16.msra.mxu2 %v5231_v0  ;;  %v2839_v44 = vrot.slane %v2836_v15, 4  ;;  %v2813_v47 = vrot.slane %v2810_v38, 4  ;;  %v7825_v31 = vpop.permute.xlu1 %2723  ;;  %v6012_v0 = vld [vmem:[#allocation3 + $0x1e4] sm:$0xf0] }
 0x42c   : > { %v2728_v11 = vrot.slane %v7825_v31, 4 }
 0x42d   : > { %v2842_v27 = vsel %vm438_vm0, %v2838_v23, %v2839_v44  ;;  %v2844_v29 = vsel %vm572_vm7, %v2836_v15, %v2839_v44  ;;  %v2816_v7 = vsel %vm438_vm0, %v2812_v9, %v2813_v47  ;;  %v2818_v62 = vsel %vm500_vm11, %v2810_v38, %v2813_v47 }
 0x42e   : > { %v2843_v14 = vsel %vm572_vm7, %v7708_v59, %v2842_v27  ;;  %2850 = vst [vmem:[#allocation3 + $0x2d0] sm:$0xf] %v2844_v29  ;;  %v2817_v42 = vsel %vm500_vm11, %v7770_v39, %v2816_v7  ;;  %v2730_v23 = vsel %vm438_vm0, %v2727_v48, %v2728_v11  ;;  %3352 = vmatmul.bf16.vlgmr.msra.gmra.mxu3 %v7823_v21  ;;  %v5406_v9 = vld [vmem:[#allocation3 + $0x240] sm:$0xf]  ;;  %v6019_v35 = vld [vmem:[#allocation3 + $0x244] sm:$0xf] }
 0x42f   : > { %3417 = vmatpush.bf16.msrb.mxu3 %v3336_v28  ;;  %3445 = vmatpush.bf16.msrb.mxu2 %v3339_v58  ;;  %2849 = vst [vmem:[#allocation3 + $0x2c8] sm:$0xff] %v2843_v14  ;;  %v2731_v51 = vsel %vm8503_vm15, %v7629_v50, %v2730_v23  ;;  %v5407_v17 = vor.u32 %v6021_v36, %v5406_v9  ;;  %v2981_v39 = vld [vmem:[%s8379_s4 + $0x8] sm:$0xff]  ;;  %v5386_v15 = vld [vmem:[#allocation3 + $0x200] sm:$0xf] }
 0x430   : > { %3380 = vmatmul.bf16.vlgmr.msra.gmra.mxu2 %v7823_v21  ;;  %v5411_v59 = vor.u32 %v6019_v35, %v5408_v3  ;;  %2823 = vst [vmem:[#allocation3 + $0x2a8] sm:$0xff] %v2817_v42  ;;  %2989 = vperm.xlu0 %6221, %v2981_v39   ;;  %v6032_v61 = vld [vmem:[#allocation3 + $0x2e4] sm:$0xf0]  ;;  %v5456_v4 = vld [vmem:[#allocation3 + $0x2e8] sm:$0xf0] }
 0x431   : > { %2824 = vst [vmem:[#allocation3 + $0x2b0] sm:$0xf] %v2818_v62  ;;  %3364 = vmatpush.bf16.msra.mxu1 %v5407_v17  ;;  %v6014_v38 = vld [vmem:[#allocation3 + $0x204] sm:$0xf]  ;;  %v5434_v7 = vld [vmem:[#allocation3 + $0x288] sm:$0xf] }
 0x432   : > { %3392 = vmatpush.bf16.msra.mxu0 %v5411_v59  ;;  %2738 = vst [vmem:[#allocation3 + $0x220] sm:$0xff] %v2731_v51  ;;  %v2537_v25 = vpop.permute.xlu0 %2536  ;;  %v2752_v55 = vpop.permute.xlu2 %2751  ;;  %v5374_v14 = vld [vmem:[#allocation3 + $0x1c8] sm:$0xf]  ;;  %v6025_v42 = vld [vmem:[#allocation3 + $0x28c] sm:$0xf] }
 0x433   : > { %v2540_v1 = vrot.slane %v2537_v25, 4  ;;  %v2755_v34 = vrot.slane %v2752_v55, 4  ;;  %v2484_v37 = vpop.permute.xlu1 %2483  ;;  %v5375_v35 = vor.u32 %v6012_v0, %v5374_v14  ;;  %v6010_v51 = vld [vmem:[#allocation3 + $0x1cc] sm:$0xf] }
 0x434   : > { %v2487_v57 = vrot.slane %v2484_v37, 4 }
 0x435   : > { %v2544_v50 = vsel %vm438_vm0, %v2539_v24, %v2540_v1  ;;  %v2546_v45 = vsel %vm2542_vm5, %v2537_v25, %v2540_v1  ;;  %v2758_v43 = vsel %vm438_vm0, %v2754_v32, %v2755_v34  ;;  %v2760_v41 = vsel %vm2515_vm6, %v2752_v55, %v2755_v34  ;;  %v5972_v32 = vld [vmem:[%s8378_s3 + $0x4] sm:$0xf]  ;;  %v5354_v34 = vld [vmem:[#allocation3 + $0x188] sm:$0xf] }
 0x436   : > { %v2545_v2 = vsel %vm2542_vm5, %v7577_v46, %v2544_v50  ;;  %2552 = vst [vmem:[#allocation3 + $0x130] sm:$0xf] %v2546_v45  ;;  %v2759_v20 = vsel %vm2515_vm6, %v7793_v30, %v2758_v43  ;;  %v2490_v24 = vsel %vm438_vm0, %v2486_v18, %v2487_v57  ;;  %v5454_v13 = vld [vmem:[#allocation3 + $0x2c8] sm:$0xf]  ;;  %v6030_v26 = vld [vmem:[#allocation3 + $0x2cc] sm:$0xf]  ;;  %vm8505_vm6 = vmmov %vm8498_vm8 }
 0x437   : > { %v5220_v46 = vld [vmem:[%s8378_s3 + $0x8] sm:$0xf0]  ;;  %2551 = vst [vmem:[#allocation3 + $0x128] sm:$0xff] %v2545_v2  ;;  %v2491_v30 = vsel %vm8504_vm14, %v7633_v63, %v2490_v24  ;;  %v5455_v44 = vor.u32 %v6032_v61, %v5454_v13  ;;  %v5459_v47 = vor.u32 %v6030_v26, %v5456_v4  ;;  %v5376_v18 = vld [vmem:[#allocation3 + $0x1e8] sm:$0xf0]  ;;  %v2492_v28 = vsel %vm8505_vm6, %v2484_v37, %v2487_v57  ;;  %vm8506_vm8 = vmmov %vm8502_vm10 }
 0x438   : > { %2765 = vst [vmem:[#allocation3 + $0x248] sm:$0xff] %v2759_v20  ;;  %v6027_v58 = vld [vmem:[#allocation3 + $0x2a4] sm:$0xf0]  ;;  %v5436_v48 = vld [vmem:[#allocation3 + $0x2a8] sm:$0xf0]  ;;  %v7877_v59 = vor.u32 %v5972_v32, %v5220_v46  ;;  %v5379_v39 = vor.u32 %v6010_v51, %v5376_v18  ;;  %vm8508_vm12 = vmmov %vm8506_vm8 }
 0x439   : > { %2766 = vst [vmem:[#allocation3 + $0x250] sm:$0xf] %v2760_v41  ;;  %v6016_v27 = vld [vmem:[#allocation3 + $0x21c] sm:$0xf0]  ;;  %v5388_v29 = vld [vmem:[#allocation3 + $0x220] sm:$0xf0]  ;;  %3418 = vmatpush.bf16.msrb.mxu3 %v5455_v44  ;;  %3446 = vmatpush.bf16.msrb.mxu2 %v5459_v47  ;;  %v5435_v55 = vor.u32 %v6027_v58, %v5434_v7  ;;  %v5439_v1 = vor.u32 %v6025_v42, %v5436_v48 }
 0x43a   : > { %2497 = vst [vmem:[#allocation3 + $0xe8] sm:$0xff] %v2491_v30  ;;  %v5387_v62 = vor.u32 %v6016_v27, %v5386_v15  ;;  %v5391_v36 = vor.u32 %v6014_v38, %v5388_v29  ;;  %v2458_v63 = vpop.permute.xlu0 %2457  ;;  %v2432_v3 = vpop.permute.xlu2 %2431  ;;  %v6007_v37 = vld [vmem:[#allocation3 + $0x1a4] sm:$0xf0]  ;;  %v6005_v61 = vld [vmem:[#allocation3 + $0x18c] sm:$0xf] }
 0x43b   : > { %2498 = vst [vmem:[#allocation3 + $0xf0] sm:$0xf] %v2492_v28  ;;  %v2461_v23 = vrot.slane %v2458_v63, 4  ;;  %v2435_v9 = vrot.slane %v2432_v3, 4  ;;  %v2405_v17 = vpop.permute.xlu1 %2404  ;;  %v5356_v4 = vld [vmem:[#allocation3 + $0x1a8] sm:$0xf0] }
 0x43c   : > { %3365 = vmatpush.bf16.msra.mxu1 %v5387_v62  ;;  %3393 = vmatpush.bf16.msra.mxu0 %v5391_v36  ;;  %v2408_v25 = vrot.slane %v2405_v17, 4  ;;  %v5359_v41 = vor.u32 %v6005_v61, %v5356_v4  ;;  %v6002_v24 = vld [vmem:[#allocation3 + $0x164] sm:$0xf0]  ;;  %v6000_v30 = vld [vmem:[#allocation3 + $0x14c] sm:$0xf] }
 0x43d   : > { %v2464_v57 = vsel %vm438_vm0, %v2460_v16, %v2461_v23  ;;  %v2466_v50 = vsel %vm8506_vm8, %v2458_v63, %v2461_v23  ;;  %v2438_v45 = vsel %vm438_vm0, %v2434_v54, %v2435_v9  ;;  %v2440_v43 = vsel %vm8507_vm13, %v2432_v3, %v2435_v9  ;;  %3419 = vmatpush.bf16.msrb.mxu3 %v5435_v55  ;;  %v5334_v26 = vld [vmem:[#allocation3 + $0x148] sm:$0xf]  ;;  %v5995_v3 = vld [vmem:[#allocation3 + $0x10c] sm:$0xf] }
 0x43e   : > { %v2465_v2 = vsel %vm8508_vm12, %v7550_v60, %v2464_v57  ;;  %2472 = vst [vmem:[#allocation3 + $0xd0] sm:$0xf] %v2466_v50  ;;  %v2439_v20 = vsel %vm8509_vm9, %v7651_v33, %v2438_v45  ;;  %v2412_v16 = vsel %vm438_vm0, %v2407_v5, %v2408_v25  ;;  %v5355_v60 = vor.u32 %v6007_v37, %v5354_v34  ;;  %v5336_v5 = vld [vmem:[#allocation3 + $0x168] sm:$0xf0]  ;;  %v5997_v47 = vld [vmem:[#allocation3 + $0x124] sm:$0xf0] }
 0x43f   : > { %2471 = vst [vmem:[#allocation3 + $0xc8] sm:$0xff] %v2465_v2  ;;  %v2413_v54 = vsel %vm2410_vm2, %v7579_v40, %v2412_v16  ;;  %5464 = vmatmul.msk.bf16.vlgmr.msra.gmra.mxu1 %vm1942_vm3, %v7877_v59  ;;  %5465 = vmatmul.msk.bf16.vlgmr.msra.gmra.mxu0 %vm1942_vm3, %v7877_v59  ;;  %v2414_v33 = vsel %vm2410_vm2, %v2405_v17, %v2408_v25  ;;  %v5316_v27 = vld [vmem:[#allocation3 + $0x128] sm:$0xf0]  ;;  %v5314_v62 = vld [vmem:[#allocation3 + $0x108] sm:$0xf]  ;;  %vm8510_vm2 = vmmov %vm8505_vm6 }
 0x440   : > { %3400 = vmatpush.bf16.msrb.mxu1 %v5375_v35  ;;  %3428 = vmatpush.bf16.msrb.mxu0 %v5379_v39  ;;  %2445 = vst [vmem:[#allocation3 + $0xa8] sm:$0xff] %v2439_v20  ;;  %v5335_v46 = vor.u32 %v6002_v24, %v5334_v26  ;;  %v5339_v38 = vor.u32 %v6000_v30, %v5336_v5  ;;  %v5414_v55 = vld [vmem:[#allocation3 + $0x248] sm:$0xf]  ;;  %v6020_v50 = vld [vmem:[#allocation3 + $0x24c] sm:$0xf] }
 0x441   : > { %3447 = vmatpush.bf16.msrb.mxu2 %v5439_v1  ;;  %2446 = vst [vmem:[#allocation3 + $0xb0] sm:$0xf] %v2440_v43  ;;  %v5315_v63 = vor.u32 %v5997_v47, %v5314_v62  ;;  %v5319_v42 = vor.u32 %v5995_v3, %v5316_v27  ;;  %v5992_v23 = vld [vmem:[#allocation3 + $0xe4] sm:$0xf0]  ;;  %v5296_v9 = vld [vmem:[#allocation3 + $0xe8] sm:$0xf0] }
 0x442   : > { %2419 = vst [vmem:[#allocation3 + $0x88] sm:$0xff] %v2413_v54  ;;  %v2778_v13 = vpop.permute.xlu0 %2777  ;;  %v2352_v40 = vpop.permute.xlu2 %2351  ;;  %v6013_v5 = vld [vmem:[#allocation3 + $0x1ec] sm:$0xf0]  ;;  %v5234_v3 = vld [vmem:[#allocation3 + $0x8] sm:$0xf] }
 0x443   : > { %2420 = vst [vmem:[#allocation3 + $0x90] sm:$0xf] %v2414_v33  ;;  %v2781_v0 = vrot.slane %v2778_v13, 4  ;;  %v2355_v32 = vrot.slane %v2352_v40, 4  ;;  %v2726_v15 = vpop.permute.xlu1 %2725  ;;  %v6003_v47 = vld [vmem:[#allocation3 + $0x16c] sm:$0xf0] }
 0x444   : > { %3401 = vmatpush.bf16.msrb.mxu1 %v5355_v60  ;;  %3429 = vmatpush.bf16.msrb.mxu0 %v5359_v41  ;;  %v2729_v44 = vrot.slane %v2726_v15, 4 }
 0x445   : > { %v2784_v18 = vsel %vm438_vm0, %v2780_v22, %v2781_v0  ;;  %v2786_v28 = vsel %vm2542_vm5, %v2778_v13, %v2781_v0  ;;  %v2358_v58 = vsel %vm438_vm0, %v2354_v10, %v2355_v32  ;;  %v2360_v48 = vsel %vm572_vm7, %v2352_v40, %v2355_v32 }
 0x446   : > { %v2785_v29 = vsel %vm2542_vm5, %v7751_v19, %v2784_v18  ;;  %2792 = vst [vmem:[#allocation3 + $0x270] sm:$0xf] %v2786_v28  ;;  %v2359_v7 = vsel %vm572_vm7, %v7599_v12, %v2358_v58  ;;  %v2732_v22 = vsel %vm438_vm0, %v2728_v11, %v2729_v44  ;;  %v5294_v36 = vld [vmem:[#allocation3 + $0xc8] sm:$0xf]  ;;  %v5990_v14 = vld [vmem:[#allocation3 + $0xcc] sm:$0xf]  ;;  %vm8511_vm5 = vmmov %vm8510_vm2 }
 0x447   : > { %2791 = vst [vmem:[#allocation3 + $0x268] sm:$0xff] %v2785_v29  ;;  %v2733_v10 = vsel %vm8510_vm2, %v7825_v31, %v2732_v22  ;;  %v2734_v19 = vsel %vm8511_vm5, %v2726_v15, %v2729_v44  ;;  %v5295_v12 = vor.u32 %v5992_v23, %v5294_v36  ;;  %v5299_v35 = vor.u32 %v5990_v14, %v5296_v9  ;;  %v5987_v25 = vld [vmem:[#allocation3 + $0xa4] sm:$0xf0]  ;;  %vm8512_vm7 = vmmov %vm8506_vm8  ;;  %v5276_v57 = vld [vmem:[#allocation3 + $0xa8] sm:$0xf0] }
 0x448   : > { %3402 = vmatpush.bf16.msrb.mxu1 %v5335_v46  ;;  %3430 = vmatpush.bf16.msrb.mxu0 %v5339_v38  ;;  %2365 = vst [vmem:[#allocation3 + $0x48] sm:$0xff] %v2359_v7  ;;  %vm8513_vm1 = vmmov %vm8512_vm7  ;;  %v5382_v46 = vld [vmem:[#allocation3 + $0x1d0] sm:$0xf]  ;;  %v5975_v14 = vld [vmem:[#allocation3 + $0xc] sm:$0xf]  ;;  %vm8522_vm8 = vcmask 261120  }
 0x449   : > { %2366 = vst [vmem:[#allocation3 + $0x50] sm:$0xf] %v2360_v48  ;;  %v5274_v39 = vld [vmem:[#allocation3 + $0x88] sm:$0xf]  ;;  %v5985_v37 = vld [vmem:[#allocation3 + $0x8c] sm:$0xf]  ;;  %v5383_v30 = vor.u32 %v6013_v5, %v5382_v46  ;;  %vm8523_vm13 = vmmov %vm8522_vm8 }
 0x44a   : > { %2739 = vst [vmem:[#allocation3 + $0x228] sm:$0xff] %v2733_v10  ;;  %v2700_v11 = vpop.permute.xlu0 %2699  ;;  %v5275_v20 = vor.u32 %v5987_v25, %v5274_v39  ;;  %v5279_v60 = vor.u32 %v5985_v37, %v5276_v57  ;;  %v5362_v15 = vld [vmem:[#allocation3 + $0x190] sm:$0xf]  ;;  %vm8524_vm12 = vmmov %vm8522_vm8 }
 0x44b   : > { %2740 = vst [vmem:[#allocation3 + $0x230] sm:$0xf] %v2734_v19  ;;  %v2703_v51 = vrot.slane %v2700_v11, 4  ;;  %v2326_v17 = vpop.permute.xlu1 %2325  ;;  %v2979_v38 = vld [vmem:[#allocation3 + $0x310] sm:$0xf]  ;;  %vm8526_vm2 = vmmov %vm8522_vm8 }
 0x44c   : > { %3403 = vmatpush.bf16.msrb.mxu1 %v5315_v63  ;;  %3431 = vmatpush.bf16.msrb.mxu0 %v5319_v42  ;;  %v2329_v31 = vrot.slane %v2326_v17, 4  ;;  %v3200_v18 = vunpack.c.l.b16 %v2979_v38  ;;  %v5342_v7 = vld [vmem:[#allocation3 + $0x150] sm:$0xf]  ;;  %vm8527_vm5 = vmmov %vm8526_vm2 }
 0x44d   : > { %v2706_v1 = vsel %vm438_vm0, %v2702_v52, %v2703_v51  ;;  %v2708_v34 = vsel %vm8512_vm7, %v2700_v11, %v2703_v51  ;;  %v5343_v22 = vor.u32 %v6003_v47, %v5342_v7  ;;  %v5998_v10 = vld [vmem:[#allocation3 + $0x12c] sm:$0xf0]  ;;  %vm8528_vm7 = vmmov %vm8526_vm2 }
 0x44e   : > { %v2707_v45 = vsel %vm8513_vm1, %v7795_v53, %v2706_v1  ;;  %2714 = vst [vmem:[#allocation3 + $0x210] sm:$0xf] %v2708_v34  ;;  %v2332_v43 = vsel %vm438_vm0, %v2328_v49, %v2329_v31  ;;  %v2334_v61 = vsel %vm500_vm11, %v2326_v17, %v2329_v31  ;;  %v6022_v4 = vld [vmem:[#allocation3 + $0x264] sm:$0xf0]  ;;  %v5416_v2 = vld [vmem:[#allocation3 + $0x268] sm:$0xf0]  ;;  %v3265_v63 = vpack.c.b16 %v3200_v18, %v3200_v18  ;;  %vm8529_vm1 = vmmov %vm8526_vm2 }
 0x44f   : > { %2713 = vst [vmem:[#allocation3 + $0x208] sm:$0xff] %v2707_v45  ;;  %v2333_v52 = vsel %vm500_vm11, %v7646_v8, %v2332_v43  ;;  %v5415_v16 = vor.u32 %v6022_v4, %v5414_v55  ;;  %v5419_v54 = vor.u32 %v6020_v50, %v5416_v2  ;;  %v5980_v58 = vld [vmem:[#allocation3 + $0x4c] sm:$0xf]  ;;  %v5322_v23 = vld [vmem:[#allocation3 + $0x110] sm:$0xf] }
 0x450   : > { %3404 = vmatpush.bf16.msrb.mxu1 %v5295_v12  ;;  %3432 = vmatpush.bf16.msrb.mxu0 %v5299_v35  ;;  %2339 = vst [vmem:[#allocation3 + $0x28] sm:$0xff] %v2333_v52  ;;  %v5323_v12 = vor.u32 %v5998_v10, %v5322_v23  ;;  %v3342_v9 = vsel %vm438_vm0, %v3265_v63, 0  ;;  %v5302_v11 = vld [vmem:[#allocation3 + $0xd0] sm:$0xf] }
 0x451   : > { %2340 = vst [vmem:[#allocation3 + $0x30] sm:$0xf] %v2334_v61  ;;  %3420 = vmatpush.bf16.msrb.mxu3 %v5415_v16  ;;  %3448 = vmatpush.bf16.msrb.mxu2 %v5419_v54  ;;  %v6017_v24 = vld [vmem:[#allocation3 + $0x224] sm:$0xf0]  ;;  %v5396_v8 = vld [vmem:[#allocation3 + $0x228] sm:$0xf0] }
 0x452   : > { %v2378_v53 = vpop.permute.xlu0 %2377  ;;  %v5462_v35 = vld [vmem:[#allocation3 + $0x2d0] sm:$0xf] }
 0x453   : > { %v2381_v49 = vrot.slane %v2378_v53, 4  ;;  %v5993_v51 = vld [vmem:[#allocation3 + $0xec] sm:$0xf0] }
 0x454   : > { %3405 = vmatpush.bf16.msrb.mxu1 %v5275_v20  ;;  %3433 = vmatpush.bf16.msrb.mxu0 %v5279_v60  ;;  %v6033_v17 = vld [vmem:[#allocation3 + $0x2ec] sm:$0xf0]  ;;  %v5303_v31 = vor.u32 %v5993_v51, %v5302_v11 }
 0x455   : > { %v2385_v33 = vsel %vm438_vm0, %v2380_v56, %v2381_v49  ;;  %v2387_v41 = vsel %vm2383_vm4, %v2378_v53, %v2381_v49  ;;  %v6008_v56 = vld [vmem:[#allocation3 + $0x1ac] sm:$0xf0]  ;;  %v5463_v39 = vor.u32 %v6033_v17, %v5462_v35  ;;  %vm8514_vm0 = vmmov %vm8509_vm9 }
 0x456   : > { %v2386_v13 = vsel %vm2383_vm4, %v7601_v6, %v2385_v33  ;;  %2393 = vst [vmem:[#allocation3 + $0x70] sm:$0xf] %v2387_v41  ;;  %v5394_v40 = vld [vmem:[#allocation3 + $0x208] sm:$0xf]  ;;  %v6015_v26 = vld [vmem:[#allocation3 + $0x20c] sm:$0xf]  ;;  %v5363_v44 = vor.u32 %v6008_v56, %v5362_v15  ;;  %v2985_v41 = vpop.permute.xlu2 %2984  ;;  %vm8517_vm4 = vmmov %vm8514_vm0 }
 0x457   : > { %2392 = vst [vmem:[#allocation3 + $0x68] sm:$0xff] %v2386_v13  ;;  %v5395_v0 = vor.u32 %v6017_v24, %v5394_v40  ;;  %v5399_v32 = vor.u32 %v6015_v26, %v5396_v8  ;;  %v5254_v6 = vld [vmem:[#allocation3 + $0x48] sm:$0xf]  ;;  %v5236_v36 = vld [vmem:[#allocation3 + $0x28] sm:$0xf0]  ;;  %vm8518_vm10 = vmmov %vm8514_vm0 }
 0x458   : > { %v5977_v62 = vld [vmem:[#allocation3 + $0x24] sm:$0xf0]  ;;  %v5239_v42 = vor.u32 %v5975_v14, %v5236_v36  ;;  %v5282_v25 = vld [vmem:[#allocation3 + $0x90] sm:$0xf]  ;;  %vm8519_vm15 = vmmov %vm8514_vm0 }
 0x459   : > { %3421 = vmatpush.bf16.msrb.mxu3 %v5395_v0  ;;  %3449 = vmatpush.bf16.msrb.mxu2 %v5399_v32  ;;  %v5235_v19 = vor.u32 %v5977_v62, %v5234_v3  ;;  %v5988_v55 = vld [vmem:[#allocation3 + $0xac] sm:$0xf0]  ;;  %vm8520_vm14 = vmmov %vm8514_vm0 }
 0x45a   : > { %v6028_v1 = vld [vmem:[#allocation3 + $0x2ac] sm:$0xf0]  ;;  %v5283_v37 = vor.u32 %v5988_v55, %v5282_v25  ;;  %vm8521_vm6 = vmmov %vm8514_vm0 }
 0x45b   : > { %v5442_v34 = vld [vmem:[#allocation3 + $0x290] sm:$0xf]  ;;  %vm8525_vm9 = vmmov %vm8522_vm8 }
 0x45c   : > { %5466 = vmatmul.msk.bf16.vlgmr.msrb.gmra.mxu3 %vm1942_vm3, %v7877_v59  ;;  %5467 = vmatmul.msk.bf16.vlgmr.msrb.gmra.mxu2 %vm1942_vm3, %v7877_v59  ;;  %v5443_v57 = vor.u32 %v6028_v1, %v5442_v34  ;;  %v6023_v45 = vld [vmem:[#allocation3 + $0x26c] sm:$0xf0] }
 0x45d   : > { %3456 = vmatpush.bf16.msra.mxu3 %v5383_v30  ;;  %v5983_v50 = vld [vmem:[#allocation3 + $0x6c] sm:$0xf0] }
 0x45e   : > { %v5982_v28 = vld [vmem:[#allocation3 + $0x64] sm:$0xf0]  ;;  %v5256_v48 = vld [vmem:[#allocation3 + $0x68] sm:$0xf0]  ;;  %v5262_v43 = vld [vmem:[#allocation3 + $0x50] sm:$0xf] }
 0x45f   : > { %v5255_v27 = vor.u32 %v5982_v28, %v5254_v6  ;;  %v5259_v29 = vor.u32 %v5980_v58, %v5256_v48  ;;  %v5422_v61 = vld [vmem:[#allocation3 + $0x250] sm:$0xf]  ;;  %v5263_v4 = vor.u32 %v5983_v50, %v5262_v43 }
 0x460   : > { %v5423_v2 = vor.u32 %v6023_v45, %v5422_v61  ;;  %v5978_v52 = vld [vmem:[#allocation3 + $0x2c] sm:$0xf0] }
 0x461   : > { %3457 = vmatpush.bf16.msra.mxu3 %v5363_v44  ;;  %3406 = vmatpush.bf16.msrb.mxu1 %v5255_v27  ;;  %v5402_v20 = vld [vmem:[#allocation3 + $0x210] sm:$0xf] }
 0x462   : > { %3434 = vmatpush.bf16.msrb.mxu0 %v5259_v29  ;;  %v5242_v16 = vld [vmem:[#allocation3 + $0x10] sm:$0xf] }
 0x463   : > { %v6018_v54 = vld [vmem:[#allocation3 + $0x22c] sm:$0xf0]  ;;  %v5243_v60 = vor.u32 %v5978_v52, %v5242_v16 }
 0x464   : > { %v5403_v53 = vor.u32 %v6018_v54, %v5402_v20 }
 0x465   : > { %3458 = vmatpush.bf16.msra.mxu3 %v5343_v22  ;;  %3407 = vmatpush.bf16.msrb.mxu1 %v5235_v19 }
 0x466   : > { %3435 = vmatpush.bf16.msrb.mxu0 %v5239_v42 }
 0x468   : > { %3408 = vmatmul.bf16.vlgmr.msrb.gmra.mxu1 %v7823_v21 }
 0x469   : > { %3459 = vmatpush.bf16.msra.mxu3 %v5323_v12  ;;  %3473 = vmatpush.bf16.msra.mxu1 %v3342_v9 }
 0x46a   : > { %3436 = vmatmul.bf16.vlgmr.msrb.gmra.mxu0 %v7823_v21 }
 0x46d   : > { %3460 = vmatpush.bf16.msra.mxu3 %v5303_v31  ;;  %3474 = vmatpush.bf16.msra.mxu1 %v5463_v39 }
 0x471   : > { %3461 = vmatpush.bf16.msra.mxu3 %v5283_v37  ;;  %3475 = vmatpush.bf16.msra.mxu1 %v5443_v57 }
 0x475   : > { %3462 = vmatpush.bf16.msra.mxu3 %v5263_v4  ;;  %3476 = vmatpush.bf16.msra.mxu1 %v5423_v2 }
 0x479   : > { %3463 = vmatpush.bf16.msra.mxu3 %v5243_v60  ;;  %3477 = vmatpush.bf16.msra.mxu1 %v5403_v53 }
 0x47c   : > { %3464 = vmatmul.bf16.vlgmr.msra.gmra.mxu3 %v7823_v21  ;;  %5468 = vmatmul.msk.bf16.vlgmr.msra.gmra.mxu1 %vm1942_vm3, %v7877_v59  ;;  %vm8515_vm3 = vmmov %vm8514_vm0 }
 0x4a2   : > { %v2990_v0 = vpop.permute.xlu0 %2989 }
 0x4b1   : > { %v3353_v49 = vpop.f32.mrf.mxu3 }
 0x4b2   : > { %v3354_v24 = vadd.f32 %v3353_v49, %v2985_v41 }
 0x4b3   : > { %v3381_v33 = vpop.f32.mrf.mxu2 }
 0x4b4   : > { %v3382_v8 = vadd.f32 %v3381_v33, %v2985_v41 }
 0x4b9   : > { %v3355_v32 = vpop.f32.mrf.mxu3 }
 0x4ba   : > { %v3356_v30 = vadd.f32 %v3355_v32, %v2990_v0 }
 0x4bb   : > { %v3383_v46 = vpop.f32.mrf.mxu2 }
 0x4bc   : > { %v3367_v5 = vpop.f32.mrf.mxu1  ;;  %v3395_v13 = vpop.f32.mrf.mxu0  ;;  %v3384_v15 = vadd.f32 %v3383_v46, %v2990_v0 }
 0x4bd   : > { %v7947_v40 = vadd.f32 %v3367_v5, %v3354_v24  ;;  %v7949_v26 = vadd.f32 %v3395_v13, %v3382_v8 }
 0x4bf   : > { %v3484_v37 = vmax.f32 %v7947_v40, 0.0  ;;  %v3485_v57 = vmax.f32 %v7949_v26, 0.0 }
 0x4c1   : > { %v6237_v61 = vpack.i.bf16 %v3485_v57, %v3484_v37 }
 0x4c4   : > { %v3369_v21 = vpop.f32.mrf.mxu1  ;;  %v3397_v56 = vpop.f32.mrf.mxu0 }
 0x4c5   : > { %v7951_v38 = vadd.f32 %v3369_v21, %v3356_v30  ;;  %v7953_v59 = vadd.f32 %v3397_v56, %v3384_v15 }
 0x4c7   : > { %v3489_v44 = vmax.f32 %v7951_v38, 0.0  ;;  %v3490_v6 = vmax.f32 %v7953_v59, 0.0  ;;  %v6049_v38 = vld [vmem:[%s8380_s5 + $0x78] sm:$0xff] }
 0x4c8   : > { %3926 = vmatpush.bf16.msra.mxu0 %v6049_v38 }
 0x4c9   : > { %v6242_v47 = vpack.i.bf16 %v3490_v6, %v3489_v44 }
 0x4cb   : > { %6243 = vrot.lane.b32.xlu0 %v6242_v47, %s8460_s20 }
 0x4df   : > { %v3423_v27 = vpop.f32.mrf.mxu3  ;;  %v3451_v29 = vpop.f32.mrf.mxu2 }
 0x4e5   : > { %v3409_v18 = vpop.f32.mrf.mxu1 }
 0x4e6   : > { %v3410_v58 = vadd.f32 %v3409_v18, %v2985_v41 }
 0x4e7   : > { %v3437_v28 = vpop.f32.mrf.mxu0  ;;  %v3425_v3 = vpop.f32.mrf.mxu3 }
 0x4e8   : > { %v3438_v48 = vadd.f32 %v3437_v28, %v2985_v41  ;;  %v3424_v7 = vadd.f32 %v3423_v27, %v3410_v58  ;;  %v3453_v39 = vpop.f32.mrf.mxu2  ;;  %v6041_v58 = vld [vmem:[%s8380_s5 + $0x38] sm:$0xff] }
 0x4e9   : > { %3912 = vmatpush.bf16.msra.mxu2 %v6041_v58  ;;  %v6065_v27 = vld [vmem:[%s8380_s5 + $0xf8] sm:$0xff] }
 0x4ea   : > { %v3452_v22 = vadd.f32 %v3451_v29, %v3438_v48  ;;  %v3486_v62 = vmax.f32 %v3424_v7, 0.0  ;;  %v6040_v48 = vld [vmem:[%s8380_s5 + $0x30] sm:$0xff]  ;;  %3954 = vmatpush.bf16.msrb.mxu3 %v6065_v27 }
 0x4eb   : > { %v6048_v29 = vld [vmem:[%s8380_s5 + $0x70] sm:$0xff] }
 0x4ec   : > { %v3487_v36 = vmax.f32 %v3452_v22, 0.0  ;;  %v6064_v7 = vld [vmem:[%s8380_s5 + $0xf0] sm:$0xff]  ;;  %v6055_v22 = vld [vmem:[%s8380_s5 + $0xa8] sm:$0xff]  ;;  %3927 = vmatpush.bf16.msra.mxu0 %v6048_v29 }
 0x4ed   : > { %v3411_v63 = vpop.f32.mrf.mxu1  ;;  %3913 = vmatpush.bf16.msra.mxu2 %v6040_v48 }
 0x4ee   : > { %v6222_v10 = vpack.i.bf16 %v3487_v36, %v3486_v62  ;;  %v3412_v14 = vadd.f32 %v3411_v63, %v2990_v0  ;;  %3955 = vmatpush.bf16.msrb.mxu3 %v6064_v7  ;;  %v6054_v63 = vld [vmem:[%s8380_s5 + $0xa0] sm:$0xff] }
 0x4ef   : > { %v3439_v9 = vpop.f32.mrf.mxu0 }
 0x4f0   : > { %6223 = vrot.lane.b32.xlu1 %v6222_v10, %s8460_s20  ;;  %v7963_v23 = vadd.f32 %v3425_v3, %v3412_v14  ;;  %v3440_v51 = vadd.f32 %v3439_v9, %v2990_v0  ;;  %v6063_v10 = vld [vmem:[%s8380_s5 + $0xe8] sm:$0xff]  ;;  %v6038_v3 = vld [vmem:[%s8380_s5 + $0x20] sm:$0xff] }
 0x4f1   : > { %v6046_v14 = vld [vmem:[%s8380_s5 + $0x60] sm:$0xff] }
 0x4f2   : > { %v3491_v35 = vmax.f32 %v7963_v23, 0.0  ;;  %v7973_v55 = vadd.f32 %v3453_v39, %v3440_v51  ;;  %3956 = vmatpush.bf16.msrb.mxu3 %v6063_v10 }
 0x4f4   : > { %v3492_v45 = vmax.f32 %v7973_v55, 0.0  ;;  %v6037_v55 = vld [vmem:[%s8380_s5 + $0x18] sm:$0xff] }
 0x4f9   : > { %v3479_v19 = vpop.f32.mrf.mxu1 }
 0x4ff   : > { %v3465_v42 = vpop.f32.mrf.mxu3 }
 0x500   : > { %v3466_v12 = vadd.f32 %v3465_v42, %v2985_v41 }
 0x501   : > { %v3481_v34 = vpop.f32.mrf.mxu1 }
 0x502   : > { %v7965_v11 = vadd.f32 %v3479_v19, %v3466_v12  ;;  %v6053_v19 = vld [vmem:[%s8380_s5 + $0x98] sm:$0xff] }
 0x504   : > { %v3488_v17 = vmax.f32 %v7965_v11, 0.0  ;;  %v6062_v11 = vld [vmem:[%s8380_s5 + $0xe0] sm:$0xff] }
 0x505   : > { %3957 = vmatpush.bf16.msrb.mxu3 %v6062_v11  ;;  %v6085_v11 = vld [vmem:[%s8381_s6 + $0x88] sm:$0xff] }
 0x506   : > { %v6227_v31 = vpack.i.bf16 %v3491_v35, %v3488_v17 }
 0x507   : > { %v3467_v25 = vpop.f32.mrf.mxu3 }
 0x508   : > { %v3468_v1 = vadd.f32 %v3467_v25, %v2990_v0  ;;  %6228 = vrot.lane.b32.xlu2 %v6227_v31, %s8460_s20 }
 0x50a   : > { %v7978_v50 = vadd.f32 %v3481_v34, %v3468_v1 }
 0x50c   : > { %v3493_v43 = vmax.f32 %v7978_v50, 0.0  ;;  %v6044_v50 = vld [vmem:[%s8380_s5 + $0x50] sm:$0xff] }
 0x50e   : > { %v6232_v4 = vpack.i.bf16 %v3493_v43, %v3492_v45 }
 0x510   : > { %6233 = vrot.lane.b32.xlu1 %v6232_v4, %s8460_s20  ;;  %6238 = vrot.lane.b32.xlu2 %v6237_v61, %s8460_s20  ;;  %v6035_v61 = vld [vmem:[%s8380_s5 + $0x8] sm:$0xff]  ;;  %s405_s20 = scalar_lea.vmem [#allocation8], %s404_s24 }
 0x511   : > { %v6043_v4 = vld [vmem:[%s8380_s5 + $0x48] sm:$0xff]  ;;  %s4762_s23 = sshll.u32 %s405_s20, 4  ;;  %s4763_s23 = int_to_ptr.vmem [resolvable:$true] %s4762_s23 }
 0x53d   : > { %v6244_v60 = vpop.permute.xlu0 %6243 }
 0x53e   : > { %v6246_v8 = vunpack.i.h.bf16 %v6244_v60  ;;  %v6245_v5 = vunpack.i.l.bf16 %v6244_v60  ;;  %v6059_v60 = vld [vmem:[%s8380_s5 + $0xc8] sm:$0xff] }
 0x540   : > { %v3549_v46 = vsel %vm500_vm11, %v6245_v5, %v6246_v8 }
 0x541   : > { %v8017_v18 = vmax.f32 %v3489_v44, %v3549_v46  ;;  %v6056_v44 = vld [vmem:[%s8380_s5 + $0xb0] sm:$0xff] }
 0x562   : > { %v7988_v2 = vpop.permute.xlu2 %6228  ;;  %v6224_v20 = vpop.permute.xlu1 %6223 }
 0x563   : > { %v6230_v52 = vunpack.i.l.bf16 %v7988_v2  ;;  %v6226_v16 = vunpack.i.h.bf16 %v6224_v20  ;;  %v6225_v54 = vunpack.i.l.bf16 %v6224_v20  ;;  %v6231_v53 = vunpack.i.h.bf16 %v7988_v2  ;;  %v6050_v2 = vld [vmem:[%s8380_s5 + $0x80] sm:$0xff] }
 0x564   : > { %v6034_v20 = vld [vmem:[%s8380_s5] sm:$0xff] }
 0x565   : > { %v3548_v49 = vsel %vm500_vm11, %v6226_v16, %v6230_v52  ;;  %v3547_v33 = vsel %vm500_vm11, %v6225_v54, %v6226_v16  ;;  %v3550_v40 = vsel %vm500_vm11, %v6246_v8, %v6231_v53  ;;  %v8094_v23 = vmax.f32 %v3488_v17, %v6230_v52  ;;  %v6036_v17 = vld [vmem:[%s8380_s5 + $0x10] sm:$0xff]  ;;  %v6042_v16 = vld [vmem:[%s8380_s5 + $0x40] sm:$0xff] }
 0x566   : > { %v7996_v41 = vmax.f32 %v3487_v36, %v3548_v49  ;;  %v7998_v24 = vmax.f32 %v3486_v62, %v3547_v33  ;;  %v8007_v30 = vmax.f32 %v3490_v6, %v3550_v40  ;;  %v6057_v6 = vld [vmem:[%s8380_s5 + $0xb8] sm:$0xff]  ;;  %v6039_v62 = vld [vmem:[%s8380_s5 + $0x28] sm:$0xff]  ;;  %v6060_v52 = vld [vmem:[%s8380_s5 + $0xd0] sm:$0xff] }
 0x567   : > { %3940 = vmatpush.bf16.msrb.mxu1 %v6057_v6  ;;  %v6047_v36 = vld [vmem:[%s8380_s5 + $0x68] sm:$0xff]  ;;  %3914 = vmatpush.bf16.msra.mxu2 %v6039_v62  ;;  %v6066_v49 = vld [vmem:[%s8380_s5 + $0x100] sm:$0xff] }
 0x568   : > { %v6252_v13 = vpack.i.bf16 %v7996_v41, %v7998_v24  ;;  %v6257_v59 = vpack.i.bf16 %v8007_v30, %v8017_v18  ;;  %3928 = vmatpush.bf16.msra.mxu0 %v6047_v36 }
 0x56a   : > { %v6239_v26 = vpop.permute.xlu2 %6238  ;;  %6253 = vrot.lane.b32.xlu1 %v6252_v13, %s8456_s18 }
 0x56b   : > { %v6241_v0 = vunpack.i.h.bf16 %v6239_v26  ;;  %v6240_v32 = vunpack.i.l.bf16 %v6239_v26  ;;  %3941 = vmatpush.bf16.msrb.mxu1 %v6056_v44  ;;  %3915 = vmatpush.bf16.msra.mxu2 %v6038_v3 }
 0x56c   : > { %3929 = vmatpush.bf16.msra.mxu0 %v6046_v14 }
 0x56d   : > { %v3546_v15 = vsel %vm500_vm11, %v6241_v0, %v6225_v54  ;;  %v3545_v21 = vsel %vm500_vm11, %v6240_v32, %v6241_v0  ;;  %v6067_v54 = vld [vmem:[%s8380_s5 + $0x108] sm:$0xff] }
 0x56e   : > { %v8011_v56 = vmax.f32 %v3485_v57, %v3546_v15  ;;  %v8013_v47 = vmax.f32 %v3484_v37, %v3545_v21  ;;  %v6045_v37 = vld [vmem:[%s8380_s5 + $0x58] sm:$0xff]  ;;  %v6052_v57 = vld [vmem:[%s8380_s5 + $0x90] sm:$0xff] }
 0x56f   : > { %3942 = vmatpush.bf16.msrb.mxu1 %v6055_v22  ;;  %3916 = vmatpush.bf16.msra.mxu2 %v6037_v55  ;;  %v6075_v55 = vld [vmem:[%s8381_s6 + $0x38] sm:$0xff] }
 0x570   : > { %v6247_v28 = vpack.i.bf16 %v8011_v56, %v8013_v47  ;;  %3930 = vmatpush.bf16.msra.mxu0 %v6045_v37  ;;  %v6079_v37 = vld [vmem:[%s8381_s6 + $0x58] sm:$0xff] }
 0x572   : > { %6248 = vrot.lane.b32.xlu0 %v6247_v28, %s8456_s18  ;;  %6258 = vrot.lane.b32.xlu1 %v6257_v59, %s8456_s18 }
 0x573   : > { %3943 = vmatpush.bf16.msrb.mxu1 %v6054_v63  ;;  %3917 = vmatpush.bf16.msra.mxu2 %v6036_v17 }
 0x574   : > { %3931 = vmatpush.bf16.msra.mxu0 %v6044_v50  ;;  %v6074_v50 = vld [vmem:[%s8381_s6 + $0x30] sm:$0xff] }
 0x577   : > { %3944 = vmatpush.bf16.msrb.mxu1 %v6053_v19  ;;  %3918 = vmatpush.bf16.msra.mxu2 %v6035_v61  ;;  %v6084_v61 = vld [vmem:[%s8381_s6 + $0x80] sm:$0xff] }
 0x578   : > { %3932 = vmatpush.bf16.msra.mxu0 %v6043_v4 }
 0x57b   : > { %3945 = vmatpush.bf16.msrb.mxu1 %v6052_v57  ;;  %3919 = vmatpush.bf16.msra.mxu2 %v6034_v20  ;;  %v6081_v57 = vld [vmem:[%s8381_s6 + $0x68] sm:$0xff] }
 0x57c   : > { %3933 = vmatpush.bf16.msra.mxu0 %v6042_v16 }
 0x582   : > { %v6234_v42 = vpop.permute.xlu1 %6233 }
 0x583   : > { %v6236_v12 = vunpack.i.h.bf16 %v6234_v42  ;;  %v6235_v9 = vunpack.i.l.bf16 %v6234_v42 }
 0x585   : > { %v3551_v51 = vsel %vm500_vm11, %v6231_v53, %v6235_v9  ;;  %v3552_v31 = vsel %vm500_vm11, %v6235_v9, %v6236_v12  ;;  %v8088_v34 = vmax.f32 %v3493_v43, %v6236_v12  ;;  %v6061_v43 = vld [vmem:[%s8380_s5 + $0xd8] sm:$0xff]  ;;  %v6058_v53 = vld [vmem:[%s8380_s5 + $0xc0] sm:$0xff]  ;;  %vm8516_vm11 = vmmov %vm8514_vm0 }
 0x586   : > { %v8077_v39 = vmax.f32 %v3491_v35, %v3551_v51  ;;  %v8081_v25 = vmax.f32 %v3492_v45, %v3552_v31  ;;  %v6051_v45 = vld [vmem:[%s8380_s5 + $0x88] sm:$0xff]  ;;  %3958 = vmatpush.bf16.msrb.mxu3 %v6061_v43  ;;  %v6080_v43 = vld [vmem:[%s8381_s6 + $0x60] sm:$0xff] }
 0x587   : > { %v6267_v35 = vpack.i.bf16 %v8088_v34, %v8094_v23  ;;  %3946 = vmatpush.bf16.msrb.mxu1 %v6051_v45  ;;  %v6069_v31 = vld [vmem:[%s8381_s6 + $0x8] sm:$0xff]  ;;  %v6078_v45 = vld [vmem:[%s8381_s6 + $0x50] sm:$0xff] }
 0x588   : > { %v6262_v1 = vpack.i.bf16 %v8081_v25, %v8077_v39 }
 0x58a   : > { %6263 = vrot.lane.b32.xlu2 %v6262_v1, %s8456_s18  ;;  %3959 = vmatpush.bf16.msrb.mxu3 %v6060_v52  ;;  %v6077_v1 = vld [vmem:[%s8381_s6 + $0x48] sm:$0xff] }
 0x58b   : > { %3947 = vmatpush.bf16.msrb.mxu1 %v6050_v2  ;;  %4156 = vmatpush.bf16.msrb.mxu0 %v6077_v1 }
 0x58e   : > { %3960 = vmatpush.bf16.msrb.mxu3 %v6059_v60 }
 0x58f   : > { %3974 = vmatpush.bf16.msra.mxu1 %v6067_v54 }
 0x592   : > { %6268 = vrot.lane.b32.xlu2 %v6267_v35, %s8456_s18  ;;  %3961 = vmatpush.bf16.msrb.mxu3 %v6058_v53  ;;  %v6076_v35 = vld [vmem:[%s8381_s6 + $0x40] sm:$0xff] }
 0x593   : > { %3975 = vmatpush.bf16.msra.mxu1 %v6066_v49  ;;  %4157 = vmatpush.bf16.msrb.mxu0 %v6076_v35 }
 0x596   : > { %4012 = vmatpush.bf16.msra.mxu3 %v6069_v31 }
 0x5dc   : > { %v6254_v33 = vpop.permute.xlu1 %6253 }
 0x5dd   : > { %v6256_v8 = vunpack.i.h.bf16 %v6254_v33  ;;  %v6255_v5 = vunpack.i.l.bf16 %v6254_v33 }
 0x5df   : > { %v3605_v13 = vsel %vm8514_vm0, %v6255_v5, %v6256_v8  ;;  %vm8530_vm0 = vmmov %vm8529_vm1 }
 0x5e0   : > { %v3623_v6 = vmax.f32 %v7998_v24, %v3605_v13 }
 0x5e4   : > { %v6264_v40 = vpop.permute.xlu2 %6263  ;;  %v6249_v26 = vpop.permute.xlu0 %6248 }
 0x5e5   : > { %v6266_v0 = vunpack.i.h.bf16 %v6264_v40  ;;  %v6265_v32 = vunpack.i.l.bf16 %v6264_v40  ;;  %v6251_v46 = vunpack.i.h.bf16 %v6249_v26  ;;  %v6250_v15 = vunpack.i.l.bf16 %v6249_v26  ;;  %v6259_v21 = vpop.permute.xlu1 %6258 }
 0x5e6   : > { %v6261_v28 = vunpack.i.h.bf16 %v6259_v21  ;;  %v6260_v59 = vunpack.i.l.bf16 %v6259_v21 }
 0x5e7   : > { %v3609_v58 = vsel %vm8515_vm3, %v6265_v32, %v6266_v0  ;;  %v3604_v38 = vsel %vm8516_vm11, %v6251_v46, %v6255_v5  ;;  %v3603_v44 = vsel %vm8517_vm4, %v6250_v15, %v6251_v46  ;;  %vm8531_vm3 = vmmov %vm8530_vm0 }
 0x5e8   : > { %v3628_v48 = vmax.f32 %v8077_v39, %v3609_v58  ;;  %v3622_v27 = vmax.f32 %v8011_v56, %v3604_v38  ;;  %v3621_v29 = vmax.f32 %v8013_v47, %v3603_v44  ;;  %v3607_v7 = vsel %vm8518_vm10, %v6260_v59, %v6261_v28  ;;  %v6071_v39 = vld [vmem:[%s8381_s6 + $0x18] sm:$0xff]  ;;  %vm8532_vm11 = vmmov %vm8530_vm0 }
 0x5e9   : > { %v3608_v22 = vsel %vm8519_vm15, %v6261_v28, %v6265_v32  ;;  %v3626_v62 = vmax.f32 %v8017_v18, %v3607_v7  ;;  %4048 = vmatpush.bf16.msrb.mxu2 %v6071_v39  ;;  %v6083_v38 = vld [vmem:[%s8381_s6 + $0x78] sm:$0xff]  ;;  %v6082_v7 = vld [vmem:[%s8381_s6 + $0x70] sm:$0xff]  ;;  %vm8533_vm4 = vmmov %vm8530_vm0 }
 0x5ea   : > { %v3627_v24 = vmax.f32 %v8007_v30, %v3608_v22  ;;  %v3633_v36 = vpack.c.bf16 %v3628_v48, %v3623_v6  ;;  %v6087_v44 = vld [vmem:[%s8381_s6 + $0x98] sm:$0xff]  ;;  %v6086_v22 = vld [vmem:[%s8381_s6 + $0x90] sm:$0xff]  ;;  %vm8534_vm10 = vmmov %vm8530_vm0 }
 0x5eb   : > { %v3631_v10 = vpack.c.bf16 %v3626_v62, %v3621_v29  ;;  %v6093_v29 = vld [vmem:[%s8381_s6 + $0xc8] sm:$0xff]  ;;  %v6088_v62 = vld [vmem:[%s8381_s6 + $0xa0] sm:$0xff]  ;;  %vm8535_vm15 = vmmov %vm8530_vm0 }
 0x5ec   : > { %v6269_v63 = vpop.permute.xlu2 %6268  ;;  %3948 = vmatmul.bf16.vlgmr.msrb.gmra.mxu1 %v3633_v36  ;;  %v3632_v3 = vpack.c.bf16 %v3627_v24, %v3622_v27  ;;  %v6089_v27 = vld [vmem:[%s8381_s6 + $0xa8] sm:$0xff]  ;;  %v6092_v24 = vld [vmem:[%s8381_s6 + $0xc0] sm:$0xff] }
 0x5ed   : > { %v6271_v14 = vunpack.i.h.bf16 %v6269_v63  ;;  %v6270_v19 = vunpack.i.l.bf16 %v6269_v63  ;;  %3920 = vmatmul.bf16.vlgmr.msra.gmra.mxu2 %v3631_v10 }
 0x5ee   : > { %3934 = vmatmul.bf16.vlgmr.msra.gmra.mxu0 %v3632_v3 }
 0x5ef   : > { %v3606_v56 = vsel %vm8520_vm14, %v6256_v8, %v6270_v19  ;;  %v3610_v47 = vsel %vm8521_vm6, %v6266_v0, %v6271_v14  ;;  %v3630_v30 = vmax.f32 %v8088_v34, %v6271_v14  ;;  %v3625_v9 = vmax.f32 %v8094_v23, %v6270_v19  ;;  %v6070_v34 = vld [vmem:[%s8381_s6 + $0x10] sm:$0xff]  ;;  %v6072_v23 = vld [vmem:[%s8381_s6 + $0x20] sm:$0xff]  ;;  %4300 = vmatpush.bf16.msra.mxu0 %v6085_v11  ;;  %vm8536_vm14 = vmmov %vm8530_vm0 }
 0x5f0   : > { %v3624_v42 = vmax.f32 %v7996_v41, %v3606_v56  ;;  %v3629_v12 = vmax.f32 %v8081_v25, %v3610_v47  ;;  %v6068_v41 = vld [vmem:[%s8381_s6] sm:$0xff]  ;;  %v6073_v25 = vld [vmem:[%s8381_s6 + $0x28] sm:$0xff]  ;;  %4049 = vmatpush.bf16.msrb.mxu2 %v6070_v34  ;;  %v6091_v56 = vld [vmem:[%s8381_s6 + $0xb8] sm:$0xff] }
 0x5f1   : > { %v3635_v51 = vpack.c.bf16 %v3630_v30, %v3625_v9  ;;  %4013 = vmatpush.bf16.msra.mxu3 %v6068_v41  ;;  %4084 = vmatpush.bf16.msrb.mxu1 %v6073_v25  ;;  %v6095_v47 = vld [vmem:[%s8381_s6 + $0xd8] sm:$0xff]  ;;  %v6090_v30 = vld [vmem:[%s8381_s6 + $0xb0] sm:$0xff]  ;;  %vm8537_vm6 = vmmov %vm8530_vm0 }
 0x5f2   : > { %v3634_v18 = vpack.c.bf16 %v3629_v12, %v3624_v42  ;;  %v6094_v9 = vld [vmem:[%s8381_s6 + $0xd0] sm:$0xff] }
 0x5f3   : > { %4301 = vmatpush.bf16.msra.mxu0 %v6084_v61 }
 0x5f4   : > { %3962 = vmatmul.bf16.vlgmr.msrb.gmra.mxu3 %v3634_v18  ;;  %4192 = vmatpush.bf16.msra.mxu2 %v6079_v37  ;;  %v6097_v18 = vld [vmem:[%s8381_s6 + $0xe8] sm:$0xff]  ;;  %v6098_v37 = vld [vmem:[%s8381_s6 + $0xf0] sm:$0xff] }
 0x5f5   : > { %4085 = vmatpush.bf16.msrb.mxu1 %v6072_v23  ;;  %4120 = vmatpush.bf16.msrb.mxu3 %v6075_v55  ;;  %v6099_v23 = vld [vmem:[%s8381_s6 + $0xf8] sm:$0xff] }
 0x5f8   : > { %4193 = vmatpush.bf16.msra.mxu2 %v6078_v45 }
 0x5f9   : > { %4121 = vmatpush.bf16.msrb.mxu3 %v6074_v50 }
 0x5fc   : > { %5605 = vmatmul.msk.bf16.vlgmr.msra.gmra.mxu1 %vm8522_vm8, %v3635_v51  ;;  %v6096_v51 = vld [vmem:[%s8381_s6 + $0xe0] sm:$0xff]  ;;  %vm8538_vm8 = vmmov %vm8530_vm0 }
 0x5fd   : > { %4228 = vmatpush.bf16.msra.mxu1 %v6081_v57 }
 0x601   : > { %4229 = vmatpush.bf16.msra.mxu1 %v6080_v43 }
 0x669   : > { %v3949_v17 = vpop.f32.mrf.mxu1 }
 0x66b   : > { %v3935_v4 = vpop.f32.mrf.mxu0 }
 0x670   : > { %v3921_v2 = vpop.f32.mrf.mxu2 }
 0x671   : > { %v3951_v52 = vpop.f32.mrf.mxu1  ;;  %v3936_v20 = vadd.f32 %v3935_v4, %v3921_v2 }
 0x673   : > { %v3950_v16 = vadd.f32 %v3949_v17, %v3936_v20  ;;  %v3937_v49 = vpop.f32.mrf.mxu0 }
 0x677   : > { %v3963_v54 = vpop.f32.mrf.mxu3 }
 0x678   : > { %v3964_v60 = vadd.f32 %v3963_v54, %v3950_v16  ;;  %v3923_v53 = vpop.f32.mrf.mxu2 }
 0x679   : > { %v3977_v33 = vpop.f32.mrf.mxu1  ;;  %v3938_v8 = vadd.f32 %v3937_v49, %v3923_v53 }
 0x67a   : > { %v3978_v5 = vadd.f32 %v3977_v33, %v3964_v60  ;;  %v6107_v33 = vld [vmem:[%s8383_s8 + $0x38] sm:$0xff] }
 0x67b   : > { %v3952_v13 = vadd.f32 %v3951_v52, %v3938_v8  ;;  %v3984_v8 = vld [vmem:[%s8382_s7] sm:$0x1] }
 0x67c   : > { %3982 = vst.msk [vmem:[#allocation7] sm:$0xff] %vm8523_vm13, %v3978_v5  ;;  %vm8539_vm13 = vmmov %vm8530_vm0 }
 0x67f   : > { %v3965_v40 = vpop.f32.mrf.mxu3 }
 0x680   : > { %v3966_v26 = vadd.f32 %v3965_v40, %v3952_v13  ;;  %v6106_v40 = vld [vmem:[%s8383_s8 + $0x30] sm:$0xff] }
 0x681   : > { %v3979_v0 = vpop.f32.mrf.mxu1 }
 0x682   : > { %v3980_v32 = vadd.f32 %v3979_v0, %v3966_v26 }
 0x683   : > { %v3985_v46 = vld [vmem:[#allocation7] sm:$0x1]  ;;  %v4020_v15 = vld [vmem:[#allocation7 + $0x1] sm:$0x1]  ;;  %v4056_v21 = vld [vmem:[#allocation7 + $0x2] sm:$0x1] }
 0x684   : > { %3983 = vst.msk [vmem:[#allocation7 + $0x8] sm:$0xff] %vm8524_vm12, %v3980_v32  ;;  %v3986_v28 = vpack.c.bf16 %v3985_v46, %v3985_v46  ;;  %v4021_v59 = vpack.c.bf16 %v4020_v15, %v4020_v15  ;;  %v4057_v6 = vpack.c.bf16 %v4056_v21, %v4056_v21  ;;  %v4128_v58 = vld [vmem:[#allocation7 + $0x4] sm:$0x1]  ;;  %v4092_v36 = vld [vmem:[#allocation7 + $0x3] sm:$0x1]  ;;  %vm8540_vm12 = vmmov %vm8530_vm0 }
 0x685   : > { %v4129_v48 = vpack.c.bf16 %v4128_v58, %v4128_v58  ;;  %v4164_v10 = vld [vmem:[#allocation7 + $0x5] sm:$0x1]  ;;  %v4200_v63 = vld [vmem:[#allocation7 + $0x6] sm:$0x1]  ;;  %v4093_v14 = vpack.c.bf16 %v4092_v36, %v4092_v36  ;;  %v4236_v31 = vld [vmem:[#allocation7 + $0x7] sm:$0x1] }
 0x686   : > { %5614 = vmatmul.msk.bf16.vlgmr.msra.gmra.mxu3 %vm8525_vm9, %v3986_v28  ;;  %5627 = vmatmul.msk.bf16.vlgmr.msrb.gmra.mxu2 %vm8526_vm2, %v4021_v59  ;;  %v4165_v19 = vpack.c.bf16 %v4164_v10, %v4164_v10  ;;  %v4201_v42 = vpack.c.bf16 %v4200_v63, %v4200_v63  ;;  %v4237_v1 = vpack.c.bf16 %v4236_v31, %v4236_v31  ;;  %v6105_v28 = vld [vmem:[%s8383_s8 + $0x28] sm:$0xff]  ;;  %vm4724_vm2 = vcmask 1040384  }
 0x687   : > { %5640 = vmatmul.msk.bf16.vlgmr.msrb.gmra.mxu1 %vm8527_vm5, %v4057_v6  ;;  %5666 = vmatmul.msk.bf16.vlgmr.msrb.gmra.mxu0 %vm8528_vm7, %v4129_v48  ;;  %v6104_v6 = vld [vmem:[%s8383_s8 + $0x20] sm:$0xff]  ;;  %v6103_v48 = vld [vmem:[%s8383_s8 + $0x18] sm:$0xff]  ;;  %v6113_v31 = vld [vmem:[%s8385_s10 + $0x28] sm:$0xff] }
 0x688   : > { %4264 = vmatpush.bf16.msra.mxu3 %v6083_v38  ;;  %4336 = vmatpush.bf16.msrb.mxu2 %v6087_v44 }
 0x689   : > { %4372 = vmatpush.bf16.msrb.mxu1 %v6089_v27  ;;  %4444 = vmatpush.bf16.msrb.mxu0 %v6093_v29 }
 0x68b   : > { %v4272_v3 = vld [vmem:[#allocation7 + $0x8] sm:$0x1]  ;;  %v4308_v41 = vld [vmem:[#allocation7 + $0x9] sm:$0x1]  ;;  %v4344_v39 = vld [vmem:[#allocation7 + $0xa] sm:$0x1] }
 0x68c   : > { %4265 = vmatpush.bf16.msra.mxu3 %v6082_v7  ;;  %4337 = vmatpush.bf16.msrb.mxu2 %v6086_v22  ;;  %v4273_v12 = vpack.c.bf16 %v4272_v3, %v4272_v3  ;;  %v4416_v25 = vld [vmem:[#allocation7 + $0xc] sm:$0x1]  ;;  %v4309_v34 = vpack.c.bf16 %v4308_v41, %v4308_v41  ;;  %v4345_v35 = vpack.c.bf16 %v4344_v39, %v4344_v39  ;;  %v4380_v57 = vld [vmem:[#allocation7 + $0xb] sm:$0x1]  ;;  %v4452_v11 = vld [vmem:[#allocation7 + $0xd] sm:$0x1] }
 0x68d   : > { %4373 = vmatpush.bf16.msrb.mxu1 %v6088_v62  ;;  %4445 = vmatpush.bf16.msrb.mxu0 %v6092_v24  ;;  %v4417_v55 = vpack.c.bf16 %v4416_v25, %v4416_v25  ;;  %v4488_v17 = vld [vmem:[#allocation7 + $0xe] sm:$0x1]  ;;  %v4381_v50 = vpack.c.bf16 %v4380_v57, %v4380_v57  ;;  %v4453_v45 = vpack.c.bf16 %v4452_v11, %v4452_v11  ;;  %v4524_v61 = vld [vmem:[#allocation7 + $0xf] sm:$0x1] }
 0x68e   : > { %v4489_v43 = vpack.c.bf16 %v4488_v17, %v4488_v17  ;;  %v4525_v4 = vpack.c.bf16 %v4524_v61, %v4524_v61  ;;  %v6102_v22 = vld [vmem:[%s8383_s8 + $0x10] sm:$0xff] }
 0x68f   : > { %v6110_v11 = vld [vmem:[%s8385_s10 + $0x10] sm:$0xff] }
 0x696   : > { %5653 = vmatmul.msk.bf16.vlgmr.msrb.gmra.mxu3 %vm8529_vm1, %v4093_v14  ;;  %5679 = vmatmul.msk.bf16.vlgmr.msra.gmra.mxu2 %vm8530_vm0, %v4165_v19  ;;  %v6101_v14 = vld [vmem:[%s8383_s8 + $0x8] sm:$0xff] }
 0x697   : > { %5692 = vmatmul.msk.bf16.vlgmr.msra.gmra.mxu1 %vm8531_vm3, %v4201_v42  ;;  %5718 = vmatmul.msk.bf16.vlgmr.msra.gmra.mxu0 %vm8532_vm11, %v4273_v12  ;;  %v6115_v12 = vld [vmem:[%s8385_s10 + $0x38] sm:$0xff]  ;;  %vm4749_vm3 = vcmask 73728  }
 0x698   : > { %4408 = vmatpush.bf16.msrb.mxu3 %v6091_v56  ;;  %4480 = vmatpush.bf16.msra.mxu2 %v6095_v47  ;;  %v6100_v56 = vld [vmem:[%s8383_s8] sm:$0xff] }
 0x699   : > { %4516 = vmatpush.bf16.msra.mxu1 %v6097_v18  ;;  %4627 = vmatpush.bf16.msra.mxu0 %v6107_v33 }
 0x69c   : > { %4409 = vmatpush.bf16.msrb.mxu3 %v6090_v30  ;;  %4481 = vmatpush.bf16.msra.mxu2 %v6094_v9  ;;  %v6114_v30 = vld [vmem:[%s8385_s10 + $0x30] sm:$0xff] }
 0x69d   : > { %4517 = vmatpush.bf16.msra.mxu1 %v6096_v51  ;;  %4628 = vmatpush.bf16.msra.mxu0 %v6106_v40 }
 0x6a1   : > { %4629 = vmatpush.bf16.msra.mxu0 %v6105_v28 }
 0x6a5   : > { %4630 = vmatpush.bf16.msra.mxu0 %v6104_v6 }
 0x6a6   : > { %5705 = vmatmul.msk.bf16.vlgmr.msra.gmra.mxu3 %vm8533_vm4, %v4237_v1  ;;  %5731 = vmatmul.msk.bf16.vlgmr.msrb.gmra.mxu2 %vm8534_vm10, %v4309_v34  ;;  %v6112_v1 = vld [vmem:[%s8385_s10 + $0x20] sm:$0xff] }
 0x6a7   : > { %5744 = vmatmul.msk.bf16.vlgmr.msrb.gmra.mxu1 %vm8535_vm15, %v4345_v35  ;;  %5770 = vmatmul.msk.bf16.vlgmr.msrb.gmra.mxu0 %vm8536_vm14, %v4417_v55  ;;  %v6111_v35 = vld [vmem:[%s8385_s10 + $0x18] sm:$0xff] }
 0x6a8   : > { %4552 = vmatpush.bf16.msra.mxu3 %v6099_v23  ;;  %4707 = vmatpush.bf16.msrb.mxu2 %v6115_v12 }
 0x6a9   : > { %4631 = vmatpush.bf16.msra.mxu0 %v6103_v48 }
 0x6ac   : > { %4553 = vmatpush.bf16.msra.mxu3 %v6098_v37  ;;  %4708 = vmatpush.bf16.msrb.mxu2 %v6114_v30 }
 0x6ad   : > { %4632 = vmatpush.bf16.msra.mxu0 %v6102_v22 }
 0x6b0   : > { %4709 = vmatpush.bf16.msrb.mxu2 %v6113_v31 }
 0x6b1   : > { %4633 = vmatpush.bf16.msra.mxu0 %v6101_v14 }
 0x6b4   : > { %4710 = vmatpush.bf16.msrb.mxu2 %v6112_v1 }
 0x6b5   : > { %4634 = vmatpush.bf16.msra.mxu0 %v6100_v56 }
 0x6b6   : > { %5757 = vmatmul.msk.bf16.vlgmr.msrb.gmra.mxu3 %vm8537_vm6, %v4381_v50  ;;  %5783 = vmatmul.msk.bf16.vlgmr.msra.gmra.mxu2 %vm8538_vm8, %v4453_v45 }
 0x6b7   : > { %5796 = vmatmul.msk.bf16.vlgmr.msra.gmra.mxu1 %vm8539_vm13, %v4489_v43 }
 0x6b8   : > { %4711 = vmatpush.bf16.msrb.mxu2 %v6111_v35 }
 0x6bc   : > { %4712 = vmatpush.bf16.msrb.mxu2 %v6110_v11 }
 0x6c6   : > { %5809 = vmatmul.msk.bf16.vlgmr.msra.gmra.mxu3 %vm8540_vm12, %v4525_v4 }
 0x704   : > { %v4087_v2 = vpop.f32.mrf.mxu1  ;;  %v4159_v52 = vpop.f32.mrf.mxu0 }
 0x709   : > { %v4015_v20 = vpop.f32.mrf.mxu3  ;;  %v4051_v16 = vpop.f32.mrf.mxu2 }
 0x70a   : > { %v4019_v26 = vadd.f32 %v4015_v20, %v3984_v8  ;;  %v6108_v20 = vld [vmem:[%s8385_s10] sm:$0xff]  ;;  %v4720_v8 = vlaneseq }
 0x70c   : > { %v4089_v54 = vpop.f32.mrf.mxu1  ;;  %v4161_v60 = vpop.f32.mrf.mxu0  ;;  %v4055_v46 = vadd.f32 %v4051_v16, %v4019_v26  ;;  %v4578_v16 = vld [vmem:[%s8384_s9] sm:$0x1] }
 0x70e   : > { %v4091_v59 = vadd.f32 %v4087_v2, %v4055_v46 }
 0x711   : > { %v4017_v53 = vpop.f32.mrf.mxu3  ;;  %v4053_v49 = vpop.f32.mrf.mxu2 }
 0x714   : > { %v4231_v5 = vpop.f32.mrf.mxu1  ;;  %v4303_v13 = vpop.f32.mrf.mxu0 }
 0x719   : > { %v4123_v0 = vpop.f32.mrf.mxu3  ;;  %v4195_v32 = vpop.f32.mrf.mxu2 }
 0x71a   : > { %v4127_v58 = vadd.f32 %v4123_v0, %v4091_v59 }
 0x71c   : > { %v4233_v15 = vpop.f32.mrf.mxu1  ;;  %v4305_v21 = vpop.f32.mrf.mxu0  ;;  %v4163_v27 = vadd.f32 %v4159_v52, %v4127_v58  ;;  %v6109_v52 = vld [vmem:[%s8385_s10 + $0x8] sm:$0xff] }
 0x71d   : > { %4713 = vmatpush.bf16.msrb.mxu2 %v6109_v52 }
 0x71e   : > { %v4199_v62 = vadd.f32 %v4195_v32, %v4163_v27 }
 0x720   : > { %v4235_v10 = vadd.f32 %v4231_v5, %v4199_v62  ;;  %v4721_v5 = vand.u32 127, %v4720_v8 }
 0x721   : > { %v4125_v38 = vpop.f32.mrf.mxu3  ;;  %v4197_v44 = vpop.f32.mrf.mxu2  ;;  %4714 = vmatpush.bf16.msrb.mxu2 %v6108_v20 }
 0x722   : > { %vm4722_vm9 = vcmp.lt.s32.totalorder %v4721_v5, 10 }
 0x724   : > { %v4375_v29 = vpop.f32.mrf.mxu1  ;;  %v4447_v7 = vpop.f32.mrf.mxu0 }
 0x729   : > { %v4267_v24 = vpop.f32.mrf.mxu3  ;;  %v4339_v36 = vpop.f32.mrf.mxu2 }
 0x72a   : > { %v4271_v19 = vadd.f32 %v4267_v24, %v4235_v10 }
 0x72c   : > { %v4377_v63 = vpop.f32.mrf.mxu1  ;;  %v4449_v3 = vpop.f32.mrf.mxu0  ;;  %v4307_v18 = vadd.f32 %v4303_v13, %v4271_v19  ;;  %v4658_v13 = vld [vmem:[%s8386_s11] sm:$0x1] }
 0x72e   : > { %v4343_v51 = vadd.f32 %v4339_v36, %v4307_v18 }
 0x730   : > { %v4379_v25 = vadd.f32 %v4375_v29, %v4343_v51 }
 0x731   : > { %v4269_v47 = vpop.f32.mrf.mxu3  ;;  %v4341_v42 = vpop.f32.mrf.mxu2 }
 0x734   : > { %v4519_v9 = vpop.f32.mrf.mxu1 }
 0x739   : > { %v4411_v41 = vpop.f32.mrf.mxu3  ;;  %v4483_v39 = vpop.f32.mrf.mxu2 }
 0x73a   : > { %v4415_v34 = vadd.f32 %v4411_v41, %v4379_v25 }
 0x73c   : > { %v4521_v23 = vpop.f32.mrf.mxu1  ;;  %v4451_v55 = vadd.f32 %v4447_v7, %v4415_v34 }
 0x73e   : > { %v4487_v17 = vadd.f32 %v4483_v39, %v4451_v55 }
 0x740   : > { %v4523_v50 = vadd.f32 %v4519_v9, %v4487_v17 }
 0x741   : > { %v4413_v37 = vpop.f32.mrf.mxu3  ;;  %v4485_v57 = vpop.f32.mrf.mxu2 }
 0x749   : > { %v4555_v45 = vpop.f32.mrf.mxu3 }
 0x74a   : > { %v4559_v43 = vadd.f32 %v4555_v45, %v4523_v50 }
 0x74c   : > { %v4560_v61 = vmax.f32 %v4559_v43, 0.0 }
 0x74e   : > { %v4561_v4 = vpack.c.bf16 %v4560_v61, %v4560_v61 }
 0x750   : > { %4635 = vmatmul.bf16.vlgmr.msra.gmra.mxu0 %v4561_v4 }
 0x751   : > { %v4557_v2 = vpop.f32.mrf.mxu3 }
 0x7cd   : > { %v4636_v54 = vpop.f32.mrf.mxu0 }
 0x7ce   : > { %v4637_v60 = vadd.f32 %v4636_v54, %v4578_v16 }
 0x7d0   : > { %v4640_v53 = vmax.f32 %v4637_v60, 0.0 }
 0x7d2   : > { %v4641_v49 = vpack.c.bf16 %v4640_v53, %v4640_v53 }
 0x7d4   : > { %4715 = vmatmul.bf16.vlgmr.msrb.gmra.mxu2 %v4641_v49 }
 0x7d5   : > { %v4638_v33 = vpop.f32.mrf.mxu0 }
 0x857   : > { %v4716_v40 = vpop.f32.mrf.mxu2 }
 0x858   : > { %v4717_v26 = vadd.f32 %v4716_v40, %v4658_v13 }
 0x85a   : > { %v4723_v0 = vsel %vm4722_vm9, %v4717_v26, -inf }
 0x85b   : > { %v4725_v32 = vsel %vm4724_vm2, %v4723_v0, -inf }
 0x85c   : > { %4726 = vmax.xlane.f32.xlu0 %v4725_v32 }
 0x85f   : > { %v4718_v46 = vpop.f32.mrf.mxu2 }
 0x8cf   : > { %v4727_v15 = vpop.xlane.xlu0 %4726 }
 0x8d0   : > { %v4728_v21 = vsub.f32 %v4723_v0, %v4727_v15 }
 0x8d2   : > { %v4729_v28 = vmul.f32 1.442695, %v4728_v21 }
 0x8d4   : > { %6272 = vpow2.f32 %v4729_v28 }
 0x8da   : > { %v6273_v59 = vpop.eup %6272 }
 0x8db   : > { %v4731_v6 = vsel %vm4724_vm2, %v6273_v59, 0.0 }
 0x8dc   : > { %4732 = vadd.xlane.f32.xlu1 %v4731_v6 }
 0x94f   : > { %v4733_v58 = vpop.xlane.xlu1 %4732 }
 0x950   : > { %6274 = vrcp.f32 %v4733_v58  ;;  %v4745_v27 = vand.u32 2147483648, %v4733_v58  ;;  %v4743_v7 = vand.u32 2147483647, %v4733_v58  ;;  %vm4739_vm7 = vweird.f32 %v4733_v58 }
 0x952   : > { %v4746_v62 = vor.u32 1.1754944e-38, %v4745_v27  ;;  %vm4744_vm0 = vcmp.eq.f32.partialorder %v4743_v7, 8.507059e+37 }
 0x956   : > { %v6275_v38 = vpop.eup %6274 }
 0x957   : > { %v4735_v44 = vmul.f32 %v6275_v38, %v4733_v58  ;;  %vm4740_vm5 = vweird.f32 %v6275_v38 }
 0x958   : > { %vm4741_vm1 = vmor %vm4739_vm7, %vm4740_vm5 }
 0x959   : > { %v4736_v48 = vsub.f32 1.0, %v4735_v44 }
 0x95b   : > { %v4737_v29 = vmul.f32 %v6275_v38, %v4736_v48 }
 0x95d   : > { %v4738_v22 = vadd.f32 %v6275_v38, %v4737_v29 }
 0x95f   : > { %v4742_v24 = vsel %vm4741_vm1, %v6275_v38, %v4738_v22 }
 0x960   : > { %v4747_v36 = vsel %vm4744_vm0, %v4746_v62, %v4742_v24 }
 0x961   : > { %v4748_v10 = vmul.f32 %v6273_v59, %v4747_v36 }
 0x963   : > { %4750 = vst.msk [vmem:[%s405_s20] sm:$0x1] %vm4749_vm3, %v4748_v10 }
 0x964   : > { %6303 = shalt.err (!%p6300_p3)
}
 0x965   : > { %6117 = dma.vmem_to_hbm [thread:$0]  (%p6467_p5), %s4763_s23, 16, %s4765_s29, %s4752_s15  }
 0x966 PF: > { %s8541_s16 = sld [smem:[#allocation13_spill]] }
 0x967   : > { %s8542_s18 = sld [smem:[#allocation11_spill]] }
 0x96c   : > { %p6123_p4 = scmp.ge.s32.totalorder %s8541_s16, 2 }
 0x96d   : > { %s4776_s27 = sand.u32 1, %s8542_s18  }
 0x96e   : > { %p6120_p7 = pnand %p6123_p4, %p6471_p6  ;;  %s4777_s30 = scalar_lea.sflag [#allocation9], %s4776_s27 }
 0x970   : > { %p6121_p8 = pneg %p6120_p7 }
 0x972   : > { %6321 = dma.done.wait (%p6121_p8), %s4777_s30, 16  }
 0x973   : > { %6323 = vsyncadd (%p6121_p8), %s4777_s30, 4294967280  ;;  %s8544_s24 = sld [smem:[#allocation14_spill]]  ;;  %s8547_s21 = smov %s6330_s22 }
 0x974   : > { %s8545_s14 = sld [smem:[#allocation12_spill]] }
 0x975   : > { %s8546_s23 = sld [smem:[#allocation15_spill]] }
 0x979   : > { %p22_p9 = scmp.ge.s32.totalorder %s8544_s24, 4  }
 0x97a   : > { %s8548_s22 = smov %s8545_s14 }
 0x97b   :  { %24 = sbr.rel (!%p22_p9) target bundleno = 5 (0x5), region = 118 }
 0x980   :  { %4782 = vsyncpa [#allocation9], 1 }
 0x981   :  { %4784 = vsyncpa [#allocation9 + $0x1], 1 }

</bundles_post_ra>
